<compile_context>
chip_gen: v5e
topology: v5e:2x2
jax: 0.10.0
libtpu: 0.0.40
codegen_flags: <defaults>
</compile_context>

<pallas_src>
import functools
import math

import jax
import jax.numpy as jnp
from jax import lax
from jax.experimental import pallas as pl
from jax.experimental.pallas import tpu as pltpu


# ---------------------------------------------------------------------------
# Fused per-level DAFNeHead kernel (channel-major layout).
# ---------------------------------------------------------------------------
def _dafne_level_kernel(x_ref, wt_ref, bt_ref, wcls_ref, bcls_ref,
                        wreg_ref, breg_ref, rscale_ref,
                        o_cls_ref, o_reg_ref, o_clst_ref, o_cort_ref,
                        *, H, W):
    # x_ref:     (C, H*W)        f32   channel-major feature (batch squeezed)
    # wt_ref:    (5, C, 9*C)     bf16  tower conv weights (share, cls0, cls1,
    #                                   cor0, cor1), row-major (Cout, 9*Cin)
    # bt_ref:    (5, C, 1)       f32   tower conv biases
    # wcls_ref:  (NC, 9*C)       bf16  cls_logits weights
    # bcls_ref:  (NC, 1)         f32
    # wreg_ref:  (9, 9*C)        bf16  merged corners_pred(8) + ctrness(1)
    # breg_ref:  (9, 1)          f32
    # rscale_ref:(9, 1)          f32   [scale]*8 + [1.0]
    # outputs:   (Cout, H*W)     f32   lane-dense, channel-major (== NCHW)
    HW = H * W

    # image column of every flattened pixel (masks the row-boundary wrap of
    # the dx = +/-1 taps; zero padding at the image border).
    col_id = lax.broadcasted_iota(jnp.int32, (1, HW), 1) % W
    mask_l = col_id >= 1           # left  neighbour (dx = -1) exists
    mask_r = col_id < (W - 1)      # right neighbour (dx = +1) exists

    def _shift(a, off):
        # s[:, i] = a[:, i + off] if 0 <= i + off < HW else 0   (no wrap)
        if off == 0:
            return a
        z = jnp.zeros((a.shape[0], abs(off)), a.dtype)
        if off > 0:
            return jnp.concatenate([a[:, off:], z], axis=1)
        return jnp.concatenate([z, a[:, :off]], axis=1)

    def _im2col_t(a):
        # a: (C, HW) f32 -> (9*C, HW) bf16, rows grouped tap-major
        # (tap = ky*3 + kx), matching the (Cout, 9*Cin) weight layout.
        rows = []
        for dy in (-1, 0, 1):
            for dx in (-1, 0, 1):
                s = _shift(a, dy * W + dx)
                if dx == -1:
                    s = jnp.where(mask_l, s, 0.0)
                elif dx == 1:
                    s = jnp.where(mask_r, s, 0.0)
                rows.append(s)
        return jnp.concatenate(rows, axis=0).astype(jnp.bfloat16)

    def _conv(a, w_t, b, relu):
        # single K=9*C MXU matmul: (Cout, 9C) @ (9C, HW) -> (Cout, HW) f32
        out = jnp.dot(w_t, _im2col_t(a), preferred_element_type=jnp.float32)
        out = out + b
        if relu:
            out = jnp.maximum(out, 0.0)
        return out

    x = x_ref[...]                                   # (C, HW) f32
    x = _conv(x, wt_ref[0], bt_ref[0], True)         # share_tower (1 conv)
    c = _conv(x, wt_ref[1], bt_ref[1], True)         # cls_tower conv 0
    c = _conv(c, wt_ref[2], bt_ref[2], True)         # cls_tower conv 1
    r = _conv(x, wt_ref[3], bt_ref[3], True)         # corners_tower conv 0
    r = _conv(r, wt_ref[4], bt_ref[4], True)         # corners_tower conv 1

    o_clst_ref[...] = c                              # cls_tower (towers dict)
    o_cort_ref[...] = r                              # corners_tower
    o_cls_ref[...] = _conv(c, wcls_ref[...], bcls_ref[...], False)
    # merged corners_pred + ctrness (CTR_ON_REG=True -> both read cor_tower);
    # per-level Scale applies only to the 8 corner rows (rscale = [s]*8+[1]).
    o_reg_ref[...] = (_conv(r, wreg_ref[...], breg_ref[...], False)
                      * rscale_ref[...])


# ---------------------------------------------------------------------------
# Parameter packing: flatten 3x3 HWIO weights to (Cout, 9*Cin), cast to bf16,
# merge corners_pred + ctrness. Done once per forward.
# ---------------------------------------------------------------------------
def _pack_head_params(params):
    def flat_wT(w):                       # (3,3,Cin,Cout) -> (Cout, 9*Cin)
        k0, k1, cin, cout = w.shape
        return w.reshape(k0 * k1 * cin, cout).T

    tower = (params["share_tower"] + params["cls_tower"]
             + params["corners_tower"])                       # 5 convs, C->C
    w_tower = jnp.stack([flat_wT(w) for (w, _) in tower]).astype(jnp.bfloat16)
    b_tower = jnp.stack([b.reshape(-1, 1) for (_, b) in tower])
    w_cls = flat_wT(params["cls_logits"][0]).astype(jnp.bfloat16)
    b_cls = params["cls_logits"][1].reshape(-1, 1)
    w_reg = jnp.concatenate(
        [flat_wT(params["corners_pred"][0]), flat_wT(params["ctrness"][0])],
        axis=0).astype(jnp.bfloat16)                          # (9, 9*C)
    b_reg = jnp.concatenate(
        [params["corners_pred"][1], params["ctrness"][1]]).reshape(-1, 1)
    return dict(w_tower=w_tower, b_tower=b_tower, w_cls=w_cls, b_cls=b_cls,
                w_reg=w_reg, b_reg=b_reg)


def _dafne_level_call(packed, feat_nchw, scale, num_classes):
    N, C, H, W = feat_nchw.shape
    HW = H * W
    K = 9 * C
    x_cm = feat_nchw.reshape(N, C, HW)          # channel-major; free reshape
    rscale = jnp.concatenate(
        [jnp.full((8,), scale, jnp.float32), jnp.ones((1,), jnp.float32)]
    ).reshape(9, 1)

    kernel = functools.partial(_dafne_level_kernel, H=H, W=W)
    out_shape = (
        jax.ShapeDtypeStruct((N, num_classes, HW), jnp.float32),
        jax.ShapeDtypeStruct((N, 9, HW), jnp.float32),
        jax.ShapeDtypeStruct((N, C, HW), jnp.float32),
        jax.ShapeDtypeStruct((N, C, HW), jnp.float32),
    )
    o_cls, o_reg, o_clst, o_cort = pl.pallas_call(
        kernel,
        out_shape=out_shape,
        grid=(N,),
        in_specs=[
            pl.BlockSpec((None, C, HW), lambda n: (n, 0, 0)),
            pl.BlockSpec((5, C, K), lambda n: (0, 0, 0)),
            pl.BlockSpec((5, C, 1), lambda n: (0, 0, 0)),
            pl.BlockSpec((num_classes, K), lambda n: (0, 0)),
            pl.BlockSpec((num_classes, 1), lambda n: (0, 0)),
            pl.BlockSpec((9, K), lambda n: (0, 0)),
            pl.BlockSpec((9, 1), lambda n: (0, 0)),
            pl.BlockSpec((9, 1), lambda n: (0, 0)),
        ],
        out_specs=(
            pl.BlockSpec((None, num_classes, HW), lambda n: (n, 0, 0)),
            pl.BlockSpec((None, 9, HW), lambda n: (n, 0, 0)),
            pl.BlockSpec((None, C, HW), lambda n: (n, 0, 0)),
            pl.BlockSpec((None, C, HW), lambda n: (n, 0, 0)),
        ),
        compiler_params=pltpu.CompilerParams(
            dimension_semantics=("parallel",)),
    )(x_cm, packed["w_tower"], packed["b_tower"], packed["w_cls"],
      packed["b_cls"], packed["w_reg"], packed["b_reg"], rscale)

    logits = o_cls.reshape(N, num_classes, H, W)
    corners = o_reg[:, :8, :].reshape(N, 8, H, W)
    ctr = o_reg[:, 8:, :].reshape(N, 1, H, W)
    cls_t = o_clst.reshape(N, C, H, W)
    cor_t = o_cort.reshape(N, C, H, W)
    return logits, corners, ctr, cls_t, cor_t


# ---------------------------------------------------------------------------
# compute_locations (pure index math -> plain JAX glue)
# ---------------------------------------------------------------------------
def compute_locations_jax(h, w, stride):
    shifts_x = jnp.arange(0, w * stride, step=stride, dtype=jnp.float32)
    shifts_y = jnp.arange(0, h * stride, step=stride, dtype=jnp.float32)
    shift_y, shift_x = jnp.meshgrid(shifts_y, shifts_x, indexing="ij")
    locations = jnp.stack(
        (shift_x.reshape(-1), shift_y.reshape(-1)), axis=1) + stride // 2
    return locations


# ---------------------------------------------------------------------------
# Parameter init (deterministic, mirrors the PyTorch __init__)
# ---------------------------------------------------------------------------
def init_params(key, cfg):
    C = cfg["in_channels"]

    def conv_param(k, cin, cout, bias_val=0.0):
        w = jax.random.normal(k, (3, 3, cin, cout), jnp.float32) * 0.01
        b = jnp.full((cout,), bias_val, jnp.float32)
        return (w, b)

    keys = jax.random.split(key, 8)
    bias_value = -math.log((1.0 - cfg["prior_prob"]) / cfg["prior_prob"])
    params = {
        "share_tower": [conv_param(keys[0], C, C)],
        "cls_tower": [conv_param(keys[1], C, C), conv_param(keys[2], C, C)],
        "corners_tower": [conv_param(keys[3], C, C), conv_param(keys[4], C, C)],
        "cls_logits": conv_param(keys[5], C, cfg["num_classes"], bias_value),
        "corners_pred": conv_param(keys[6], C, 8),
        "ctrness": conv_param(keys[7], C, 1),
        "scales": [jnp.float32(1.0) for _ in cfg["fpn_strides"]],   # Scale()
    }
    return params


# ---------------------------------------------------------------------------
# DAFNeHead forward (strategy='direct', centerness='plain', CTR_ON_REG=True)
# ---------------------------------------------------------------------------
def dafne_head_forward(params, features_nchw, num_classes):
    packed = _pack_head_params(params)
    logits, corners_reg, ctrness = [], [], []
    center_reg, ltrb_reg, top_feats = [], [], []
    corners_towers, cls_towers = [], []

    for level, feat in enumerate(features_nchw):
        lg, co, ct, cls_t, cor_t = _dafne_level_call(
            packed, feat, params["scales"][level], num_classes)
        logits.append(lg)
        corners_reg.append(co)
        ctrness.append(ct)
        cls_towers.append(cls_t)
        corners_towers.append(cor_t)

    towers = {"corners_towers": corners_towers,
              "center_towers": [],
              "cls_towers": cls_towers}
    return logits, corners_reg, center_reg, ltrb_reg, ctrness, top_feats, towers


def dafne_forward(params, features_dict, cfg):
    feats_nchw = [features_dict[f] for f in cfg["in_features"]]
    locations = [
        compute_locations_jax(f.shape[2], f.shape[3], s)
        for f, s in zip(feats_nchw, cfg["fpn_strides"])
    ]
    head_out = dafne_head_forward(params, feats_nchw, cfg["num_classes"])
    # TODO(synk): DAFNeOutputs.losses / predict_proposals are external to the
    # provided reference source; raw head predictions + locations are returned.
    return head_out, locations


# ---------------------------------------------------------------------------
# Pure-JAX f32 reference (lax.conv) for correctness checks
# ---------------------------------------------------------------------------
def _conv3x3_ref(x, w, b, relu=False):
    out = lax.conv_general_dilated(
        x, w, (1, 1), "SAME", dimension_numbers=("NHWC", "HWIO", "NHWC"))
    out = out + b[None, None, None, :]
    if relu:
        out = jnp.maximum(out, 0.0)
    return out


def _head_ref_level(params, feat_nhwc, scale):
    x = feat_nhwc
    for (w, b) in params["share_tower"]:
        x = _conv3x3_ref(x, w, b, relu=True)
    cls_t = x
    for (w, b) in params["cls_tower"]:
        cls_t = _conv3x3_ref(cls_t, w, b, relu=True)
    cor_t = x
    for (w, b) in params["corners_tower"]:
        cor_t = _conv3x3_ref(cor_t, w, b, relu=True)
    logit = _conv3x3_ref(cls_t, *params["cls_logits"])
    corners = _conv3x3_ref(cor_t, *params["corners_pred"]) * scale
    ctr = _conv3x3_ref(cor_t, *params["ctrness"])
    return logit, corners, ctr


if __name__ == "__main__":
    cfg = dict(
        in_features=["p3", "p4"],
        fpn_strides=[8, 16],
        in_channels=32,
        num_classes=8,
        prior_prob=0.01,
    )
    key = jax.random.PRNGKey(0)
    kp, k3, k4 = jax.random.split(key, 3)
    params = init_params(kp, cfg)

    features = {
        "p3": jax.random.normal(k3, (2, 32, 16, 16), jnp.float32),  # NCHW
        "p4": jax.random.normal(k4, (2, 32, 8, 8), jnp.float32),    # NCHW
    }

    head_out, locations = dafne_forward(params, features, cfg)
    jax.block_until_ready((head_out, locations))
    logits, corners_reg, center_reg, ltrb_reg, ctrness, top_feats, towers = head_out

    # shape checks (PyTorch NCHW convention)
    assert logits[0].shape == (2, cfg["num_classes"], 16, 16)
    assert corners_reg[0].shape == (2, 8, 16, 16)
    assert ctrness[0].shape == (2, 1, 16, 16)
    assert logits[1].shape == (2, cfg["num_classes"], 8, 8)
    assert towers["cls_towers"][0].shape == (2, 32, 16, 16)
    assert towers["corners_towers"][1].shape == (2, 32, 8, 8)
    assert locations[0].shape == (16 * 16, 2)
    assert locations[1].shape == (8 * 8, 2)

    # numerical check against the pure-JAX f32 conv reference (both levels)
    for lvl, name in enumerate(cfg["in_features"]):
        feat_nhwc = jnp.transpose(features[name], (0, 2, 3, 1))
        ref_logit, ref_corners, ref_ctr = _head_ref_level(
            params, feat_nhwc, params["scales"][lvl])
        ref_logit = jnp.transpose(ref_logit, (0, 3, 1, 2))
        ref_corners = jnp.transpose(ref_corners, (0, 3, 1, 2))
        ref_ctr = jnp.transpose(ref_ctr, (0, 3, 1, 2))
        assert float(jnp.max(jnp.abs(logits[lvl] - ref_logit))) < 5e-3
        assert float(jnp.max(jnp.abs(corners_reg[lvl] - ref_corners))) < 5e-3
        assert float(jnp.max(jnp.abs(ctrness[lvl] - ref_ctr))) < 5e-3

    print("KERNEL_OK")
</pallas_src>

<mosaic_0001>
module attributes {stable_mosaic.version = 11 : i64} {
  func.func @_dafne_level_kernel(%arg0: i32, %arg1: memref<1x32x256xf32, #tpu.memory_space<vmem>>, %arg2: memref<5x32x288xbf16, #tpu.memory_space<vmem>>, %arg3: memref<5x32x1xf32, #tpu.memory_space<vmem>>, %arg4: memref<8x288xbf16, #tpu.memory_space<vmem>>, %arg5: memref<8x1xf32, #tpu.memory_space<vmem>>, %arg6: memref<9x288xbf16, #tpu.memory_space<vmem>>, %arg7: memref<9x1xf32, #tpu.memory_space<vmem>>, %arg8: memref<9x1xf32, #tpu.memory_space<vmem>>, %arg9: memref<1x8x256xf32, #tpu.memory_space<vmem>>, %arg10: memref<1x9x256xf32, #tpu.memory_space<vmem>>, %arg11: memref<1x32x256xf32, #tpu.memory_space<vmem>>, %arg12: memref<1x32x256xf32, #tpu.memory_space<vmem>>) attributes {dimension_semantics = [#tpu.dimension_semantics<parallel>], iteration_bounds = array<i64: 2>, scalar_prefetch = 0 : i64, scratch_operands = 0 : i64, tpu.core_type = #tpu.core_type<tc>, window_params = [{transform_indices = @transform_0, window_bounds = array<i64: 1, 32, 256>}, {pipeline_mode = #tpu.pipeline_mode<synchronous>, transform_indices = @transform_1, window_bounds = array<i64: 5, 32, 288>}, {pipeline_mode = #tpu.pipeline_mode<synchronous>, transform_indices = @transform_2, window_bounds = array<i64: 5, 32, 1>}, {pipeline_mode = #tpu.pipeline_mode<synchronous>, transform_indices = @transform_3, window_bounds = array<i64: 8, 288>}, {pipeline_mode = #tpu.pipeline_mode<synchronous>, transform_indices = @transform_4, window_bounds = array<i64: 8, 1>}, {pipeline_mode = #tpu.pipeline_mode<synchronous>, transform_indices = @transform_5, window_bounds = array<i64: 9, 288>}, {pipeline_mode = #tpu.pipeline_mode<synchronous>, transform_indices = @transform_6, window_bounds = array<i64: 9, 1>}, {pipeline_mode = #tpu.pipeline_mode<synchronous>, transform_indices = @transform_7, window_bounds = array<i64: 9, 1>}, {transform_indices = @transform_8, window_bounds = array<i64: 1, 8, 256>}, {transform_indices = @transform_9, window_bounds = array<i64: 1, 9, 256>}, {transform_indices = @transform_10, window_bounds = array<i64: 1, 32, 256>}, {transform_indices = @transform_11, window_bounds = array<i64: 1, 32, 256>}]} {
    %0 = tpu.iota {dimensions = array<i32: 1>} : vector<1x256xi32>
    %c16_i32 = arith.constant 16 : i32
    %c0_i32 = arith.constant 0 : i32
    %1 = arith.cmpi eq, %c16_i32, %c0_i32 : i32
    %c1_i32 = arith.constant 1 : i32
    %2 = arith.select %1, %c1_i32, %c16_i32 : i32
    %3 = vector.broadcast %2 : i32 to vector<1x256xi32>
    %4 = arith.remsi %0, %3 : vector<1x256xi32>
    %c0_i32_0 = arith.constant 0 : i32
    %5 = vector.broadcast %c0_i32_0 : i32 to vector<1x256xi32>
    %6 = arith.cmpi ne, %4, %5 : vector<1x256xi32>
    %c0_i32_1 = arith.constant 0 : i32
    %7 = vector.broadcast %c0_i32_1 : i32 to vector<1x256xi32>
    %8 = arith.cmpi slt, %4, %7 : vector<1x256xi32>
    %c0_i32_2 = arith.constant 0 : i32
    %9 = arith.cmpi slt, %2, %c0_i32_2 : i32
    %10 = vector.broadcast %9 : i1 to vector<1x256xi1>
    %11 = vector.broadcast %10 : vector<1x256xi1> to vector<1x256xi1>
    %12 = arith.xori %8, %11 : vector<1x256xi1>
    %13 = arith.andi %12, %6 : vector<1x256xi1>
    %14 = vector.broadcast %2 : i32 to vector<1x256xi32>
    %15 = arith.addi %4, %14 : vector<1x256xi32>
    %16 = arith.select %13, %15, %4 : vector<1x256xi1>, vector<1x256xi32>
    %c1_i32_3 = arith.constant 1 : i32
    %17 = vector.broadcast %c1_i32_3 : i32 to vector<1x256xi32>
    %18 = arith.cmpi sge, %16, %17 : vector<1x256xi32>
    %c15_i32 = arith.constant 15 : i32
    %19 = vector.broadcast %c15_i32 : i32 to vector<1x256xi32>
    %20 = arith.cmpi slt, %16, %19 : vector<1x256xi32>
    %c0 = arith.constant 0 : index
    %c0_4 = arith.constant 0 : index
    %c0_5 = arith.constant 0 : index
    %21 = vector.load %arg1[%c0, %c0_4, %c0_5] : memref<1x32x256xf32, #tpu.memory_space<vmem>>, vector<1x32x256xf32>
    %22 = vector.shape_cast %21 : vector<1x32x256xf32> to vector<32x256xf32>
    %c0_6 = arith.constant 0 : index
    %c0_7 = arith.constant 0 : index
    %c0_8 = arith.constant 0 : index
    %23 = vector.load %arg2[%c0_6, %c0_7, %c0_8] : memref<5x32x288xbf16, #tpu.memory_space<vmem>>, vector<1x32x288xbf16>
    %24 = vector.shape_cast %23 : vector<1x32x288xbf16> to vector<32x288xbf16>
    %c0_9 = arith.constant 0 : index
    %c0_10 = arith.constant 0 : index
    %c0_11 = arith.constant 0 : index
    %25 = vector.load %arg3[%c0_9, %c0_10, %c0_11] : memref<5x32x1xf32, #tpu.memory_space<vmem>>, vector<1x32x1xf32>
    %26 = vector.shape_cast %25 : vector<1x32x1xf32> to vector<32x1xf32>
    %cst = arith.constant 0.000000e+00 : f32
    %27 = vector.broadcast %cst : f32 to vector<32x17xf32>
    %28 = vector.extract_strided_slice %22 {offsets = [0, 0], sizes = [32, 239], strides = [1, 1]} : vector<32x256xf32> to vector<32x239xf32>
    %29 = tpu.concatenate %27, %28 in 1 : vector<32x17xf32>, vector<32x239xf32> -> vector<32x256xf32>
    %cst_12 = arith.constant 0.000000e+00 : f32
    %30 = vector.shape_cast %18 : vector<1x256xi1> to vector<1x256xi1>
    %31 = vector.broadcast %30 : vector<1x256xi1> to vector<32x256xi1>
    %32 = vector.broadcast %cst_12 : f32 to vector<32x256xf32>
    %33 = arith.select %31, %29, %32 : vector<32x256xi1>, vector<32x256xf32>
    %cst_13 = arith.constant 0.000000e+00 : f32
    %34 = vector.broadcast %cst_13 : f32 to vector<32x16xf32>
    %35 = vector.extract_strided_slice %22 {offsets = [0, 0], sizes = [32, 240], strides = [1, 1]} : vector<32x256xf32> to vector<32x240xf32>
    %36 = tpu.concatenate %34, %35 in 1 : vector<32x16xf32>, vector<32x240xf32> -> vector<32x256xf32>
    %cst_14 = arith.constant 0.000000e+00 : f32
    %37 = vector.broadcast %cst_14 : f32 to vector<32x15xf32>
    %38 = vector.extract_strided_slice %22 {offsets = [0, 0], sizes = [32, 241], strides = [1, 1]} : vector<32x256xf32> to vector<32x241xf32>
    %39 = tpu.concatenate %37, %38 in 1 : vector<32x15xf32>, vector<32x241xf32> -> vector<32x256xf32>
    %cst_15 = arith.constant 0.000000e+00 : f32
    %40 = vector.shape_cast %20 : vector<1x256xi1> to vector<1x256xi1>
    %41 = vector.broadcast %40 : vector<1x256xi1> to vector<32x256xi1>
    %42 = vector.broadcast %cst_15 : f32 to vector<32x256xf32>
    %43 = arith.select %41, %39, %42 : vector<32x256xi1>, vector<32x256xf32>
    %cst_16 = arith.constant 0.000000e+00 : f32
    %44 = vector.broadcast %cst_16 : f32 to vector<32x1xf32>
    %45 = vector.extract_strided_slice %22 {offsets = [0, 0], sizes = [32, 255], strides = [1, 1]} : vector<32x256xf32> to vector<32x255xf32>
    %46 = tpu.concatenate %44, %45 in 1 : vector<32x1xf32>, vector<32x255xf32> -> vector<32x256xf32>
    %cst_17 = arith.constant 0.000000e+00 : f32
    %47 = vector.shape_cast %18 : vector<1x256xi1> to vector<1x256xi1>
    %48 = vector.broadcast %47 : vector<1x256xi1> to vector<32x256xi1>
    %49 = vector.broadcast %cst_17 : f32 to vector<32x256xf32>
    %50 = arith.select %48, %46, %49 : vector<32x256xi1>, vector<32x256xf32>
    %cst_18 = arith.constant 0.000000e+00 : f32
    %51 = vector.broadcast %cst_18 : f32 to vector<32x1xf32>
    %52 = vector.extract_strided_slice %22 {offsets = [0, 1], sizes = [32, 255], strides = [1, 1]} : vector<32x256xf32> to vector<32x255xf32>
    %53 = tpu.concatenate %52, %51 in 1 : vector<32x255xf32>, vector<32x1xf32> -> vector<32x256xf32>
    %cst_19 = arith.constant 0.000000e+00 : f32
    %54 = vector.shape_cast %20 : vector<1x256xi1> to vector<1x256xi1>
    %55 = vector.broadcast %54 : vector<1x256xi1> to vector<32x256xi1>
    %56 = vector.broadcast %cst_19 : f32 to vector<32x256xf32>
    %57 = arith.select %55, %53, %56 : vector<32x256xi1>, vector<32x256xf32>
    %cst_20 = arith.constant 0.000000e+00 : f32
    %58 = vector.broadcast %cst_20 : f32 to vector<32x15xf32>
    %59 = vector.extract_strided_slice %22 {offsets = [0, 15], sizes = [32, 241], strides = [1, 1]} : vector<32x256xf32> to vector<32x241xf32>
    %60 = tpu.concatenate %59, %58 in 1 : vector<32x241xf32>, vector<32x15xf32> -> vector<32x256xf32>
    %cst_21 = arith.constant 0.000000e+00 : f32
    %61 = vector.shape_cast %18 : vector<1x256xi1> to vector<1x256xi1>
    %62 = vector.broadcast %61 : vector<1x256xi1> to vector<32x256xi1>
    %63 = vector.broadcast %cst_21 : f32 to vector<32x256xf32>
    %64 = arith.select %62, %60, %63 : vector<32x256xi1>, vector<32x256xf32>
    %cst_22 = arith.constant 0.000000e+00 : f32
    %65 = vector.broadcast %cst_22 : f32 to vector<32x16xf32>
    %66 = vector.extract_strided_slice %22 {offsets = [0, 16], sizes = [32, 240], strides = [1, 1]} : vector<32x256xf32> to vector<32x240xf32>
    %67 = tpu.concatenate %66, %65 in 1 : vector<32x240xf32>, vector<32x16xf32> -> vector<32x256xf32>
    %cst_23 = arith.constant 0.000000e+00 : f32
    %68 = vector.broadcast %cst_23 : f32 to vector<32x17xf32>
    %69 = vector.extract_strided_slice %22 {offsets = [0, 17], sizes = [32, 239], strides = [1, 1]} : vector<32x256xf32> to vector<32x239xf32>
    %70 = tpu.concatenate %69, %68 in 1 : vector<32x239xf32>, vector<32x17xf32> -> vector<32x256xf32>
    %cst_24 = arith.constant 0.000000e+00 : f32
    %71 = vector.shape_cast %20 : vector<1x256xi1> to vector<1x256xi1>
    %72 = vector.broadcast %71 : vector<1x256xi1> to vector<32x256xi1>
    %73 = vector.broadcast %cst_24 : f32 to vector<32x256xf32>
    %74 = arith.select %72, %70, %73 : vector<32x256xi1>, vector<32x256xf32>
    %75 = tpu.concatenate %33, %36, %43, %50, %22, %57, %64, %67, %74 in 0 : vector<32x256xf32>, vector<32x256xf32>, vector<32x256xf32>, vector<32x256xf32>, vector<32x256xf32>, vector<32x256xf32>, vector<32x256xf32>, vector<32x256xf32>, vector<32x256xf32> -> vector<288x256xf32>
    %76 = arith.truncf %75 : vector<288x256xf32> to vector<288x256xbf16>
    %cst_25 = arith.constant dense<0.000000e+00> : vector<32x256xf32>
    %77 = tpu.matmul %24, %76, %cst_25 {dimension_numbers = #tpu.dot_dimension_numbers<[1], [0], [0], [1], [0, 0, 1, 1], [], []>} : vector<32x288xbf16>, vector<288x256xbf16>, vector<32x256xf32> -> vector<32x256xf32>
    %78 = vector.broadcast %26 : vector<32x1xf32> to vector<32x256xf32>
    %79 = arith.addf %77, %78 : vector<32x256xf32>
    %cst_26 = arith.constant 0.000000e+00 : f32
    %80 = vector.broadcast %cst_26 : f32 to vector<32x256xf32>
    %81 = arith.maximumf %79, %80 : vector<32x256xf32>
    %c1 = arith.constant 1 : index
    %c0_27 = arith.constant 0 : index
    %c0_28 = arith.constant 0 : index
    %82 = vector.load %arg2[%c1, %c0_27, %c0_28] : memref<5x32x288xbf16, #tpu.memory_space<vmem>>, vector<1x32x288xbf16>
    %83 = vector.shape_cast %82 : vector<1x32x288xbf16> to vector<32x288xbf16>
    %c1_29 = arith.constant 1 : index
    %c0_30 = arith.constant 0 : index
    %c0_31 = arith.constant 0 : index
    %84 = vector.load %arg3[%c1_29, %c0_30, %c0_31] : memref<5x32x1xf32, #tpu.memory_space<vmem>>, vector<1x32x1xf32>
    %85 = vector.shape_cast %84 : vector<1x32x1xf32> to vector<32x1xf32>
    %cst_32 = arith.constant 0.000000e+00 : f32
    %86 = vector.broadcast %cst_32 : f32 to vector<32x17xf32>
    %87 = vector.extract_strided_slice %81 {offsets = [0, 0], sizes = [32, 239], strides = [1, 1]} : vector<32x256xf32> to vector<32x239xf32>
    %88 = tpu.concatenate %86, %87 in 1 : vector<32x17xf32>, vector<32x239xf32> -> vector<32x256xf32>
    %cst_33 = arith.constant 0.000000e+00 : f32
    %89 = vector.shape_cast %18 : vector<1x256xi1> to vector<1x256xi1>
    %90 = vector.broadcast %89 : vector<1x256xi1> to vector<32x256xi1>
    %91 = vector.broadcast %cst_33 : f32 to vector<32x256xf32>
    %92 = arith.select %90, %88, %91 : vector<32x256xi1>, vector<32x256xf32>
    %cst_34 = arith.constant 0.000000e+00 : f32
    %93 = vector.broadcast %cst_34 : f32 to vector<32x16xf32>
    %94 = vector.extract_strided_slice %81 {offsets = [0, 0], sizes = [32, 240], strides = [1, 1]} : vector<32x256xf32> to vector<32x240xf32>
    %95 = tpu.concatenate %93, %94 in 1 : vector<32x16xf32>, vector<32x240xf32> -> vector<32x256xf32>
    %cst_35 = arith.constant 0.000000e+00 : f32
    %96 = vector.broadcast %cst_35 : f32 to vector<32x15xf32>
    %97 = vector.extract_strided_slice %81 {offsets = [0, 0], sizes = [32, 241], strides = [1, 1]} : vector<32x256xf32> to vector<32x241xf32>
    %98 = tpu.concatenate %96, %97 in 1 : vector<32x15xf32>, vector<32x241xf32> -> vector<32x256xf32>
    %cst_36 = arith.constant 0.000000e+00 : f32
    %99 = vector.shape_cast %20 : vector<1x256xi1> to vector<1x256xi1>
    %100 = vector.broadcast %99 : vector<1x256xi1> to vector<32x256xi1>
    %101 = vector.broadcast %cst_36 : f32 to vector<32x256xf32>
    %102 = arith.select %100, %98, %101 : vector<32x256xi1>, vector<32x256xf32>
    %cst_37 = arith.constant 0.000000e+00 : f32
    %103 = vector.broadcast %cst_37 : f32 to vector<32x1xf32>
    %104 = vector.extract_strided_slice %81 {offsets = [0, 0], sizes = [32, 255], strides = [1, 1]} : vector<32x256xf32> to vector<32x255xf32>
    %105 = tpu.concatenate %103, %104 in 1 : vector<32x1xf32>, vector<32x255xf32> -> vector<32x256xf32>
    %cst_38 = arith.constant 0.000000e+00 : f32
    %106 = vector.shape_cast %18 : vector<1x256xi1> to vector<1x256xi1>
    %107 = vector.broadcast %106 : vector<1x256xi1> to vector<32x256xi1>
    %108 = vector.broadcast %cst_38 : f32 to vector<32x256xf32>
    %109 = arith.select %107, %105, %108 : vector<32x256xi1>, vector<32x256xf32>
    %cst_39 = arith.constant 0.000000e+00 : f32
    %110 = vector.broadcast %cst_39 : f32 to vector<32x1xf32>
    %111 = vector.extract_strided_slice %81 {offsets = [0, 1], sizes = [32, 255], strides = [1, 1]} : vector<32x256xf32> to vector<32x255xf32>
    %112 = tpu.concatenate %111, %110 in 1 : vector<32x255xf32>, vector<32x1xf32> -> vector<32x256xf32>
    %cst_40 = arith.constant 0.000000e+00 : f32
    %113 = vector.shape_cast %20 : vector<1x256xi1> to vector<1x256xi1>
    %114 = vector.broadcast %113 : vector<1x256xi1> to vector<32x256xi1>
    %115 = vector.broadcast %cst_40 : f32 to vector<32x256xf32>
    %116 = arith.select %114, %112, %115 : vector<32x256xi1>, vector<32x256xf32>
    %cst_41 = arith.constant 0.000000e+00 : f32
    %117 = vector.broadcast %cst_41 : f32 to vector<32x15xf32>
    %118 = vector.extract_strided_slice %81 {offsets = [0, 15], sizes = [32, 241], strides = [1, 1]} : vector<32x256xf32> to vector<32x241xf32>
    %119 = tpu.concatenate %118, %117 in 1 : vector<32x241xf32>, vector<32x15xf32> -> vector<32x256xf32>
    %cst_42 = arith.constant 0.000000e+00 : f32
    %120 = vector.shape_cast %18 : vector<1x256xi1> to vector<1x256xi1>
    %121 = vector.broadcast %120 : vector<1x256xi1> to vector<32x256xi1>
    %122 = vector.broadcast %cst_42 : f32 to vector<32x256xf32>
    %123 = arith.select %121, %119, %122 : vector<32x256xi1>, vector<32x256xf32>
    %cst_43 = arith.constant 0.000000e+00 : f32
    %124 = vector.broadcast %cst_43 : f32 to vector<32x16xf32>
    %125 = vector.extract_strided_slice %81 {offsets = [0, 16], sizes = [32, 240], strides = [1, 1]} : vector<32x256xf32> to vector<32x240xf32>
    %126 = tpu.concatenate %125, %124 in 1 : vector<32x240xf32>, vector<32x16xf32> -> vector<32x256xf32>
    %cst_44 = arith.constant 0.000000e+00 : f32
    %127 = vector.broadcast %cst_44 : f32 to vector<32x17xf32>
    %128 = vector.extract_strided_slice %81 {offsets = [0, 17], sizes = [32, 239], strides = [1, 1]} : vector<32x256xf32> to vector<32x239xf32>
    %129 = tpu.concatenate %128, %127 in 1 : vector<32x239xf32>, vector<32x17xf32> -> vector<32x256xf32>
    %cst_45 = arith.constant 0.000000e+00 : f32
    %130 = vector.shape_cast %20 : vector<1x256xi1> to vector<1x256xi1>
    %131 = vector.broadcast %130 : vector<1x256xi1> to vector<32x256xi1>
    %132 = vector.broadcast %cst_45 : f32 to vector<32x256xf32>
    %133 = arith.select %131, %129, %132 : vector<32x256xi1>, vector<32x256xf32>
    %134 = tpu.concatenate %92, %95, %102, %109, %81, %116, %123, %126, %133 in 0 : vector<32x256xf32>, vector<32x256xf32>, vector<32x256xf32>, vector<32x256xf32>, vector<32x256xf32>, vector<32x256xf32>, vector<32x256xf32>, vector<32x256xf32>, vector<32x256xf32> -> vector<288x256xf32>
    %135 = arith.truncf %134 : vector<288x256xf32> to vector<288x256xbf16>
    %cst_46 = arith.constant dense<0.000000e+00> : vector<32x256xf32>
    %136 = tpu.matmul %83, %135, %cst_46 {dimension_numbers = #tpu.dot_dimension_numbers<[1], [0], [0], [1], [0, 0, 1, 1], [], []>} : vector<32x288xbf16>, vector<288x256xbf16>, vector<32x256xf32> -> vector<32x256xf32>
    %137 = vector.broadcast %85 : vector<32x1xf32> to vector<32x256xf32>
    %138 = arith.addf %136, %137 : vector<32x256xf32>
    %cst_47 = arith.constant 0.000000e+00 : f32
    %139 = vector.broadcast %cst_47 : f32 to vector<32x256xf32>
    %140 = arith.maximumf %138, %139 : vector<32x256xf32>
    %c2 = arith.constant 2 : index
    %c0_48 = arith.constant 0 : index
    %c0_49 = arith.constant 0 : index
    %141 = vector.load %arg2[%c2, %c0_48, %c0_49] : memref<5x32x288xbf16, #tpu.memory_space<vmem>>, vector<1x32x288xbf16>
    %142 = vector.shape_cast %141 : vector<1x32x288xbf16> to vector<32x288xbf16>
    %c2_50 = arith.constant 2 : index
    %c0_51 = arith.constant 0 : index
    %c0_52 = arith.constant 0 : index
    %143 = vector.load %arg3[%c2_50, %c0_51, %c0_52] : memref<5x32x1xf32, #tpu.memory_space<vmem>>, vector<1x32x1xf32>
    %144 = vector.shape_cast %143 : vector<1x32x1xf32> to vector<32x1xf32>
    %cst_53 = arith.constant 0.000000e+00 : f32
    %145 = vector.broadcast %cst_53 : f32 to vector<32x17xf32>
    %146 = vector.extract_strided_slice %140 {offsets = [0, 0], sizes = [32, 239], strides = [1, 1]} : vector<32x256xf32> to vector<32x239xf32>
    %147 = tpu.concatenate %145, %146 in 1 : vector<32x17xf32>, vector<32x239xf32> -> vector<32x256xf32>
    %cst_54 = arith.constant 0.000000e+00 : f32
    %148 = vector.shape_cast %18 : vector<1x256xi1> to vector<1x256xi1>
    %149 = vector.broadcast %148 : vector<1x256xi1> to vector<32x256xi1>
    %150 = vector.broadcast %cst_54 : f32 to vector<32x256xf32>
    %151 = arith.select %149, %147, %150 : vector<32x256xi1>, vector<32x256xf32>
    %cst_55 = arith.constant 0.000000e+00 : f32
    %152 = vector.broadcast %cst_55 : f32 to vector<32x16xf32>
    %153 = vector.extract_strided_slice %140 {offsets = [0, 0], sizes = [32, 240], strides = [1, 1]} : vector<32x256xf32> to vector<32x240xf32>
    %154 = tpu.concatenate %152, %153 in 1 : vector<32x16xf32>, vector<32x240xf32> -> vector<32x256xf32>
    %cst_56 = arith.constant 0.000000e+00 : f32
    %155 = vector.broadcast %cst_56 : f32 to vector<32x15xf32>
    %156 = vector.extract_strided_slice %140 {offsets = [0, 0], sizes = [32, 241], strides = [1, 1]} : vector<32x256xf32> to vector<32x241xf32>
    %157 = tpu.concatenate %155, %156 in 1 : vector<32x15xf32>, vector<32x241xf32> -> vector<32x256xf32>
    %cst_57 = arith.constant 0.000000e+00 : f32
    %158 = vector.shape_cast %20 : vector<1x256xi1> to vector<1x256xi1>
    %159 = vector.broadcast %158 : vector<1x256xi1> to vector<32x256xi1>
    %160 = vector.broadcast %cst_57 : f32 to vector<32x256xf32>
    %161 = arith.select %159, %157, %160 : vector<32x256xi1>, vector<32x256xf32>
    %cst_58 = arith.constant 0.000000e+00 : f32
    %162 = vector.broadcast %cst_58 : f32 to vector<32x1xf32>
    %163 = vector.extract_strided_slice %140 {offsets = [0, 0], sizes = [32, 255], strides = [1, 1]} : vector<32x256xf32> to vector<32x255xf32>
    %164 = tpu.concatenate %162, %163 in 1 : vector<32x1xf32>, vector<32x255xf32> -> vector<32x256xf32>
    %cst_59 = arith.constant 0.000000e+00 : f32
    %165 = vector.shape_cast %18 : vector<1x256xi1> to vector<1x256xi1>
    %166 = vector.broadcast %165 : vector<1x256xi1> to vector<32x256xi1>
    %167 = vector.broadcast %cst_59 : f32 to vector<32x256xf32>
    %168 = arith.select %166, %164, %167 : vector<32x256xi1>, vector<32x256xf32>
    %cst_60 = arith.constant 0.000000e+00 : f32
    %169 = vector.broadcast %cst_60 : f32 to vector<32x1xf32>
    %170 = vector.extract_strided_slice %140 {offsets = [0, 1], sizes = [32, 255], strides = [1, 1]} : vector<32x256xf32> to vector<32x255xf32>
    %171 = tpu.concatenate %170, %169 in 1 : vector<32x255xf32>, vector<32x1xf32> -> vector<32x256xf32>
    %cst_61 = arith.constant 0.000000e+00 : f32
    %172 = vector.shape_cast %20 : vector<1x256xi1> to vector<1x256xi1>
    %173 = vector.broadcast %172 : vector<1x256xi1> to vector<32x256xi1>
    %174 = vector.broadcast %cst_61 : f32 to vector<32x256xf32>
    %175 = arith.select %173, %171, %174 : vector<32x256xi1>, vector<32x256xf32>
    %cst_62 = arith.constant 0.000000e+00 : f32
    %176 = vector.broadcast %cst_62 : f32 to vector<32x15xf32>
    %177 = vector.extract_strided_slice %140 {offsets = [0, 15], sizes = [32, 241], strides = [1, 1]} : vector<32x256xf32> to vector<32x241xf32>
    %178 = tpu.concatenate %177, %176 in 1 : vector<32x241xf32>, vector<32x15xf32> -> vector<32x256xf32>
    %cst_63 = arith.constant 0.000000e+00 : f32
    %179 = vector.shape_cast %18 : vector<1x256xi1> to vector<1x256xi1>
    %180 = vector.broadcast %179 : vector<1x256xi1> to vector<32x256xi1>
    %181 = vector.broadcast %cst_63 : f32 to vector<32x256xf32>
    %182 = arith.select %180, %178, %181 : vector<32x256xi1>, vector<32x256xf32>
    %cst_64 = arith.constant 0.000000e+00 : f32
    %183 = vector.broadcast %cst_64 : f32 to vector<32x16xf32>
    %184 = vector.extract_strided_slice %140 {offsets = [0, 16], sizes = [32, 240], strides = [1, 1]} : vector<32x256xf32> to vector<32x240xf32>
    %185 = tpu.concatenate %184, %183 in 1 : vector<32x240xf32>, vector<32x16xf32> -> vector<32x256xf32>
    %cst_65 = arith.constant 0.000000e+00 : f32
    %186 = vector.broadcast %cst_65 : f32 to vector<32x17xf32>
    %187 = vector.extract_strided_slice %140 {offsets = [0, 17], sizes = [32, 239], strides = [1, 1]} : vector<32x256xf32> to vector<32x239xf32>
    %188 = tpu.concatenate %187, %186 in 1 : vector<32x239xf32>, vector<32x17xf32> -> vector<32x256xf32>
    %cst_66 = arith.constant 0.000000e+00 : f32
    %189 = vector.shape_cast %20 : vector<1x256xi1> to vector<1x256xi1>
    %190 = vector.broadcast %189 : vector<1x256xi1> to vector<32x256xi1>
    %191 = vector.broadcast %cst_66 : f32 to vector<32x256xf32>
    %192 = arith.select %190, %188, %191 : vector<32x256xi1>, vector<32x256xf32>
    %193 = tpu.concatenate %151, %154, %161, %168, %140, %175, %182, %185, %192 in 0 : vector<32x256xf32>, vector<32x256xf32>, vector<32x256xf32>, vector<32x256xf32>, vector<32x256xf32>, vector<32x256xf32>, vector<32x256xf32>, vector<32x256xf32>, vector<32x256xf32> -> vector<288x256xf32>
    %194 = arith.truncf %193 : vector<288x256xf32> to vector<288x256xbf16>
    %cst_67 = arith.constant dense<0.000000e+00> : vector<32x256xf32>
    %195 = tpu.matmul %142, %194, %cst_67 {dimension_numbers = #tpu.dot_dimension_numbers<[1], [0], [0], [1], [0, 0, 1, 1], [], []>} : vector<32x288xbf16>, vector<288x256xbf16>, vector<32x256xf32> -> vector<32x256xf32>
    %196 = vector.broadcast %144 : vector<32x1xf32> to vector<32x256xf32>
    %197 = arith.addf %195, %196 : vector<32x256xf32>
    %cst_68 = arith.constant 0.000000e+00 : f32
    %198 = vector.broadcast %cst_68 : f32 to vector<32x256xf32>
    %199 = arith.maximumf %197, %198 : vector<32x256xf32>
    %c3 = arith.constant 3 : index
    %c0_69 = arith.constant 0 : index
    %c0_70 = arith.constant 0 : index
    %200 = vector.load %arg2[%c3, %c0_69, %c0_70] : memref<5x32x288xbf16, #tpu.memory_space<vmem>>, vector<1x32x288xbf16>
    %201 = vector.shape_cast %200 : vector<1x32x288xbf16> to vector<32x288xbf16>
    %c3_71 = arith.constant 3 : index
    %c0_72 = arith.constant 0 : index
    %c0_73 = arith.constant 0 : index
    %202 = vector.load %arg3[%c3_71, %c0_72, %c0_73] : memref<5x32x1xf32, #tpu.memory_space<vmem>>, vector<1x32x1xf32>
    %203 = vector.shape_cast %202 : vector<1x32x1xf32> to vector<32x1xf32>
    %cst_74 = arith.constant 0.000000e+00 : f32
    %204 = vector.broadcast %cst_74 : f32 to vector<32x17xf32>
    %205 = vector.extract_strided_slice %81 {offsets = [0, 0], sizes = [32, 239], strides = [1, 1]} : vector<32x256xf32> to vector<32x239xf32>
    %206 = tpu.concatenate %204, %205 in 1 : vector<32x17xf32>, vector<32x239xf32> -> vector<32x256xf32>
    %cst_75 = arith.constant 0.000000e+00 : f32
    %207 = vector.shape_cast %18 : vector<1x256xi1> to vector<1x256xi1>
    %208 = vector.broadcast %207 : vector<1x256xi1> to vector<32x256xi1>
    %209 = vector.broadcast %cst_75 : f32 to vector<32x256xf32>
    %210 = arith.select %208, %206, %209 : vector<32x256xi1>, vector<32x256xf32>
    %cst_76 = arith.constant 0.000000e+00 : f32
    %211 = vector.broadcast %cst_76 : f32 to vector<32x16xf32>
    %212 = vector.extract_strided_slice %81 {offsets = [0, 0], sizes = [32, 240], strides = [1, 1]} : vector<32x256xf32> to vector<32x240xf32>
    %213 = tpu.concatenate %211, %212 in 1 : vector<32x16xf32>, vector<32x240xf32> -> vector<32x256xf32>
    %cst_77 = arith.constant 0.000000e+00 : f32
    %214 = vector.broadcast %cst_77 : f32 to vector<32x15xf32>
    %215 = vector.extract_strided_slice %81 {offsets = [0, 0], sizes = [32, 241], strides = [1, 1]} : vector<32x256xf32> to vector<32x241xf32>
    %216 = tpu.concatenate %214, %215 in 1 : vector<32x15xf32>, vector<32x241xf32> -> vector<32x256xf32>
    %cst_78 = arith.constant 0.000000e+00 : f32
    %217 = vector.shape_cast %20 : vector<1x256xi1> to vector<1x256xi1>
    %218 = vector.broadcast %217 : vector<1x256xi1> to vector<32x256xi1>
    %219 = vector.broadcast %cst_78 : f32 to vector<32x256xf32>
    %220 = arith.select %218, %216, %219 : vector<32x256xi1>, vector<32x256xf32>
    %cst_79 = arith.constant 0.000000e+00 : f32
    %221 = vector.broadcast %cst_79 : f32 to vector<32x1xf32>
    %222 = vector.extract_strided_slice %81 {offsets = [0, 0], sizes = [32, 255], strides = [1, 1]} : vector<32x256xf32> to vector<32x255xf32>
    %223 = tpu.concatenate %221, %222 in 1 : vector<32x1xf32>, vector<32x255xf32> -> vector<32x256xf32>
    %cst_80 = arith.constant 0.000000e+00 : f32
    %224 = vector.shape_cast %18 : vector<1x256xi1> to vector<1x256xi1>
    %225 = vector.broadcast %224 : vector<1x256xi1> to vector<32x256xi1>
    %226 = vector.broadcast %cst_80 : f32 to vector<32x256xf32>
    %227 = arith.select %225, %223, %226 : vector<32x256xi1>, vector<32x256xf32>
    %cst_81 = arith.constant 0.000000e+00 : f32
    %228 = vector.broadcast %cst_81 : f32 to vector<32x1xf32>
    %229 = vector.extract_strided_slice %81 {offsets = [0, 1], sizes = [32, 255], strides = [1, 1]} : vector<32x256xf32> to vector<32x255xf32>
    %230 = tpu.concatenate %229, %228 in 1 : vector<32x255xf32>, vector<32x1xf32> -> vector<32x256xf32>
    %cst_82 = arith.constant 0.000000e+00 : f32
    %231 = vector.shape_cast %20 : vector<1x256xi1> to vector<1x256xi1>
    %232 = vector.broadcast %231 : vector<1x256xi1> to vector<32x256xi1>
    %233 = vector.broadcast %cst_82 : f32 to vector<32x256xf32>
    %234 = arith.select %232, %230, %233 : vector<32x256xi1>, vector<32x256xf32>
    %cst_83 = arith.constant 0.000000e+00 : f32
    %235 = vector.broadcast %cst_83 : f32 to vector<32x15xf32>
    %236 = vector.extract_strided_slice %81 {offsets = [0, 15], sizes = [32, 241], strides = [1, 1]} : vector<32x256xf32> to vector<32x241xf32>
    %237 = tpu.concatenate %236, %235 in 1 : vector<32x241xf32>, vector<32x15xf32> -> vector<32x256xf32>
    %cst_84 = arith.constant 0.000000e+00 : f32
    %238 = vector.shape_cast %18 : vector<1x256xi1> to vector<1x256xi1>
    %239 = vector.broadcast %238 : vector<1x256xi1> to vector<32x256xi1>
    %240 = vector.broadcast %cst_84 : f32 to vector<32x256xf32>
    %241 = arith.select %239, %237, %240 : vector<32x256xi1>, vector<32x256xf32>
    %cst_85 = arith.constant 0.000000e+00 : f32
    %242 = vector.broadcast %cst_85 : f32 to vector<32x16xf32>
    %243 = vector.extract_strided_slice %81 {offsets = [0, 16], sizes = [32, 240], strides = [1, 1]} : vector<32x256xf32> to vector<32x240xf32>
    %244 = tpu.concatenate %243, %242 in 1 : vector<32x240xf32>, vector<32x16xf32> -> vector<32x256xf32>
    %cst_86 = arith.constant 0.000000e+00 : f32
    %245 = vector.broadcast %cst_86 : f32 to vector<32x17xf32>
    %246 = vector.extract_strided_slice %81 {offsets = [0, 17], sizes = [32, 239], strides = [1, 1]} : vector<32x256xf32> to vector<32x239xf32>
    %247 = tpu.concatenate %246, %245 in 1 : vector<32x239xf32>, vector<32x17xf32> -> vector<32x256xf32>
    %cst_87 = arith.constant 0.000000e+00 : f32
    %248 = vector.shape_cast %20 : vector<1x256xi1> to vector<1x256xi1>
    %249 = vector.broadcast %248 : vector<1x256xi1> to vector<32x256xi1>
    %250 = vector.broadcast %cst_87 : f32 to vector<32x256xf32>
    %251 = arith.select %249, %247, %250 : vector<32x256xi1>, vector<32x256xf32>
    %252 = tpu.concatenate %210, %213, %220, %227, %81, %234, %241, %244, %251 in 0 : vector<32x256xf32>, vector<32x256xf32>, vector<32x256xf32>, vector<32x256xf32>, vector<32x256xf32>, vector<32x256xf32>, vector<32x256xf32>, vector<32x256xf32>, vector<32x256xf32> -> vector<288x256xf32>
    %253 = arith.truncf %252 : vector<288x256xf32> to vector<288x256xbf16>
    %cst_88 = arith.constant dense<0.000000e+00> : vector<32x256xf32>
    %254 = tpu.matmul %201, %253, %cst_88 {dimension_numbers = #tpu.dot_dimension_numbers<[1], [0], [0], [1], [0, 0, 1, 1], [], []>} : vector<32x288xbf16>, vector<288x256xbf16>, vector<32x256xf32> -> vector<32x256xf32>
    %255 = vector.broadcast %203 : vector<32x1xf32> to vector<32x256xf32>
    %256 = arith.addf %254, %255 : vector<32x256xf32>
    %cst_89 = arith.constant 0.000000e+00 : f32
    %257 = vector.broadcast %cst_89 : f32 to vector<32x256xf32>
    %258 = arith.maximumf %256, %257 : vector<32x256xf32>
    %c4 = arith.constant 4 : index
    %c0_90 = arith.constant 0 : index
    %c0_91 = arith.constant 0 : index
    %259 = vector.load %arg2[%c4, %c0_90, %c0_91] : memref<5x32x288xbf16, #tpu.memory_space<vmem>>, vector<1x32x288xbf16>
    %260 = vector.shape_cast %259 : vector<1x32x288xbf16> to vector<32x288xbf16>
    %c4_92 = arith.constant 4 : index
    %c0_93 = arith.constant 0 : index
    %c0_94 = arith.constant 0 : index
    %261 = vector.load %arg3[%c4_92, %c0_93, %c0_94] : memref<5x32x1xf32, #tpu.memory_space<vmem>>, vector<1x32x1xf32>
    %262 = vector.shape_cast %261 : vector<1x32x1xf32> to vector<32x1xf32>
    %cst_95 = arith.constant 0.000000e+00 : f32
    %263 = vector.broadcast %cst_95 : f32 to vector<32x17xf32>
    %264 = vector.extract_strided_slice %258 {offsets = [0, 0], sizes = [32, 239], strides = [1, 1]} : vector<32x256xf32> to vector<32x239xf32>
    %265 = tpu.concatenate %263, %264 in 1 : vector<32x17xf32>, vector<32x239xf32> -> vector<32x256xf32>
    %cst_96 = arith.constant 0.000000e+00 : f32
    %266 = vector.shape_cast %18 : vector<1x256xi1> to vector<1x256xi1>
    %267 = vector.broadcast %266 : vector<1x256xi1> to vector<32x256xi1>
    %268 = vector.broadcast %cst_96 : f32 to vector<32x256xf32>
    %269 = arith.select %267, %265, %268 : vector<32x256xi1>, vector<32x256xf32>
    %cst_97 = arith.constant 0.000000e+00 : f32
    %270 = vector.broadcast %cst_97 : f32 to vector<32x16xf32>
    %271 = vector.extract_strided_slice %258 {offsets = [0, 0], sizes = [32, 240], strides = [1, 1]} : vector<32x256xf32> to vector<32x240xf32>
    %272 = tpu.concatenate %270, %271 in 1 : vector<32x16xf32>, vector<32x240xf32> -> vector<32x256xf32>
    %cst_98 = arith.constant 0.000000e+00 : f32
    %273 = vector.broadcast %cst_98 : f32 to vector<32x15xf32>
    %274 = vector.extract_strided_slice %258 {offsets = [0, 0], sizes = [32, 241], strides = [1, 1]} : vector<32x256xf32> to vector<32x241xf32>
    %275 = tpu.concatenate %273, %274 in 1 : vector<32x15xf32>, vector<32x241xf32> -> vector<32x256xf32>
    %cst_99 = arith.constant 0.000000e+00 : f32
    %276 = vector.shape_cast %20 : vector<1x256xi1> to vector<1x256xi1>
    %277 = vector.broadcast %276 : vector<1x256xi1> to vector<32x256xi1>
    %278 = vector.broadcast %cst_99 : f32 to vector<32x256xf32>
    %279 = arith.select %277, %275, %278 : vector<32x256xi1>, vector<32x256xf32>
    %cst_100 = arith.constant 0.000000e+00 : f32
    %280 = vector.broadcast %cst_100 : f32 to vector<32x1xf32>
    %281 = vector.extract_strided_slice %258 {offsets = [0, 0], sizes = [32, 255], strides = [1, 1]} : vector<32x256xf32> to vector<32x255xf32>
    %282 = tpu.concatenate %280, %281 in 1 : vector<32x1xf32>, vector<32x255xf32> -> vector<32x256xf32>
    %cst_101 = arith.constant 0.000000e+00 : f32
    %283 = vector.shape_cast %18 : vector<1x256xi1> to vector<1x256xi1>
    %284 = vector.broadcast %283 : vector<1x256xi1> to vector<32x256xi1>
    %285 = vector.broadcast %cst_101 : f32 to vector<32x256xf32>
    %286 = arith.select %284, %282, %285 : vector<32x256xi1>, vector<32x256xf32>
    %cst_102 = arith.constant 0.000000e+00 : f32
    %287 = vector.broadcast %cst_102 : f32 to vector<32x1xf32>
    %288 = vector.extract_strided_slice %258 {offsets = [0, 1], sizes = [32, 255], strides = [1, 1]} : vector<32x256xf32> to vector<32x255xf32>
    %289 = tpu.concatenate %288, %287 in 1 : vector<32x255xf32>, vector<32x1xf32> -> vector<32x256xf32>
    %cst_103 = arith.constant 0.000000e+00 : f32
    %290 = vector.shape_cast %20 : vector<1x256xi1> to vector<1x256xi1>
    %291 = vector.broadcast %290 : vector<1x256xi1> to vector<32x256xi1>
    %292 = vector.broadcast %cst_103 : f32 to vector<32x256xf32>
    %293 = arith.select %291, %289, %292 : vector<32x256xi1>, vector<32x256xf32>
    %cst_104 = arith.constant 0.000000e+00 : f32
    %294 = vector.broadcast %cst_104 : f32 to vector<32x15xf32>
    %295 = vector.extract_strided_slice %258 {offsets = [0, 15], sizes = [32, 241], strides = [1, 1]} : vector<32x256xf32> to vector<32x241xf32>
    %296 = tpu.concatenate %295, %294 in 1 : vector<32x241xf32>, vector<32x15xf32> -> vector<32x256xf32>
    %cst_105 = arith.constant 0.000000e+00 : f32
    %297 = vector.shape_cast %18 : vector<1x256xi1> to vector<1x256xi1>
    %298 = vector.broadcast %297 : vector<1x256xi1> to vector<32x256xi1>
    %299 = vector.broadcast %cst_105 : f32 to vector<32x256xf32>
    %300 = arith.select %298, %296, %299 : vector<32x256xi1>, vector<32x256xf32>
    %cst_106 = arith.constant 0.000000e+00 : f32
    %301 = vector.broadcast %cst_106 : f32 to vector<32x16xf32>
    %302 = vector.extract_strided_slice %258 {offsets = [0, 16], sizes = [32, 240], strides = [1, 1]} : vector<32x256xf32> to vector<32x240xf32>
    %303 = tpu.concatenate %302, %301 in 1 : vector<32x240xf32>, vector<32x16xf32> -> vector<32x256xf32>
    %cst_107 = arith.constant 0.000000e+00 : f32
    %304 = vector.broadcast %cst_107 : f32 to vector<32x17xf32>
    %305 = vector.extract_strided_slice %258 {offsets = [0, 17], sizes = [32, 239], strides = [1, 1]} : vector<32x256xf32> to vector<32x239xf32>
    %306 = tpu.concatenate %305, %304 in 1 : vector<32x239xf32>, vector<32x17xf32> -> vector<32x256xf32>
    %cst_108 = arith.constant 0.000000e+00 : f32
    %307 = vector.shape_cast %20 : vector<1x256xi1> to vector<1x256xi1>
    %308 = vector.broadcast %307 : vector<1x256xi1> to vector<32x256xi1>
    %309 = vector.broadcast %cst_108 : f32 to vector<32x256xf32>
    %310 = arith.select %308, %306, %309 : vector<32x256xi1>, vector<32x256xf32>
    %311 = tpu.concatenate %269, %272, %279, %286, %258, %293, %300, %303, %310 in 0 : vector<32x256xf32>, vector<32x256xf32>, vector<32x256xf32>, vector<32x256xf32>, vector<32x256xf32>, vector<32x256xf32>, vector<32x256xf32>, vector<32x256xf32>, vector<32x256xf32> -> vector<288x256xf32>
    %312 = arith.truncf %311 : vector<288x256xf32> to vector<288x256xbf16>
    %cst_109 = arith.constant dense<0.000000e+00> : vector<32x256xf32>
    %313 = tpu.matmul %260, %312, %cst_109 {dimension_numbers = #tpu.dot_dimension_numbers<[1], [0], [0], [1], [0, 0, 1, 1], [], []>} : vector<32x288xbf16>, vector<288x256xbf16>, vector<32x256xf32> -> vector<32x256xf32>
    %314 = vector.broadcast %262 : vector<32x1xf32> to vector<32x256xf32>
    %315 = arith.addf %313, %314 : vector<32x256xf32>
    %cst_110 = arith.constant 0.000000e+00 : f32
    %316 = vector.broadcast %cst_110 : f32 to vector<32x256xf32>
    %317 = arith.maximumf %315, %316 : vector<32x256xf32>
    %c0_111 = arith.constant 0 : index
    %c0_112 = arith.constant 0 : index
    %c0_113 = arith.constant 0 : index
    %318 = vector.load %arg11[%c0_111, %c0_112, %c0_113] : memref<1x32x256xf32, #tpu.memory_space<vmem>>, vector<1x32x256xf32>
    %319 = vector.shape_cast %318 : vector<1x32x256xf32> to vector<32x256xf32>
    %320 = vector.shape_cast %199 : vector<32x256xf32> to vector<1x32x256xf32>
    tpu.vector_store %arg11[%c0_111, %c0_112, %c0_113], %320 {strides = array<i32>} : memref<1x32x256xf32, #tpu.memory_space<vmem>>, vector<1x32x256xf32>,
    %c0_114 = arith.constant 0 : index
    %c0_115 = arith.constant 0 : index
    %c0_116 = arith.constant 0 : index
    %321 = vector.load %arg12[%c0_114, %c0_115, %c0_116] : memref<1x32x256xf32, #tpu.memory_space<vmem>>, vector<1x32x256xf32>
    %322 = vector.shape_cast %321 : vector<1x32x256xf32> to vector<32x256xf32>
    %323 = vector.shape_cast %317 : vector<32x256xf32> to vector<1x32x256xf32>
    tpu.vector_store %arg12[%c0_114, %c0_115, %c0_116], %323 {strides = array<i32>} : memref<1x32x256xf32, #tpu.memory_space<vmem>>, vector<1x32x256xf32>,
    %c0_117 = arith.constant 0 : index
    %c0_118 = arith.constant 0 : index
    %324 = vector.load %arg4[%c0_117, %c0_118] : memref<8x288xbf16, #tpu.memory_space<vmem>>, vector<8x288xbf16>
    %c0_119 = arith.constant 0 : index
    %c0_120 = arith.constant 0 : index
    %325 = vector.load %arg5[%c0_119, %c0_120] : memref<8x1xf32, #tpu.memory_space<vmem>>, vector<8x1xf32>
    %cst_121 = arith.constant 0.000000e+00 : f32
    %326 = vector.broadcast %cst_121 : f32 to vector<32x17xf32>
    %327 = vector.extract_strided_slice %199 {offsets = [0, 0], sizes = [32, 239], strides = [1, 1]} : vector<32x256xf32> to vector<32x239xf32>
    %328 = tpu.concatenate %326, %327 in 1 : vector<32x17xf32>, vector<32x239xf32> -> vector<32x256xf32>
    %cst_122 = arith.constant 0.000000e+00 : f32
    %329 = vector.shape_cast %18 : vector<1x256xi1> to vector<1x256xi1>
    %330 = vector.broadcast %329 : vector<1x256xi1> to vector<32x256xi1>
    %331 = vector.broadcast %cst_122 : f32 to vector<32x256xf32>
    %332 = arith.select %330, %328, %331 : vector<32x256xi1>, vector<32x256xf32>
    %cst_123 = arith.constant 0.000000e+00 : f32
    %333 = vector.broadcast %cst_123 : f32 to vector<32x16xf32>
    %334 = vector.extract_strided_slice %199 {offsets = [0, 0], sizes = [32, 240], strides = [1, 1]} : vector<32x256xf32> to vector<32x240xf32>
    %335 = tpu.concatenate %333, %334 in 1 : vector<32x16xf32>, vector<32x240xf32> -> vector<32x256xf32>
    %cst_124 = arith.constant 0.000000e+00 : f32
    %336 = vector.broadcast %cst_124 : f32 to vector<32x15xf32>
    %337 = vector.extract_strided_slice %199 {offsets = [0, 0], sizes = [32, 241], strides = [1, 1]} : vector<32x256xf32> to vector<32x241xf32>
    %338 = tpu.concatenate %336, %337 in 1 : vector<32x15xf32>, vector<32x241xf32> -> vector<32x256xf32>
    %cst_125 = arith.constant 0.000000e+00 : f32
    %339 = vector.shape_cast %20 : vector<1x256xi1> to vector<1x256xi1>
    %340 = vector.broadcast %339 : vector<1x256xi1> to vector<32x256xi1>
    %341 = vector.broadcast %cst_125 : f32 to vector<32x256xf32>
    %342 = arith.select %340, %338, %341 : vector<32x256xi1>, vector<32x256xf32>
    %cst_126 = arith.constant 0.000000e+00 : f32
    %343 = vector.broadcast %cst_126 : f32 to vector<32x1xf32>
    %344 = vector.extract_strided_slice %199 {offsets = [0, 0], sizes = [32, 255], strides = [1, 1]} : vector<32x256xf32> to vector<32x255xf32>
    %345 = tpu.concatenate %343, %344 in 1 : vector<32x1xf32>, vector<32x255xf32> -> vector<32x256xf32>
    %cst_127 = arith.constant 0.000000e+00 : f32
    %346 = vector.shape_cast %18 : vector<1x256xi1> to vector<1x256xi1>
    %347 = vector.broadcast %346 : vector<1x256xi1> to vector<32x256xi1>
    %348 = vector.broadcast %cst_127 : f32 to vector<32x256xf32>
    %349 = arith.select %347, %345, %348 : vector<32x256xi1>, vector<32x256xf32>
    %cst_128 = arith.constant 0.000000e+00 : f32
    %350 = vector.broadcast %cst_128 : f32 to vector<32x1xf32>
    %351 = vector.extract_strided_slice %199 {offsets = [0, 1], sizes = [32, 255], strides = [1, 1]} : vector<32x256xf32> to vector<32x255xf32>
    %352 = tpu.concatenate %351, %350 in 1 : vector<32x255xf32>, vector<32x1xf32> -> vector<32x256xf32>
    %cst_129 = arith.constant 0.000000e+00 : f32
    %353 = vector.shape_cast %20 : vector<1x256xi1> to vector<1x256xi1>
    %354 = vector.broadcast %353 : vector<1x256xi1> to vector<32x256xi1>
    %355 = vector.broadcast %cst_129 : f32 to vector<32x256xf32>
    %356 = arith.select %354, %352, %355 : vector<32x256xi1>, vector<32x256xf32>
    %cst_130 = arith.constant 0.000000e+00 : f32
    %357 = vector.broadcast %cst_130 : f32 to vector<32x15xf32>
    %358 = vector.extract_strided_slice %199 {offsets = [0, 15], sizes = [32, 241], strides = [1, 1]} : vector<32x256xf32> to vector<32x241xf32>
    %359 = tpu.concatenate %358, %357 in 1 : vector<32x241xf32>, vector<32x15xf32> -> vector<32x256xf32>
    %cst_131 = arith.constant 0.000000e+00 : f32
    %360 = vector.shape_cast %18 : vector<1x256xi1> to vector<1x256xi1>
    %361 = vector.broadcast %360 : vector<1x256xi1> to vector<32x256xi1>
    %362 = vector.broadcast %cst_131 : f32 to vector<32x256xf32>
    %363 = arith.select %361, %359, %362 : vector<32x256xi1>, vector<32x256xf32>
    %cst_132 = arith.constant 0.000000e+00 : f32
    %364 = vector.broadcast %cst_132 : f32 to vector<32x16xf32>
    %365 = vector.extract_strided_slice %199 {offsets = [0, 16], sizes = [32, 240], strides = [1, 1]} : vector<32x256xf32> to vector<32x240xf32>
    %366 = tpu.concatenate %365, %364 in 1 : vector<32x240xf32>, vector<32x16xf32> -> vector<32x256xf32>
    %cst_133 = arith.constant 0.000000e+00 : f32
    %367 = vector.broadcast %cst_133 : f32 to vector<32x17xf32>
    %368 = vector.extract_strided_slice %199 {offsets = [0, 17], sizes = [32, 239], strides = [1, 1]} : vector<32x256xf32> to vector<32x239xf32>
    %369 = tpu.concatenate %368, %367 in 1 : vector<32x239xf32>, vector<32x17xf32> -> vector<32x256xf32>
    %cst_134 = arith.constant 0.000000e+00 : f32
    %370 = vector.shape_cast %20 : vector<1x256xi1> to vector<1x256xi1>
    %371 = vector.broadcast %370 : vector<1x256xi1> to vector<32x256xi1>
    %372 = vector.broadcast %cst_134 : f32 to vector<32x256xf32>
    %373 = arith.select %371, %369, %372 : vector<32x256xi1>, vector<32x256xf32>
    %374 = tpu.concatenate %332, %335, %342, %349, %199, %356, %363, %366, %373 in 0 : vector<32x256xf32>, vector<32x256xf32>, vector<32x256xf32>, vector<32x256xf32>, vector<32x256xf32>, vector<32x256xf32>, vector<32x256xf32>, vector<32x256xf32>, vector<32x256xf32> -> vector<288x256xf32>
    %375 = arith.truncf %374 : vector<288x256xf32> to vector<288x256xbf16>
    %cst_135 = arith.constant dense<0.000000e+00> : vector<8x256xf32>
    %376 = tpu.matmul %324, %375, %cst_135 {dimension_numbers = #tpu.dot_dimension_numbers<[1], [0], [0], [1], [0, 0, 1, 1], [], []>} : vector<8x288xbf16>, vector<288x256xbf16>, vector<8x256xf32> -> vector<8x256xf32>
    %377 = vector.broadcast %325 : vector<8x1xf32> to vector<8x256xf32>
    %378 = arith.addf %376, %377 : vector<8x256xf32>
    %c0_136 = arith.constant 0 : index
    %c0_137 = arith.constant 0 : index
    %c0_138 = arith.constant 0 : index
    %379 = vector.load %arg9[%c0_136, %c0_137, %c0_138] : memref<1x8x256xf32, #tpu.memory_space<vmem>>, vector<1x8x256xf32>
    %380 = vector.shape_cast %379 : vector<1x8x256xf32> to vector<8x256xf32>
    %381 = vector.shape_cast %378 : vector<8x256xf32> to vector<1x8x256xf32>
    tpu.vector_store %arg9[%c0_136, %c0_137, %c0_138], %381 {strides = array<i32>} : memref<1x8x256xf32, #tpu.memory_space<vmem>>, vector<1x8x256xf32>,
    %c0_139 = arith.constant 0 : index
    %c0_140 = arith.constant 0 : index
    %382 = vector.load %arg6[%c0_139, %c0_140] : memref<9x288xbf16, #tpu.memory_space<vmem>>, vector<9x288xbf16>
    %c0_141 = arith.constant 0 : index
    %c0_142 = arith.constant 0 : index
    %383 = vector.load %arg7[%c0_141, %c0_142] : memref<9x1xf32, #tpu.memory_space<vmem>>, vector<9x1xf32>
    %cst_143 = arith.constant 0.000000e+00 : f32
    %384 = vector.broadcast %cst_143 : f32 to vector<32x17xf32>
    %385 = vector.extract_strided_slice %317 {offsets = [0, 0], sizes = [32, 239], strides = [1, 1]} : vector<32x256xf32> to vector<32x239xf32>
    %386 = tpu.concatenate %384, %385 in 1 : vector<32x17xf32>, vector<32x239xf32> -> vector<32x256xf32>
    %cst_144 = arith.constant 0.000000e+00 : f32
    %387 = vector.shape_cast %18 : vector<1x256xi1> to vector<1x256xi1>
    %388 = vector.broadcast %387 : vector<1x256xi1> to vector<32x256xi1>
    %389 = vector.broadcast %cst_144 : f32 to vector<32x256xf32>
    %390 = arith.select %388, %386, %389 : vector<32x256xi1>, vector<32x256xf32>
    %cst_145 = arith.constant 0.000000e+00 : f32
    %391 = vector.broadcast %cst_145 : f32 to vector<32x16xf32>
    %392 = vector.extract_strided_slice %317 {offsets = [0, 0], sizes = [32, 240], strides = [1, 1]} : vector<32x256xf32> to vector<32x240xf32>
    %393 = tpu.concatenate %391, %392 in 1 : vector<32x16xf32>, vector<32x240xf32> -> vector<32x256xf32>
    %cst_146 = arith.constant 0.000000e+00 : f32
    %394 = vector.broadcast %cst_146 : f32 to vector<32x15xf32>
    %395 = vector.extract_strided_slice %317 {offsets = [0, 0], sizes = [32, 241], strides = [1, 1]} : vector<32x256xf32> to vector<32x241xf32>
    %396 = tpu.concatenate %394, %395 in 1 : vector<32x15xf32>, vector<32x241xf32> -> vector<32x256xf32>
    %cst_147 = arith.constant 0.000000e+00 : f32
    %397 = vector.shape_cast %20 : vector<1x256xi1> to vector<1x256xi1>
    %398 = vector.broadcast %397 : vector<1x256xi1> to vector<32x256xi1>
    %399 = vector.broadcast %cst_147 : f32 to vector<32x256xf32>
    %400 = arith.select %398, %396, %399 : vector<32x256xi1>, vector<32x256xf32>
    %cst_148 = arith.constant 0.000000e+00 : f32
    %401 = vector.broadcast %cst_148 : f32 to vector<32x1xf32>
    %402 = vector.extract_strided_slice %317 {offsets = [0, 0], sizes = [32, 255], strides = [1, 1]} : vector<32x256xf32> to vector<32x255xf32>
    %403 = tpu.concatenate %401, %402 in 1 : vector<32x1xf32>, vector<32x255xf32> -> vector<32x256xf32>
    %cst_149 = arith.constant 0.000000e+00 : f32
    %404 = vector.shape_cast %18 : vector<1x256xi1> to vector<1x256xi1>
    %405 = vector.broadcast %404 : vector<1x256xi1> to vector<32x256xi1>
    %406 = vector.broadcast %cst_149 : f32 to vector<32x256xf32>
    %407 = arith.select %405, %403, %406 : vector<32x256xi1>, vector<32x256xf32>
    %cst_150 = arith.constant 0.000000e+00 : f32
    %408 = vector.broadcast %cst_150 : f32 to vector<32x1xf32>
    %409 = vector.extract_strided_slice %317 {offsets = [0, 1], sizes = [32, 255], strides = [1, 1]} : vector<32x256xf32> to vector<32x255xf32>
    %410 = tpu.concatenate %409, %408 in 1 : vector<32x255xf32>, vector<32x1xf32> -> vector<32x256xf32>
    %cst_151 = arith.constant 0.000000e+00 : f32
    %411 = vector.shape_cast %20 : vector<1x256xi1> to vector<1x256xi1>
    %412 = vector.broadcast %411 : vector<1x256xi1> to vector<32x256xi1>
    %413 = vector.broadcast %cst_151 : f32 to vector<32x256xf32>
    %414 = arith.select %412, %410, %413 : vector<32x256xi1>, vector<32x256xf32>
    %cst_152 = arith.constant 0.000000e+00 : f32
    %415 = vector.broadcast %cst_152 : f32 to vector<32x15xf32>
    %416 = vector.extract_strided_slice %317 {offsets = [0, 15], sizes = [32, 241], strides = [1, 1]} : vector<32x256xf32> to vector<32x241xf32>
    %417 = tpu.concatenate %416, %415 in 1 : vector<32x241xf32>, vector<32x15xf32> -> vector<32x256xf32>
    %cst_153 = arith.constant 0.000000e+00 : f32
    %418 = vector.shape_cast %18 : vector<1x256xi1> to vector<1x256xi1>
    %419 = vector.broadcast %418 : vector<1x256xi1> to vector<32x256xi1>
    %420 = vector.broadcast %cst_153 : f32 to vector<32x256xf32>
    %421 = arith.select %419, %417, %420 : vector<32x256xi1>, vector<32x256xf32>
    %cst_154 = arith.constant 0.000000e+00 : f32
    %422 = vector.broadcast %cst_154 : f32 to vector<32x16xf32>
    %423 = vector.extract_strided_slice %317 {offsets = [0, 16], sizes = [32, 240], strides = [1, 1]} : vector<32x256xf32> to vector<32x240xf32>
    %424 = tpu.concatenate %423, %422 in 1 : vector<32x240xf32>, vector<32x16xf32> -> vector<32x256xf32>
    %cst_155 = arith.constant 0.000000e+00 : f32
    %425 = vector.broadcast %cst_155 : f32 to vector<32x17xf32>
    %426 = vector.extract_strided_slice %317 {offsets = [0, 17], sizes = [32, 239], strides = [1, 1]} : vector<32x256xf32> to vector<32x239xf32>
    %427 = tpu.concatenate %426, %425 in 1 : vector<32x239xf32>, vector<32x17xf32> -> vector<32x256xf32>
    %cst_156 = arith.constant 0.000000e+00 : f32
    %428 = vector.shape_cast %20 : vector<1x256xi1> to vector<1x256xi1>
    %429 = vector.broadcast %428 : vector<1x256xi1> to vector<32x256xi1>
    %430 = vector.broadcast %cst_156 : f32 to vector<32x256xf32>
    %431 = arith.select %429, %427, %430 : vector<32x256xi1>, vector<32x256xf32>
    %432 = tpu.concatenate %390, %393, %400, %407, %317, %414, %421, %424, %431 in 0 : vector<32x256xf32>, vector<32x256xf32>, vector<32x256xf32>, vector<32x256xf32>, vector<32x256xf32>, vector<32x256xf32>, vector<32x256xf32>, vector<32x256xf32>, vector<32x256xf32> -> vector<288x256xf32>
    %433 = arith.truncf %432 : vector<288x256xf32> to vector<288x256xbf16>
    %cst_157 = arith.constant dense<0.000000e+00> : vector<9x256xf32>
    %434 = tpu.matmul %382, %433, %cst_157 {dimension_numbers = #tpu.dot_dimension_numbers<[1], [0], [0], [1], [0, 0, 1, 1], [], []>} : vector<9x288xbf16>, vector<288x256xbf16>, vector<9x256xf32> -> vector<9x256xf32>
    %435 = vector.broadcast %383 : vector<9x1xf32> to vector<9x256xf32>
    %436 = arith.addf %434, %435 : vector<9x256xf32>
    %c0_158 = arith.constant 0 : index
    %c0_159 = arith.constant 0 : index
    %437 = vector.load %arg8[%c0_158, %c0_159] : memref<9x1xf32, #tpu.memory_space<vmem>>, vector<9x1xf32>
    %438 = vector.broadcast %437 : vector<9x1xf32> to vector<9x256xf32>
    %439 = arith.mulf %436, %438 : vector<9x256xf32>
    %c0_160 = arith.constant 0 : index
    %c0_161 = arith.constant 0 : index
    %c0_162 = arith.constant 0 : index
    %440 = vector.load %arg10[%c0_160, %c0_161, %c0_162] : memref<1x9x256xf32, #tpu.memory_space<vmem>>, vector<1x9x256xf32>
    %441 = vector.shape_cast %440 : vector<1x9x256xf32> to vector<9x256xf32>
    %442 = vector.shape_cast %439 : vector<9x256xf32> to vector<1x9x256xf32>
    tpu.vector_store %arg10[%c0_160, %c0_161, %c0_162], %442 {strides = array<i32>} : memref<1x9x256xf32, #tpu.memory_space<vmem>>, vector<1x9x256xf32>,
    return
  }
  func.func @transform_0(%arg0: i32) -> (i32, i32, i32) {
    %c0_i32 = arith.constant 0 : i32
    %c0_i32_0 = arith.constant 0 : i32
    %c0_i32_1 = arith.constant 0 : i32
    return %arg0, %c0_i32, %c0_i32_0 : i32, i32, i32
  }
  func.func @transform_1(%arg0: i32) -> (i32, i32, i32) {
    %c0_i32 = arith.constant 0 : i32
    %c0_i32_0 = arith.constant 0 : i32
    %c0_i32_1 = arith.constant 0 : i32
    %c0_i32_2 = arith.constant 0 : i32
    return %c0_i32, %c0_i32_0, %c0_i32_1 : i32, i32, i32
  }
  func.func @transform_2(%arg0: i32) -> (i32, i32, i32) {
    %c0_i32 = arith.constant 0 : i32
    %c0_i32_0 = arith.constant 0 : i32
    %c0_i32_1 = arith.constant 0 : i32
    %c0_i32_2 = arith.constant 0 : i32
    return %c0_i32, %c0_i32_0, %c0_i32_1 : i32, i32, i32
  }
  func.func @transform_3(%arg0: i32) -> (i32, i32) {
    %c0_i32 = arith.constant 0 : i32
    %c0_i32_0 = arith.constant 0 : i32
    %c0_i32_1 = arith.constant 0 : i32
    return %c0_i32, %c0_i32_0 : i32, i32
  }
  func.func @transform_4(%arg0: i32) -> (i32, i32) {
    %c0_i32 = arith.constant 0 : i32
    %c0_i32_0 = arith.constant 0 : i32
    %c0_i32_1 = arith.constant 0 : i32
    return %c0_i32, %c0_i32_0 : i32, i32
  }
  func.func @transform_5(%arg0: i32) -> (i32, i32) {
    %c0_i32 = arith.constant 0 : i32
    %c0_i32_0 = arith.constant 0 : i32
    %c0_i32_1 = arith.constant 0 : i32
    return %c0_i32, %c0_i32_0 : i32, i32
  }
  func.func @transform_6(%arg0: i32) -> (i32, i32) {
    %c0_i32 = arith.constant 0 : i32
    %c0_i32_0 = arith.constant 0 : i32
    %c0_i32_1 = arith.constant 0 : i32
    return %c0_i32, %c0_i32_0 : i32, i32
  }
  func.func @transform_7(%arg0: i32) -> (i32, i32) {
    %c0_i32 = arith.constant 0 : i32
    %c0_i32_0 = arith.constant 0 : i32
    %c0_i32_1 = arith.constant 0 : i32
    return %c0_i32, %c0_i32_0 : i32, i32
  }
  func.func @transform_8(%arg0: i32) -> (i32, i32, i32) {
    %c0_i32 = arith.constant 0 : i32
    %c0_i32_0 = arith.constant 0 : i32
    %c0_i32_1 = arith.constant 0 : i32
    return %arg0, %c0_i32, %c0_i32_0 : i32, i32, i32
  }
  func.func @transform_9(%arg0: i32) -> (i32, i32, i32) {
    %c0_i32 = arith.constant 0 : i32
    %c0_i32_0 = arith.constant 0 : i32
    %c0_i32_1 = arith.constant 0 : i32
    return %arg0, %c0_i32, %c0_i32_0 : i32, i32, i32
  }
  func.func @transform_10(%arg0: i32) -> (i32, i32, i32) {
    %c0_i32 = arith.constant 0 : i32
    %c0_i32_0 = arith.constant 0 : i32
    %c0_i32_1 = arith.constant 0 : i32
    return %arg0, %c0_i32, %c0_i32_0 : i32, i32, i32
  }
  func.func @transform_11(%arg0: i32) -> (i32, i32, i32) {
    %c0_i32 = arith.constant 0 : i32
    %c0_i32_0 = arith.constant 0 : i32
    %c0_i32_1 = arith.constant 0 : i32
    return %arg0, %c0_i32, %c0_i32_0 : i32, i32, i32
  }
}

</mosaic_0001>

<bundles_post_ra>
// kernel: tpu_custom_call.1
= control target key start
LH: loop header
LB: loop body
LE: loop exit
PB: predicated region body
PF: predicated region fallthrough
CT: control target
= control target key end

     0   :  { %s8627_s0 = inlined_call_operand.vmem [shape: f32[2,32,256], index: 0, kind: input, shape index: {}]   ;;  %s8628_s1 = inlined_call_operand.hbm [shape: bf16[5,32,288], index: 1, kind: input, shape index: {}]   ;;  %s8629_s2 = inlined_call_operand.vmem [shape: f32[5,32,1], index: 2, kind: input, shape index: {}]   ;;  %s8630_s3 = inlined_call_operand.vmem [shape: bf16[8,288], index: 3, kind: input, shape index: {}]   ;;  %s8631_s4 = inlined_call_operand.vmem [shape: f32[8,1], index: 4, kind: input, shape index: {}]   ;;  %s8632_s5 = inlined_call_operand.vmem [shape: bf16[9,288], index: 5, kind: input, shape index: {}]   ;;  %s8633_s6 = inlined_call_operand.vmem [shape: f32[9,1], index: 6, kind: input, shape index: {}]   ;;  %s8634_s7 = inlined_call_operand.vmem [shape: f32[9,1], index: 7, kind: input, shape index: {}]   ;;  %s8635_s8 = inlined_call_operand.hbm [shape: f32[2,8,256], index: 8, kind: output, shape index: {0}]   ;;  %s8636_s9 = inlined_call_operand.vmem [shape: f32[2,9,256], index: 9, kind: output, shape index: {1}]   ;;  %s8637_s10 = inlined_call_operand.hbm [shape: f32[2,32,256], index: 10, kind: output, shape index: {2}]   ;;  %s8638_s11 = inlined_call_operand.hbm [shape: f32[2,32,256], index: 11, kind: output, shape index: {3}]  }
   0x1   :  { %8701 = sst [smem:[#allocation43_spill]] %s8627_s0 }
   0x2   :  { %8702 = sst [smem:[#allocation44_spill]] %s8628_s1 }
   0x3   :  { %8703 = sst [smem:[#allocation45_spill]] %s8629_s2 }
   0x4   :  { %17 = vsyncpa [#allocation3], 0 }
   0x5   :  { %18 = vsyncpa [#allocation4], 0 }
   0x6   :  { %20 = vsyncpa [#allocation4 + $0x1], 0 }
   0x7   :  { %21 = vsyncpa [#allocation7], 0 }
   0x8   :  { %23 = vsyncpa [#allocation7 + $0x1], 0  ;;  %s6134_s17 = smov 0   ;;  %s6136_s18 = smov 0  }
   0x9   :  { %s6138_s19 = smov 0   ;;  %s6140_s20 = smov 0  }
   0xa LB: > { %8704 = sst [smem:[#allocation12_spill]] %s6047_s17  ;;  %s6155_s21 = sadd.s32 4294967295, %s6059_s20   ;;  %s6059_s20 = sphi %s6140_s20, %s8819_s20   ;;  %s6055_s19 = sphi %s6138_s19, %s8822_s19   ;;  %s6051_s18 = sphi %s6136_s18, %s8821_s18   ;;  %s6047_s17 = sphi %s6134_s17, %s8820_s17  }
   0xb   : > { %8705 = sst [smem:[#allocation13_spill]] %s6051_s18  ;;  %s8639_s22 = sadd.s32 4294967294, %s6059_s20  }
   0xc   : > { %8706 = sst [smem:[#allocation14_spill]] %s6055_s19  ;;  %s6159_s23 = sadd.s32 1, %s6059_s20  }
   0xd   : > { %8707 = sst [smem:[#allocation15_spill]] %s6059_s20  ;;  %s209_s24 = sadd.s32 1, %s6055_s19 }
   0xe   : > { %8708 = sst [smem:[#allocation16_spill]] %s6159_s23  ;;  %s206_s25 = ssub.s32 %s6059_s20, %s6159_s23 }
   0xf   : > { %p219_p0 = scmp.ne.s32.totalorder %s6055_s19, %s6051_s18  ;;  %p207_p1 = scmp.eq.s32.totalorder %s206_s25, 0 }
  0x10   : > { %p220_p2 = scmp.eq.s32.totalorder %s6155_s21, 1  ;;  %p225_p3 = scmp.ne.s32.totalorder %s6051_s18, %s6047_s17 }
  0x11   : > { %p226_p4 = scmp.eq.s32.totalorder %s8639_s22, 1  ;;  %p4019_p7 = scmp.ge.s32.totalorder %s6059_s20, 1 }
  0x12   : > { %s6172_s26 = scalar_select %p207_p1, %s6055_s19, %s209_s24  }
  0x13   : > { %p6174_p5 = por %p220_p2, %p219_p0  ;;  %p6178_p6 = por %p226_p4, %p225_p3 }
  0x14   : > { %8709 = sst [smem:[#allocation17_spill]] %s6172_s26  ;;  %p311_p8 = scmp.lt.s32.totalorder %s6059_s20, 3 }
  0x15   : > { %s8711_s28 = scalar_select %p6178_p6, 1, 0 }
  0x16   : > { %p4892_p9 = scmp.eq.s32.totalorder %s6155_s21, 0  ;;  %p312_p10 = pnand %p4019_p7, %p311_p8 }
  0x17   : > { %8712 = sst [smem:[#allocation18_spill]] %s8711_s28  ;;  %s6061_s13 = smov [#allocation2]  }
  0x18   : > { %s8713_s1 = sld [smem:[#allocation44_spill]]  ;;  %p4878_p11 = pneg %p312_p10 }
  0x19   : > { %s324_s14 = sshll.u32 %s6061_s13, 4  ;;  %s6062_s15 = smov 192   ;;  %s325_s14 = int_to_ptr.vmem [resolvable:$true] %s324_s14 }
  0x1a   : > { %p4879_p12 = pnand %p4892_p9, %p4878_p11  ;;  %s6063_s16 = smov 12  }
  0x1b   : > { %366 = sbr.rel (%p312_p10) target bundleno = 1877 (0x755), region = 52 }
  0x1e   : > { %s322_s12 = sshll.u32 %s8713_s1, 4  ;;  %s323_s12 = int_to_ptr.hbm [resolvable:$true] %s322_s12 }
  0x1f   : > { %4881 = dma.hbm_to_vmem [thread:$0]  (!%p4879_p12), %s323_s12, 3840, %s325_s14, [#allocation3], %s6062_s15, %s6062_s15, %s6063_s16  }
  0x20   : > { %6034 = dma.done.wait (%p4892_p9), [#allocation3], 3840  }
  0x21   : > { %6036 = vsyncadd (%p4892_p9), [#allocation3], 4294963456  ;;  %p422_p13 = scmp.lt.s32.totalorder %s6155_s21, 1  ;;  %s8714_s0 = sld [smem:[#allocation43_spill]]  ;;  %v433_v20 = vlaneseq  ;;  %vm631_vm1 = vcmask 7168   ;;  %vm586_vm4 = vcmask 121856  }
  0x22   : > { %s8670_s12 = smov 1   ;;  %s8672_s14 = smov 15   ;;  %vm553_vm6 = vcmask 130048   ;;  %vm787_vm7 = vcmask 908288   ;;  %vm898_vm12 = vcmask 261120   ;;  %vm754_vm13 = vcmask 916480  }
  0x23   : > { %s6196_s24 = scalar_select %p422_p13, %s6155_s21, 1  ;;  %v434_v21 = vand.u32 127, %v433_v20  ;;  %vm4067_vm8 = vmneg %vm553_vm6  ;;  %vm508_vm14 = vcmask 138240   ;;  %v4863_v63 = vld [vmem:[%s8632_s5 + $0x8] sm:$0x10] }
  0x24   : > { %s8648_s15 = smov 17   ;;  %s8640_s16 = smov 111   ;;  %vm6353_vm9 = vmpackc.low %vm4067_vm8, %vm4067_vm8  ;;  %vm713_vm8 = vcmask 924672  }
  0x25   : > { %s4830_s25 = sshll.u32 %s6196_s24, 6  ;;  %s8644_s29 = smov 112   ;;  %v440_v23 = vand.u32 15, %v434_v21  ;;  %v6336_v54 = vadd.s32 128, %v434_v21  ;;  %vm6431_vm15 = vmpackc.low %vm754_vm13, %vm754_vm13 }
  0x26   : > { %s8642_s30 = smov 113   ;;  %s8729_s2 = sld [smem:[#allocation45_spill]] }
  0x27   : > { %s426_s13 = scalar_lea.vmem %s8714_s0, %s4830_s25  ;;  %s8646_s25 = smov 16   ;;  %vm460_vm0 = vcmp.ge.s32.totalorder %v440_v23, 1  ;;  %vm462_vm3 = vcmp.lt.s32.totalorder %v440_v23, 15 }
  0x28   : > { %v6202_v0 = vld [vmem:[%s426_s13 + $0x20] sm:$0xff]  ;;  %v6204_v1 = vld [vmem:[%s426_s13 + $0x30] sm:$0xff]  ;;  %v6217_v6 = vld [vmem:[%s426_s13 + $0x28] sm:$0xff]  ;;  %s8734_s22 = smov 111   ;;  %s7449_s28 = sand.u32 1, %s6051_s18  }
  0x29   : > { %v6206_v2 = vld [vmem:[%s426_s13] sm:$0xff]  ;;  %v4940_v3 = vpack.i.bf16 %v6204_v1, %v6202_v0  ;;  %v6210_v4 = vld [vmem:[%s426_s13 + $0x10] sm:$0xff]  ;;  %v4965_v8 = vpack.i.bf16 %v6217_v6, %v6202_v0  ;;  %v6226_v9 = vld [vmem:[%s426_s13 + $0x38] sm:$0xff]  ;;  %s8803_s0 = smov 15   ;;  %s8811_s17 = sshll.u32 %s7449_s28, 6 }
  0x2a   : > { %v4960_v5 = vpack.i.bf16 %v6210_v4, %v6206_v2  ;;  %v4945_v7 = vpack.i.bf16 %v6202_v0, %v6206_v2  ;;  %v6228_v10 = vld [vmem:[%s426_s13 + $0x8] sm:$0xff]  ;;  %v4970_v11 = vpack.i.bf16 %v6226_v9, %v6204_v1  ;;  %v6237_v13 = vld [vmem:[%s426_s13 + $0x18] sm:$0xff]  ;;  %v4995_v15 = vpack.i.bf16 %v6226_v9, %v6217_v6  ;;  %s8650_s13 = smov 127   ;;  %vm6292_vm2 = vmpackc.low %vm460_vm0, %vm460_vm0  ;;  %s8097_s18 = scalar_lea.vmem [#allocation8], %s8811_s17 }
  0x2b   : > { %4941 = vrot.lane.b32.xlu0 %v4940_v3, %s8670_s12  ;;  %v4980_v12 = vpack.i.bf16 %v6228_v10, %v6206_v2  ;;  %v4985_v14 = vpack.i.bf16 %v6237_v13, %v6210_v4  ;;  %v5000_v16 = vpack.i.bf16 %v6210_v4, %v6204_v1  ;;  %v5010_v17 = vpack.i.bf16 %v6237_v13, %v6228_v10  ;;  %vm6320_vm5 = vmpackc.low %vm462_vm3, %vm462_vm3  ;;  %s4024_s19 = sshll.u32 %s7449_s28, 4  ;;  %s4866_s1 = sshll.u32 %s6155_s21, 6 }
  0x2c   : > { %4961 = vrot.lane.b32.xlu2 %v4960_v5, %s8672_s14  ;;  %4951 = vrot.lane.b32.xlu1 %v4960_v5, %s8670_s12  ;;  %s8446_s23 = scalar_lea.vmem [#allocation5], %s4024_s19  ;;  %s4865_s17 = sshll.u32 %s6155_s21, 4 }
  0x2d   : > { %s5953_s19 = scalar_lea.hbm %s8637_s10, 128 }
  0x33   : > { %4946 = vrot.lane.b32.xlu0 %v4945_v7, %s8648_s15  ;;  %v447_v7 = vand.u32 15, %v6336_v54 }
  0x34   : > { %4966 = vrot.lane.b32.xlu2 %v4965_v8, %s8640_s16  ;;  %4956 = vrot.lane.b32.xlu1 %v4940_v3, %s8672_s14 }
  0x35   : > { %vm6372_vm10 = vcmp.ge.s32.totalorder %v447_v7, 1  ;;  %vm463_vm0 = vcmp.lt.s32.totalorder %v447_v7, 15 }
  0x36   : > { %vm6401_vm11 = vmpackc.low %vm6372_vm10, %vm6372_vm10  ;;  %vm672_vm10 = vcmask 1039360  }
  0x37   : > { %vm6459_vm3 = vmpackc.low %vm463_vm0, %vm463_vm0 }
  0x3b   : > { %4971 = vrot.lane.b32.xlu0 %v4970_v11, %s8640_s16 }
  0x3c   : > { %4981 = vrot.lane.b32.xlu2 %v4980_v12, %s8640_s16  ;;  %4976 = vrot.lane.b32.xlu1 %v4940_v3, %s8646_s25 }
  0x43   : > { %4986 = vrot.lane.b32.xlu0 %v4985_v14, %s8640_s16  ;;  %s8695_s16 = sshll.u32 %s7449_s28, 6 }
  0x44   : > { %4996 = vrot.lane.b32.xlu2 %v4995_v15, %s8670_s12  ;;  %4991 = vrot.lane.b32.xlu1 %v4960_v5, %s8646_s25 }
  0x4b   : > { %5001 = vrot.lane.b32.xlu0 %v5000_v16, %s8648_s15 }
  0x4c   : > { %5011 = vrot.lane.b32.xlu2 %v5010_v17, %s8670_s12  ;;  %5006 = vrot.lane.b32.xlu1 %v4995_v15, %s8644_s29 }
  0x53   : > { %5016 = vrot.lane.b32.xlu0 %v5010_v17, %s8644_s29 }
  0x54   : > { %5021 = vrot.lane.b32.xlu1 %v4995_v15, %s8672_s14  ;;  %5026 = vrot.lane.b32.xlu2 %v4940_v3, %s8644_s29 }
  0x5b   : > { %5031 = vrot.lane.b32.xlu0 %v4995_v15, %s8642_s30 }
  0x5c   : > { %5036 = vrot.lane.b32.xlu1 %v5010_v17, %s8672_s14  ;;  %5041 = vrot.lane.b32.xlu2 %v4960_v5, %s8644_s29 }
  0x63   : > { %5046 = vrot.lane.b32.xlu0 %v5010_v17, %s8642_s30 }
  0x64   : > { %5051 = vrot.lane.b32.xlu1 %v4995_v15, %s8646_s25  ;;  %5056 = vrot.lane.b32.xlu2 %v4940_v3, %s8642_s30 }
  0x6b   : > { %5061 = vrot.lane.b32.xlu0 %v4995_v15, %s8650_s13 }
  0x6c   : > { %5066 = vrot.lane.b32.xlu1 %v5010_v17, %s8646_s25  ;;  %5071 = vrot.lane.b32.xlu2 %v4960_v5, %s8642_s30 }
  0x73   : > { %5076 = vrot.lane.b32.xlu0 %v5010_v17, %s8650_s13 }
  0x74   : > { %5081 = vrot.lane.b32.xlu1 %v4995_v15, %s8648_s15  ;;  %5086 = vrot.lane.b32.xlu2 %v4940_v3, %s8650_s13 }
  0x7b   : > { %5091 = vrot.lane.b32.xlu0 %v5010_v17, %s8648_s15 }
  0x7c   : > { %5096 = vrot.lane.b32.xlu1 %v4960_v5, %s8650_s13 }
  0x86   : > { %v6270_v18 = vpop.permute.xlu2 %4961 }
  0x87   : > { %v4964_v40 = vunpack.i.h.bf16 %v6270_v18  ;;  %v4963_v41 = vunpack.i.l.bf16 %v6270_v18 }
  0x89   : > { %v599_v49 = vsel %vm586_vm4, 0.0, %v4963_v41  ;;  %v600_v50 = vsel %vm586_vm4, 0.0, %v4964_v40 }
  0x8a   : > { %v4065_v58 = vpack.c.bf16 %v600_v50, %v599_v49 }
  0x8e   : > { %v6272_v19 = vpop.permute.xlu2 %4966 }
  0x8f   : > { %v4969_v51 = vunpack.i.h.bf16 %v6272_v19  ;;  %v4968_v52 = vunpack.i.l.bf16 %v6272_v19 }
  0x91   : > { %v790_v61 = vsel %vm787_vm7, %v4968_v52, %v4969_v51 }
  0x96   : > { %v6274_v22 = vpop.permute.xlu2 %4981 }
  0x97   : > { %v4984_v14 = vunpack.i.h.bf16 %v6274_v22  ;;  %v4983_v15 = vunpack.i.l.bf16 %v6274_v22  ;;  %v481_v22 = vld [vmem:[%s8729_s2 + $0x8] sm:$0xff] }
  0x9d   : > { %v6276_v24 = vpop.permute.xlu0 %4941 }
  0x9e   : > { %v4944_v25 = vunpack.i.h.bf16 %v6276_v24  ;;  %v4943_v26 = vunpack.i.l.bf16 %v6276_v24  ;;  %v6280_v27 = vpop.permute.xlu1 %4951  ;;  %v6282_v28 = vpop.permute.xlu2 %4996 }
  0x9f   : > { %v4954_v29 = vunpack.i.h.bf16 %v6280_v27  ;;  %v4953_v30 = vunpack.i.l.bf16 %v6280_v27  ;;  %v4999_v11 = vunpack.i.h.bf16 %v6282_v28  ;;  %v4998_v12 = vunpack.i.l.bf16 %v6282_v28 }
  0xa0   : > { %v646_v31 = vsel %vm631_vm1, 0.0, %v4943_v26  ;;  %v647_v32 = vsel %vm631_vm1, 0.0, %v4944_v25 }
  0xa1   : > { %v4056_v34 = vpack.c.bf16 %v647_v32, %v646_v31  ;;  %v644_v35 = vsel %vm631_vm1, 0.0, %v4953_v30  ;;  %v645_v36 = vsel %vm631_vm1, 0.0, %v4954_v29  ;;  %v634_v28 = vsel %vm631_vm1, %v4943_v26, %v4998_v12 }
  0xa2   : > { %v4059_v38 = vpack.c.bf16 %v645_v36, %v644_v35  ;;  %v635_v31 = vsel %vm631_vm1, %v4944_v25, %v4999_v11 }
  0xa3   : > { %4057 = vmatpush.bf16.msk.msra.mxu0 %vm6292_vm2, %v4056_v34 }
  0xa5   : > { %v6304_v37 = vpop.permute.xlu0 %4946 }
  0xa6   : > { %v6306_v39 = vpop.permute.xlu1 %4956  ;;  %v5012_v44 = vpop.permute.xlu2 %5011  ;;  %v4948_v12 = vunpack.i.l.bf16 %v6304_v37 }
  0xa7   : > { %v4959_v42 = vunpack.i.h.bf16 %v6306_v39  ;;  %v4958_v43 = vunpack.i.l.bf16 %v6306_v39  ;;  %4060 = vmatpush.bf16.msk.msra.mxu0 %vm6292_vm2, %v4059_v38  ;;  %v5014_v32 = vunpack.i.h.bf16 %v5012_v44  ;;  %v5013_v34 = vunpack.i.l.bf16 %v5012_v44  ;;  %v4041_v38 = vld [vmem:[#allocation2 + $0x8] sm:$0xf] }
  0xa9   : > { %v601_v45 = vsel %vm586_vm4, 0.0, %v4958_v43  ;;  %v602_v46 = vsel %vm586_vm4, 0.0, %v4959_v42  ;;  %v632_v50 = vsel %vm631_vm1, %v4953_v30, %v5013_v34  ;;  %v633_v52 = vsel %vm631_vm1, %v4954_v29, %v5014_v32 }
  0xaa   : > { %v4062_v48 = vpack.c.bf16 %v602_v46, %v601_v45  ;;  %v4834_v45 = vld [vmem:[#allocation2 + $0x10] sm:$0xf0]  ;;  %v788_v46 = vsel %vm787_vm7, %v4983_v15, %v4984_v14 }
  0xab   : > { %v6405_v49 = vor.u32 %v4834_v45, %v4041_v38 }
  0xac   : > { %4063 = vmatpush.bf16.msk.msra.mxu0 %vm6320_vm5, %v4062_v48  ;;  %v4104_v48 = vpack.c.bf16 %v635_v31, %v634_v28 }
  0xad   : > { %v6334_v53 = vpop.permute.xlu0 %4971 }
  0xae   : > { %v6338_v55 = vpop.permute.xlu1 %4976  ;;  %v4974_v56 = vunpack.i.h.bf16 %v6334_v53  ;;  %v4973_v57 = vunpack.i.l.bf16 %v6334_v53  ;;  %v5027_v8 = vpop.permute.xlu2 %5026 }
  0xaf   : > { %v4979_v59 = vunpack.i.h.bf16 %v6338_v55  ;;  %v4978_v60 = vunpack.i.l.bf16 %v6338_v55 }
  0xb0   : > { %4066 = vmatpush.bf16.msk.msra.mxu0 %vm6320_vm5, %v4065_v58  ;;  %v791_v62 = vsel %vm787_vm7, %v4973_v57, %v4974_v56  ;;  %v4949_v57 = vunpack.i.h.bf16 %v6304_v37  ;;  %v5029_v58 = vunpack.i.h.bf16 %v5027_v8  ;;  %v803_v45 = vsel %vm787_vm7, %v4974_v56, 0.0 }
  0xb1   : > { %v4070_v3 = vpack.c.bf16 %v4979_v59, %v4978_v60  ;;  %v4096_v5 = vpack.c.bf16 %v791_v62, %v790_v61  ;;  %v5028_v61 = vunpack.i.l.bf16 %v5027_v8  ;;  %v830_v37 = vpack.c.bf16 %v6204_v1, %v6202_v0 }
  0xb2   : > { %v523_v15 = vsel %vm508_vm14, 0.0, %v4949_v57 }
  0xb3   : > { %4097 = vmatpush.bf16.msk.msra.mxu3 %vm6320_vm5, %v4096_v5  ;;  %v4107_v5 = vpack.c.bf16 %v633_v52, %v632_v50  ;;  %v802_v52 = vsel %vm787_vm7, %v4969_v51, 0.0  ;;  %v4053_v51 = vld [vmem:[#allocation2 + $0x20] sm:$0xf] }
  0xb4   : > { %4071 = vmatpush.bf16.msk.msra.mxu0 %vm6353_vm9, %v4070_v3 }
  0xb5   : > { %v6370_v16 = vpop.permute.xlu0 %4986 }
  0xb6   : > { %v6376_v20 = vpop.permute.xlu1 %4991  ;;  %v4989_v21 = vunpack.i.h.bf16 %v6370_v16  ;;  %v4988_v23 = vunpack.i.l.bf16 %v6370_v16  ;;  %v5042_v54 = vpop.permute.xlu2 %5041 }
  0xb7   : > { %v4994_v35 = vunpack.i.h.bf16 %v6376_v20  ;;  %v4993_v36 = vunpack.i.l.bf16 %v6376_v20 }
  0xb8   : > { %v789_v26 = vsel %vm787_vm7, %v4988_v23, %v4989_v21  ;;  %v801_v19 = vsel %vm787_vm7, %v4989_v21, 0.0 }
  0xb9   : > { %v4075_v24 = vpack.c.bf16 %v4994_v35, %v4993_v36  ;;  %v4099_v25 = vpack.c.bf16 %v789_v26, %v788_v46  ;;  %v4033_v46 = vld [vmem:[#allocation2] sm:$0xf]  ;;  %v4833_v26 = vld [vmem:[#allocation2 + $0x8] sm:$0xf0] }
  0xbb   : > { %4076 = vmatpush.bf16.msk.msra.mxu0 %vm6353_vm9, %v4075_v24  ;;  %4100 = vmatpush.bf16.msk.msra.mxu3 %vm6320_vm5, %v4099_v25  ;;  %v5044_v24 = vunpack.i.h.bf16 %v5042_v54  ;;  %v5043_v25 = vunpack.i.l.bf16 %v5042_v54  ;;  %v6463_v54 = vor.u32 %v4833_v26, %v4033_v46 }
  0xbd   : > { %v6420_v62 = vpop.permute.xlu0 %5001 }
  0xbe   : > { %v5007_v3 = vpop.permute.xlu1 %5006  ;;  %v5004_v30 = vunpack.i.h.bf16 %v6420_v62  ;;  %v5003_v27 = vunpack.i.l.bf16 %v6420_v62  ;;  %4101 = vmatmul.msk.bf16.vlgmr.msra.gmra.mxu3 %vm898_vm12, %v6405_v49  ;;  %v5057_v53 = vpop.permute.xlu2 %5056  ;;  %v828_v62 = vpack.c.bf16 %v6210_v4, %v6206_v2 }
  0xbf   : > { %4105 = vmatpush.bf16.msk.msrb.mxu3 %vm6401_vm11, %v4104_v48  ;;  %v5009_v29 = vunpack.i.h.bf16 %v5007_v3  ;;  %v5008_v11 = vunpack.i.l.bf16 %v5007_v3  ;;  %v521_v48 = vsel %vm508_vm14, 0.0, %v4948_v12  ;;  %v5059_v39 = vunpack.i.h.bf16 %v5057_v53 }
  0xc0   : > { %v524_v17 = vsel %vm508_vm14, 0.0, %v5003_v27  ;;  %v522_v38 = vsel %vm508_vm14, 0.0, %v5004_v30 }
  0xc1   : > { %v4122_v23 = vpack.c.bf16 %v5009_v29, %v5008_v11  ;;  %v4078_v28 = vpack.c.bf16 %v524_v17, %v523_v15  ;;  %v757_v31 = vsel %vm754_vm13, %v5028_v61, %v5008_v11  ;;  %v758_v32 = vsel %vm754_vm13, %v5029_v58, %v5009_v29  ;;  %v4837_v15 = vld [vmem:[#allocation2 + $0x28] sm:$0xf0] }
  0xc2   : > { %v842_v34 = vpack.c.bf16 %v758_v32, %v757_v31  ;;  %v4081_v50 = vpack.c.bf16 %v522_v38, %v521_v48  ;;  %v800_v31 = vsel %vm787_vm7, %v4984_v14, 0.0  ;;  %v6072_v14 = vmov 0  }
  0xc3   : > { %4108 = vmatpush.bf16.msk.msrb.mxu3 %vm6401_vm11, %v4107_v5  ;;  %4123 = vmatpush.bf16.msk.msra.mxu2 %vm6431_vm15, %v4122_v23  ;;  %v4140_v5 = vpack.c.bf16 %v803_v45, %v802_v52  ;;  %v4143_v38 = vpack.c.bf16 %v801_v19, %v800_v31  ;;  %v6486_v45 = vor.u32 %v4837_v15, %v4053_v51  ;;  %v4045_v19 = vld [vmem:[#allocation2 + $0x18] sm:$0xf]  ;;  %v4836_v51 = vld [vmem:[#allocation2 + $0x20] sm:$0xf0] }
  0xc4   : > { %4079 = vmatpush.bf16.msk.msra.mxu0 %vm6292_vm2, %v4078_v28  ;;  %924 = vmatpush.bf16.msra.mxu1 %v842_v34 }
  0xc5   : > { %v5017_v7 = vpop.permute.xlu0 %5016  ;;  %5101 = vset.pattern.permute.xlu0 %v6072_v14  ;;  %5102 = vset.pattern.permute.xlu1 %v6072_v14 }
  0xc6   : > { %v5022_v56 = vpop.permute.xlu1 %5021  ;;  %v5019_v61 = vunpack.i.h.bf16 %v5017_v7  ;;  %v5018_v3 = vunpack.i.l.bf16 %v5017_v7  ;;  %855 = vperm.xlu0 %5101, %v481_v22   ;;  %5100 = vset.pattern.permute.xlu2 %v6072_v14  ;;  %v5072_v7 = vpop.permute.xlu2 %5071  ;;  %v482_v22 = vld [vmem:[%s8729_s2 + $0x10] sm:$0xff] }
  0xc7   : > { %v5024_v29 = vunpack.i.h.bf16 %v5022_v56  ;;  %v5023_v11 = vunpack.i.l.bf16 %v5022_v56  ;;  %v5074_v15 = vunpack.i.h.bf16 %v5072_v7  ;;  %860 = vperm.xlu1 %5102, %v482_v22  }
  0xc8   : > { %4082 = vmatpush.bf16.msk.msra.mxu0 %vm6292_vm2, %v4081_v50  ;;  %v4125_v17 = vpack.c.bf16 %v5019_v61, %v5018_v3  ;;  %v755_v23 = vsel %vm754_vm13, %v5043_v25, %v5018_v3  ;;  %v756_v28 = vsel %vm754_vm13, %v5044_v24, %v5019_v61 }
  0xc9   : > { %v840_v32 = vpack.c.bf16 %v756_v28, %v755_v23  ;;  %v589_v16 = vsel %vm586_vm4, %v4958_v43, %v5023_v11  ;;  %v590_v21 = vsel %vm586_vm4, %v4959_v42, %v5024_v29  ;;  %v5058_v42 = vunpack.i.l.bf16 %v5057_v53 }
  0xca   : > { %4126 = vmatpush.bf16.msk.msra.mxu2 %vm6431_vm15, %v4125_v17  ;;  %v4110_v34 = vpack.c.bf16 %v590_v21, %v589_v16  ;;  %v5073_v17 = vunpack.i.l.bf16 %v5072_v7 }
  0xcb   : > { %913 = vmatmul.bf16.vlgmr.msra.gmra.mxu0 %v6463_v54  ;;  %925 = vmatpush.bf16.msra.mxu1 %v840_v32 }
  0xcc   : > { %4141 = vmatpush.bf16.msk.msrb.mxu0 %vm6459_vm3, %v4140_v5  ;;  %4111 = vmatpush.bf16.msk.msrb.mxu3 %vm6459_vm3, %v4110_v34 }
  0xcd   : > { %v5032_v43 = vpop.permute.xlu0 %5031 }
  0xce   : > { %v5037_v46 = vpop.permute.xlu1 %5036  ;;  %v5034_v26 = vunpack.i.h.bf16 %v5032_v43  ;;  %v5033_v24 = vunpack.i.l.bf16 %v5032_v43  ;;  %4102 = vmatmul.msk.bf16.gmra.mxu3 %vm898_vm12, %v6486_v45 }
  0xcf   : > { %v5039_v25 = vunpack.i.h.bf16 %v5037_v46  ;;  %v5038_v48 = vunpack.i.l.bf16 %v5037_v46  ;;  %v5087_v46 = vpop.permute.xlu2 %5086 }
  0xd0   : > { %4144 = vmatpush.bf16.msk.msrb.mxu0 %vm6459_vm3, %v4143_v38  ;;  %v716_v50 = vsel %vm713_vm8, %v5058_v42, %v5033_v24  ;;  %v717_v52 = vsel %vm713_vm8, %v5059_v39, %v5034_v26  ;;  %v728_v53 = vsel %vm713_vm8, %v5033_v24, 0.0  ;;  %v729_v56 = vsel %vm713_vm8, %v5034_v26, 0.0 }
  0xd1   : > { %v4084_v61 = vpack.c.bf16 %v717_v52, %v716_v50  ;;  %v587_v3 = vsel %vm586_vm4, %v4963_v41, %v5038_v48  ;;  %v588_v5 = vsel %vm586_vm4, %v4964_v40, %v5039_v25  ;;  %v4128_v29 = vpack.c.bf16 %v729_v56, %v728_v53  ;;  %v480_v52 = vld [vmem:[%s8729_s2] sm:$0xff] }
  0xd2   : > { %v4113_v11 = vpack.c.bf16 %v588_v5, %v587_v3  ;;  %v6513_v40 = vor.u32 %v4836_v51, %v4045_v19  ;;  %v5089_v24 = vunpack.i.h.bf16 %v5087_v46  ;;  %v5088_v25 = vunpack.i.l.bf16 %v5087_v46  ;;  %850 = vperm.xlu2 %5100, %v480_v52  }
  0xd3   : > { %4085 = vmatpush.bf16.msk.msra.mxu1 %vm6292_vm2, %v4084_v61  ;;  %4129 = vmatpush.bf16.msk.msra.mxu2 %vm6401_vm11, %v4128_v29 }
  0xd4   : > { %4114 = vmatpush.bf16.msk.msrb.mxu3 %vm6459_vm3, %v4113_v11 }
  0xd5   : > { %v5047_v41 = vpop.permute.xlu0 %5046 }
  0xd6   : > { %v5052_v23 = vpop.permute.xlu1 %5051  ;;  %v5049_v18 = vunpack.i.h.bf16 %v5047_v41  ;;  %v5048_v28 = vunpack.i.l.bf16 %v5047_v41 }
  0xd7   : > { %v5054_v31 = vunpack.i.h.bf16 %v5052_v23  ;;  %v5053_v32 = vunpack.i.l.bf16 %v5052_v23 }
  0xd8   : > { %v714_v16 = vsel %vm713_vm8, %v5073_v17, %v5048_v28  ;;  %v715_v21 = vsel %vm713_vm8, %v5074_v15, %v5049_v18  ;;  %v726_v34 = vsel %vm713_vm8, %v5048_v28, 0.0  ;;  %v727_v38 = vsel %vm713_vm8, %v5049_v18, 0.0 }
  0xd9   : > { %v4087_v14 = vpack.c.bf16 %v715_v21, %v714_v16  ;;  %v556_v39 = vsel %vm553_vm6, %v4978_v60, %v5053_v32  ;;  %v557_v42 = vsel %vm553_vm6, %v4979_v59, %v5054_v31  ;;  %v4131_v43 = vpack.c.bf16 %v727_v38, %v726_v34 }
  0xda   : > { %v819_v26 = vpack.c.bf16 %v557_v42, %v556_v39  ;;  %v831_v21 = vpack.c.bf16 %v6226_v9, %v6217_v6  ;;  %v829_v39 = vpack.c.bf16 %v6237_v13, %v6228_v10  ;;  %v4035_v42 = vld [vmem:[#allocation2 + $0xc] sm:$0xf0] }
  0xdb   : > { %918 = vmatmul.bf16.gmra.mxu0 %v6513_v40  ;;  %4088 = vmatpush.bf16.msk.msra.mxu1 %vm6292_vm2, %v4087_v14 }
  0xdc   : > { %4132 = vmatpush.bf16.msk.msra.mxu2 %vm6401_vm11, %v4131_v43  ;;  %966 = vmatpush.bf16.msrb.mxu3 %v819_v26  ;;  %v483_v43 = vld [vmem:[%s8729_s2 + $0x18] sm:$0xff] }
  0xdd   : > { %v5062_v60 = vpop.permute.xlu0 %5061  ;;  %865 = vperm.xlu2 %5100, %v483_v43  }
  0xde   : > { %v5067_v55 = vpop.permute.xlu1 %5066  ;;  %v5064_v48 = vunpack.i.h.bf16 %v5062_v60  ;;  %v5063_v59 = vunpack.i.l.bf16 %v5062_v60 }
  0xdf   : > { %v5069_v7 = vunpack.i.h.bf16 %v5067_v55  ;;  %v5068_v50 = vunpack.i.l.bf16 %v5067_v55 }
  0xe0   : > { %v675_v53 = vsel %vm672_vm10, %v5088_v25, %v5063_v59  ;;  %v676_v56 = vsel %vm672_vm10, %v5089_v24, %v5064_v48  ;;  %v687_v61 = vsel %vm672_vm10, %v5063_v59, 0.0  ;;  %v688_v3 = vsel %vm672_vm10, %v5064_v48, 0.0 }
  0xe1   : > { %v4090_v5 = vpack.c.bf16 %v676_v56, %v675_v53  ;;  %v554_v29 = vsel %vm553_vm6, %v4993_v36, %v5068_v50  ;;  %v555_v11 = vsel %vm553_vm6, %v4994_v35, %v5069_v7  ;;  %v4134_v19 = vpack.c.bf16 %v688_v3, %v687_v61 }
  0xe2   : > { %v817_v51 = vpack.c.bf16 %v555_v11, %v554_v29 }
  0xe3   : > { %4091 = vmatpush.bf16.msk.msra.mxu1 %vm6320_vm5, %v4090_v5  ;;  %4135 = vmatpush.bf16.msk.msra.mxu2 %vm6459_vm3, %v4134_v19 }
  0xe4   : > { %967 = vmatpush.bf16.msrb.mxu3 %v817_v51 }
  0xe5   : > { %v5077_v15 = vpop.permute.xlu0 %5076 }
  0xe6   : > { %v5082_v17 = vpop.permute.xlu1 %5081  ;;  %v5079_v41 = vunpack.i.h.bf16 %v5077_v15  ;;  %v5078_v23 = vunpack.i.l.bf16 %v5077_v15 }
  0xe7   : > { %v5084_v18 = vunpack.i.h.bf16 %v5082_v17  ;;  %v5083_v28 = vunpack.i.l.bf16 %v5082_v17 }
  0xe8   : > { %v685_v36 = vsel %vm672_vm10, %v5078_v23, 0.0  ;;  %v686_v20 = vsel %vm672_vm10, %v5079_v41, 0.0 }
  0xe9   : > { %v511_v35 = vsel %vm508_vm14, %v4949_v57, %v5083_v28  ;;  %v512_v31 = vsel %vm508_vm14, %v5003_v27, %v5084_v18  ;;  %v4137_v32 = vpack.c.bf16 %v686_v20, %v685_v36 }
  0xea   : > { %v4116_v16 = vpack.c.bf16 %v512_v31, %v511_v35 }
  0xeb   : > { %4145 = vmatmul.msk.bf16.vlgmr.msrb.gmra.mxu0 %vm898_vm12, %v6405_v49  ;;  %4138 = vmatpush.bf16.msk.msra.mxu2 %vm6459_vm3, %v4137_v32  ;;  %v4832_v49 = vld [vmem:[#allocation2 + $0x4] sm:$0xf] }
  0xec   : > { %4117 = vmatpush.bf16.msk.msrb.mxu3 %vm6401_vm11, %v4116_v16  ;;  %v4038_v24 = vor.u32 %v4832_v49, %v4035_v42 }
  0xed   : > { %v5092_v34 = vpop.permute.xlu0 %5091 }
  0xee   : > { %v5097_v57 = vpop.permute.xlu1 %5096  ;;  %v5094_v38 = vunpack.i.h.bf16 %v5092_v34  ;;  %v5093_v22 = vunpack.i.l.bf16 %v5092_v34 }
  0xef   : > { %v5099_v14 = vunpack.i.h.bf16 %v5097_v57  ;;  %v5098_v27 = vunpack.i.l.bf16 %v5097_v57  ;;  %987 = vmatpush.bf16.msra.mxu2 %v831_v21 }
  0xf0   : > { %v509_v6 = vsel %vm508_vm14, %v4948_v12, %v5093_v22  ;;  %v510_v9 = vsel %vm508_vm14, %v5004_v30, %v5094_v38  ;;  %v4835_v30 = vld [vmem:[#allocation2 + $0x1c] sm:$0xf]  ;;  %v4047_v12 = vld [vmem:[#allocation2 + $0x24] sm:$0xf0] }
  0xf1   : > { %v673_v46 = vsel %vm672_vm10, %v5098_v27, %v5078_v23  ;;  %v674_v26 = vsel %vm672_vm10, %v5099_v14, %v5079_v41  ;;  %v4119_v10 = vpack.c.bf16 %v510_v9, %v509_v6  ;;  %v4050_v25 = vor.u32 %v4835_v30, %v4047_v12 }
  0xf2   : > { %v4093_v13 = vpack.c.bf16 %v674_v26, %v673_v46 }
  0xf3   : > { %4120 = vmatpush.bf16.msk.msrb.mxu3 %vm6401_vm11, %v4119_v10  ;;  %988 = vmatpush.bf16.msra.mxu2 %v829_v39 }
  0xf4   : > { %4094 = vmatpush.bf16.msk.msra.mxu1 %vm6320_vm5, %v4093_v13 }
  0xf6   : > { %970 = vmatmul.bf16.vlgmr.msrb.gmra.mxu3 %v6463_v54  ;;  %989 = vmatmul.bf16.vlgmr.msra.gmra.mxu2 %v4038_v24 }
  0xf8   : > { %930 = vmatpush.bf16.msra.mxu1 %v830_v37 }
  0xfb   : > { %4146 = vmatmul.msk.bf16.gmra.mxu0 %vm898_vm12, %v6486_v45 }
  0xfc   : > { %931 = vmatpush.bf16.msra.mxu1 %v828_v62 }
  0xff   : > { %932 = vmatmul.bf16.vlgmr.msra.gmra.mxu1 %v4038_v24 }
 0x106   : > { %975 = vmatmul.bf16.gmra.mxu3 %v6513_v40  ;;  %994 = vmatmul.bf16.gmra.mxu2 %v4050_v25 }
 0x10f   : > { %937 = vmatmul.bf16.gmra.mxu1 %v4050_v25 }
 0x12c   : > { %v851_v45 = vpop.permute.xlu2 %850 }
 0x137   : > { %v866_v9 = vpop.permute.xlu2 %865 }
 0x138   : > { %v856_v29 = vpop.permute.xlu0 %855 }
 0x139   : > { %v861_v38 = vpop.permute.xlu1 %860 }
 0x141   : > { %v952_v1 = vpop.f32.mrf.mxu3 }
 0x148   : > { %v914_v0 = vpop.f32.mrf.mxu0 }
 0x149   : > { %v954_v60 = vpop.f32.mrf.mxu3  ;;  %v915_v53 = vadd.f32 %v914_v0, %v851_v45 }
 0x150   : > { %v916_v54 = vpop.f32.mrf.mxu0 }
 0x151   : > { %v957_v48 = vpop.f32.mrf.mxu3  ;;  %v917_v23 = vadd.f32 %v916_v54, %v856_v29 }
 0x158   : > { %v919_v55 = vpop.f32.mrf.mxu0 }
 0x159   : > { %v6591_v2 = vpop.f32.mrf.mxu3  ;;  %v920_v43 = vadd.f32 %v919_v55, %v861_v38 }
 0x160   : > { %v921_v59 = vpop.f32.mrf.mxu0 }
 0x161   : > { %v922_v24 = vadd.f32 %v921_v59, %v866_v9 }
 0x168   : > { %v1009_v4 = vpop.f32.mrf.mxu0 }
 0x170   : > { %v1011_v19 = vpop.f32.mrf.mxu0 }
 0x178   : > { %v1014_v16 = vpop.f32.mrf.mxu0 }
 0x179   : > { %v971_v7 = vpop.f32.mrf.mxu3  ;;  %v990_v50 = vpop.f32.mrf.mxu2 }
 0x17a   : > { %v972_v52 = vadd.f32 %v971_v7, %v851_v45 }
 0x17c   : > { %v991_v56 = vadd.f32 %v990_v50, %v972_v52  ;;  %v933_v61 = vpop.f32.mrf.mxu1 }
 0x17d   : > { %v934_v40 = vadd.f32 %v933_v61, %v915_v53  ;;  %v4150_v61 = vld [vmem:[%s8729_s2 + $0x38] sm:$0xff] }
 0x17e   : > { %v1010_v3 = vadd.f32 %v1009_v4, %v991_v56  ;;  %v4147_v56 = vld [vmem:[%s8729_s2 + $0x20] sm:$0xff] }
 0x17f   : > { %v953_v5 = vadd.f32 %v952_v1, %v934_v40  ;;  %v4148_v40 = vld [vmem:[%s8729_s2 + $0x28] sm:$0xff] }
 0x180   : > { %v1020_v11 = vmax.f32 %v1010_v3, 0.0  ;;  %v1016_v12 = vpop.f32.mrf.mxu0  ;;  %v4149_v3 = vld [vmem:[%s8729_s2 + $0x30] sm:$0xff] }
 0x181   : > { %v1019_v51 = vmax.f32 %v953_v5, 0.0  ;;  %v973_v15 = vpop.f32.mrf.mxu3  ;;  %v992_v17 = vpop.f32.mrf.mxu2 }
 0x182   : > { %v974_v41 = vadd.f32 %v973_v15, %v856_v29 }
 0x183   : > { %v6593_v18 = vpack.i.bf16 %v1020_v11, %v1019_v51 }
 0x184   : > { %v993_v28 = vadd.f32 %v992_v17, %v974_v41  ;;  %v935_v36 = vpop.f32.mrf.mxu1 }
 0x185   : > { %v936_v20 = vadd.f32 %v935_v36, %v917_v23  ;;  %5134 = vrot.lane.b32.xlu0 %v6593_v18, %s8644_s29  ;;  %5124 = vrot.lane.b32.xlu1 %v6593_v18, %s8648_s15 }
 0x186   : > { %v1012_v35 = vadd.f32 %v1011_v19, %v993_v28 }
 0x187   : > { %v955_v31 = vadd.f32 %v954_v60, %v936_v20 }
 0x188   : > { %v1022_v32 = vmax.f32 %v1012_v35, 0.0 }
 0x189   : > { %v1021_v21 = vmax.f32 %v955_v31, 0.0  ;;  %v976_v34 = vpop.f32.mrf.mxu3  ;;  %v995_v57 = vpop.f32.mrf.mxu2 }
 0x18a   : > { %v5233_v22 = vpack.i.bf16 %v1022_v32, %v1020_v11  ;;  %v6599_v14 = vpack.c.bf16 %v1022_v32, %v1020_v11  ;;  %v977_v27 = vadd.f32 %v976_v34, %v861_v38 }
 0x18b   : > { %v6601_v39 = vpack.i.bf16 %v1022_v32, %v1021_v21  ;;  %v5103_v49 = vpack.i.bf16 %v1021_v21, %v1019_v51  ;;  %v6607_v6 = vpack.c.bf16 %v1021_v21, %v1019_v51 }
 0x18c   : > { %8730 = vst [vmem:[#allocation19_spill] sm:$0xff] %v6599_v14  ;;  %v938_v42 = vpop.f32.mrf.mxu1  ;;  %v996_v26 = vadd.f32 %v995_v57, %v977_v27 }
 0x18d   : > { %5139 = vrot.lane.b32.xlu0 %v6593_v18, %s8642_s30  ;;  %5154 = vrot.lane.b32.xlu1 %v6601_v39, %s8644_s29  ;;  %8731 = vst [vmem:[#allocation20_spill] sm:$0xff] %v6607_v6  ;;  %v939_v46 = vadd.f32 %v938_v42, %v920_v43 }
 0x18e   : > { %5104 = vrot.lane.b32.xlu2 %v5103_v49, %s8670_s12  ;;  %v1015_v30 = vadd.f32 %v1014_v16, %v996_v26 }
 0x18f   : > { %v958_v62 = vadd.f32 %v957_v48, %v939_v46 }
 0x190   : > { %v1024_v55 = vmax.f32 %v1015_v30, 0.0 }
 0x191   : > { %v978_v10 = vpop.f32.mrf.mxu3  ;;  %v997_v13 = vpop.f32.mrf.mxu2  ;;  %v1023_v60 = vmax.f32 %v958_v62, 0.0 }
 0x192   : > { %v979_v37 = vadd.f32 %v978_v10, %v866_v9 }
 0x193   : > { %v5163_v7 = vpack.i.bf16 %v1024_v55, %v1023_v60 }
 0x194   : > { %v940_v25 = vpop.f32.mrf.mxu1  ;;  %v998_v0 = vadd.f32 %v997_v13, %v979_v37 }
 0x195   : > { %v941_v1 = vadd.f32 %v940_v25, %v922_v24  ;;  %5149 = vrot.lane.b32.xlu0 %v6601_v39, %s8646_s25  ;;  %5159 = vrot.lane.b32.xlu1 %v6601_v39, %s8642_s30 }
 0x196   : > { %5109 = vrot.lane.b32.xlu2 %v5103_v49, %s8672_s14  ;;  %v1017_v54 = vadd.f32 %v1016_v12, %v998_v0 }
 0x197   : > { %v960_v59 = vadd.f32 %v6591_v2, %v941_v1 }
 0x198   : > { %v1026_v4 = vmax.f32 %v1017_v54, 0.0 }
 0x199   : > { %v1025_v48 = vmax.f32 %v960_v59, 0.0 }
 0x19a   : > { %v6616_v45 = vpack.c.bf16 %v1026_v4, %v1024_v55  ;;  %v5243_v2 = vpack.i.bf16 %v1026_v4, %v1024_v55 }
 0x19b   : > { %v5113_v50 = vpack.i.bf16 %v1025_v48, %v1023_v60  ;;  %v6620_v52 = vpack.c.bf16 %v1025_v48, %v1023_v60  ;;  %v5188_v53 = vpack.i.bf16 %v1026_v4, %v1025_v48 }
 0x19c   : > { %8732 = vst [vmem:[#allocation21_spill] sm:$0xff] %v6616_v45 }
 0x19d   : > { %5164 = vrot.lane.b32.xlu0 %v5163_v7, %s8648_s15  ;;  %5169 = vrot.lane.b32.xlu1 %v5163_v7, %s8646_s25  ;;  %8733 = vst [vmem:[#allocation22_spill] sm:$0xff] %v6620_v52 }
 0x19e   : > { %5114 = vrot.lane.b32.xlu2 %v5113_v50, %s8670_s12 }
 0x1a5   : > { %5174 = vrot.lane.b32.xlu0 %v5163_v7, %s8644_s29  ;;  %5189 = vrot.lane.b32.xlu1 %v5188_v53, %s8648_s15 }
 0x1a6   : > { %5119 = vrot.lane.b32.xlu2 %v5113_v50, %s8672_s14 }
 0x1ad   : > { %5179 = vrot.lane.b32.xlu0 %v5163_v7, %s8642_s30  ;;  %5199 = vrot.lane.b32.xlu1 %v5188_v53, %s8644_s29  ;;  %s8768_s29 = smov 16  }
 0x1ae   : > { %5129 = vrot.lane.b32.xlu2 %v6593_v18, %s8646_s25 }
 0x1b5   : > { %5184 = vrot.lane.b32.xlu0 %v5163_v7, %s8650_s13  ;;  %5204 = vrot.lane.b32.xlu1 %v5188_v53, %s8642_s30  ;;  %s8770_s30 = smov 113  }
 0x1b6   : > { %5144 = vrot.lane.b32.xlu2 %v6601_v39, %s8648_s15  ;;  %s8766_s15 = smov 127  }
 0x1bd   : > { %5219 = vrot.lane.b32.xlu0 %v6601_v39, %s8650_s13  ;;  %5209 = vrot.lane.b32.xlu1 %v5188_v53, %s8650_s13 }
 0x1be   : > { %5194 = vrot.lane.b32.xlu2 %v5188_v53, %s8646_s25  ;;  %s8767_s25 = smov 17  }
 0x1c5   : > { %5244 = vrot.lane.b32.xlu0 %v5243_v2, %s8672_s14  ;;  %5224 = vrot.lane.b32.xlu1 %v5243_v2, %s8670_s12 }
 0x1c6   : > { %5214 = vrot.lane.b32.xlu2 %v6593_v18, %s8650_s13  ;;  %s8769_s13 = smov 112  }
 0x1cd   : > { %5249 = vrot.lane.b32.xlu0 %v5188_v53, %s8734_s22  ;;  %5234 = vrot.lane.b32.xlu1 %v5233_v22, %s8672_s14 }
 0x1ce   : > { %5229 = vrot.lane.b32.xlu2 %v5233_v22, %s8670_s12 }
 0x1d5   : > { %1391 = vperm.xlu0 %5101, %v4147_v56   ;;  %5254 = vrot.lane.b32.xlu1 %v6593_v18, %s8734_s22 }
 0x1d6   : > { %5239 = vrot.lane.b32.xlu2 %v5163_v7, %s8734_s22 }
 0x1dd   : > { %1406 = vperm.xlu0 %5101, %v4150_v61   ;;  %1396 = vperm.xlu1 %5102, %v4148_v40  }
 0x1de   : > { %5259 = vrot.lane.b32.xlu2 %v6601_v39, %s8734_s22 }
 0x1e6   : > { %1401 = vperm.xlu2 %5100, %v4149_v3  }
 0x1e8   : > { %v6662_v5 = vpop.permute.xlu2 %5104 }
 0x1e9   : > { %v5107_v15 = vunpack.i.h.bf16 %v6662_v5  ;;  %v5106_v17 = vunpack.i.l.bf16 %v6662_v5 }
 0x1eb   : > { %v1189_v20 = vsel %vm631_vm1, 0.0, %v5106_v17  ;;  %v1190_v35 = vsel %vm631_vm1, 0.0, %v5107_v15 }
 0x1ec   : > { %v6699_v21 = vpack.c.bf16 %v1190_v35, %v1189_v20 }
 0x1f0   : > { %v6664_v29 = vpop.permute.xlu2 %5109 }
 0x1f1   : > { %v8659_v34 = vunpack.i.h.bf16 %v6664_v29  ;;  %v8660_v57 = vunpack.i.l.bf16 %v6664_v29 }
 0x1f3   : > { %v1149_v42 = vsel %vm586_vm4, 0.0, %v8660_v57  ;;  %v1150_v43 = vsel %vm586_vm4, 0.0, %v8659_v34 }
 0x1f4   : > { %v6731_v10 = vpack.c.bf16 %v1150_v43, %v1149_v42 }
 0x1f7   : > { %v6666_v11 = vpop.permute.xlu0 %5134  ;;  %v6668_v19 = vpop.permute.xlu1 %5124 }
 0x1f8   : > { %v6670_v51 = vpop.permute.xlu2 %5114  ;;  %v5137_v20 = vunpack.i.h.bf16 %v6666_v11  ;;  %v5136_v35 = vunpack.i.l.bf16 %v6666_v11 }
 0x1f9   : > { %v8662_v41 = vunpack.i.h.bf16 %v6670_v51  ;;  %v5116_v23 = vunpack.i.l.bf16 %v6670_v51 }
 0x1fb   : > { %v1191_v18 = vsel %vm631_vm1, 0.0, %v5116_v23  ;;  %v1192_v28 = vsel %vm631_vm1, 0.0, %v8662_v41 }
 0x1fc   : > { %v6682_v36 = vpack.c.bf16 %v1192_v28, %v1191_v18 }
 0x1fe   : > { %4177 = vmatpush.bf16.msk.msrb.mxu1 %vm6292_vm2, %v6682_v36 }
 0x1ff   : > { %v6693_v31 = vpop.permute.xlu0 %5139  ;;  %v6695_v32 = vpop.permute.xlu1 %5154 }
 0x200   : > { %v6697_v16 = vpop.permute.xlu2 %5119  ;;  %v5157_v7 = vunpack.i.h.bf16 %v6695_v32  ;;  %v5156_v50 = vunpack.i.l.bf16 %v6695_v32  ;;  %v8661_v32 = vunpack.i.l.bf16 %v6668_v19 }
 0x201   : > { %v5122_v38 = vunpack.i.h.bf16 %v6697_v16  ;;  %v5121_v22 = vunpack.i.l.bf16 %v6697_v16 }
 0x202   : > { %4180 = vmatpush.bf16.msk.msrb.mxu1 %vm6292_vm2, %v6699_v21 }
 0x203   : > { %v1151_v27 = vsel %vm586_vm4, 0.0, %v5121_v22  ;;  %v1152_v39 = vsel %vm586_vm4, 0.0, %v5122_v38 }
 0x204   : > { %v6714_v49 = vpack.c.bf16 %v1152_v39, %v1151_v27 }
 0x206   : > { %4183 = vmatpush.bf16.msk.msrb.mxu1 %vm6320_vm5, %v6714_v49 }
 0x207   : > { %v6725_v9 = vpop.permute.xlu0 %5149  ;;  %v6727_v46 = vpop.permute.xlu1 %5159 }
 0x208   : > { %v6729_v26 = vpop.permute.xlu2 %5129  ;;  %v8655_v1 = vunpack.i.l.bf16 %v6725_v9 }
 0x209   : > { %v8656_v54 = vunpack.i.l.bf16 %v6729_v26 }
 0x20a   : > { %4186 = vmatpush.bf16.msk.msrb.mxu1 %vm6320_vm5, %v6731_v10 }
 0x20b   : > { %v6767_v56 = vpack.c.bf16 %v8655_v1, %v8656_v54 }
 0x20d   : > { %8736 = vst [vmem:[#allocation24_spill] sm:$0xff] %v6767_v56 }
 0x20f   : > { %v6736_v13 = vpop.permute.xlu0 %5164  ;;  %v6738_v24 = vpop.permute.xlu1 %5169 }
 0x210   : > { %v6740_v37 = vpop.permute.xlu2 %5144  ;;  %v8657_v25 = vunpack.i.l.bf16 %v6738_v24  ;;  %v8653_v59 = vunpack.i.l.bf16 %v6736_v13 }
 0x211   : > { %v8654_v61 = vunpack.i.l.bf16 %v6740_v37 }
 0x212   : > { %v1079_v42 = vsel %vm508_vm14, 0.0, %v8653_v59 }
 0x213   : > { %v1078_v11 = vsel %vm508_vm14, 0.0, %v8654_v61 }
 0x217   : > { %v5175_v62 = vpop.permute.xlu0 %5174  ;;  %v6742_v30 = vpop.permute.xlu1 %5189 }
 0x218   : > { %v6744_v12 = vpop.permute.xlu2 %5194  ;;  %v8652_v55 = vunpack.i.l.bf16 %v6742_v30  ;;  %v5177_v4 = vunpack.i.h.bf16 %v5175_v62  ;;  %v5176_v48 = vunpack.i.l.bf16 %v5175_v62 }
 0x219   : > { %v8658_v0 = vunpack.i.l.bf16 %v6744_v12 }
 0x21a   : > { %v1080_v28 = vsel %vm508_vm14, 0.0, %v8652_v55  ;;  %v1299_v27 = vsel %vm754_vm13, %v5176_v48, %v5177_v4  ;;  %v4153_v48 = vld [vmem:[#allocation2 + $0x30] sm:$0xf] }
 0x21b   : > { %v6754_v60 = vpack.c.bf16 %v8658_v0, %v8657_v25  ;;  %v6786_v43 = vpack.c.bf16 %v1080_v28, %v1079_v42  ;;  %v1077_v28 = vsel %vm508_vm14, 0.0, %v8661_v32 }
 0x21c   : > { %v6804_v1 = vpack.c.bf16 %v1078_v11, %v1077_v28 }
 0x21d   : > { %8735 = vst [vmem:[#allocation23_spill] sm:$0xff] %v6754_v60  ;;  %4191 = vmatpush.bf16.msk.msrb.mxu1 %vm6353_vm9, %v6754_v60 }
 0x21e   : > { %8737 = vst [vmem:[#allocation25_spill] sm:$0xff] %v6786_v43 }
 0x21f   : > { %v5180_v53 = vpop.permute.xlu0 %5179  ;;  %v5200_v2 = vpop.permute.xlu1 %5199  ;;  %8738 = vst [vmem:[#allocation26_spill] sm:$0xff] %v6804_v1 }
 0x220   : > { %v5202_v40 = vunpack.i.h.bf16 %v5200_v2  ;;  %v5201_v3 = vunpack.i.l.bf16 %v5200_v2  ;;  %v6770_v18 = vpop.permute.xlu2 %5214  ;;  %v1298_v2 = vsel %vm754_vm13, %v5156_v50, %v5157_v7  ;;  %v5182_v55 = vunpack.i.h.bf16 %v5180_v53 }
 0x221   : > { %4196 = vmatpush.bf16.msk.msrb.mxu1 %vm6353_vm9, %v6767_v56  ;;  %v5181_v59 = vunpack.i.l.bf16 %v5180_v53  ;;  %v5161_v50 = vunpack.i.l.bf16 %v6727_v46 }
 0x222   : > { %v1300_v39 = vsel %vm754_vm13, %v5201_v3, %v5202_v40  ;;  %v4839_v3 = vld [vmem:[#allocation2 + $0x38] sm:$0xf0]  ;;  %v6808_v25 = vpack.c.bf16 %v5202_v40, %v5177_v4 }
 0x223   : > { %v6788_v62 = vpack.c.bf16 %v1300_v39, %v1299_v27  ;;  %v1297_v27 = vsel %vm754_vm13, %v5136_v35, %v5137_v20  ;;  %v5162_v39 = vunpack.i.h.bf16 %v6727_v46  ;;  %v6810_v57 = vor.u32 %v4839_v3, %v4153_v48 }
 0x224   : > { %v6806_v54 = vpack.c.bf16 %v1298_v2, %v1297_v27  ;;  %8739 = vst [vmem:[#allocation27_spill] sm:$0xff] %v6808_v25  ;;  %v5142_v46 = vunpack.i.h.bf16 %v6693_v31  ;;  %v5141_v35 = vunpack.i.l.bf16 %v6693_v31  ;;  %v1259_v4 = vsel %vm713_vm8, %v5181_v59, %v5182_v55 }
 0x225   : > { %4199 = vmatpush.bf16.msk.msrb.mxu1 %vm6292_vm2, %v6786_v43  ;;  %1464 = vmatpush.bf16.msra.mxu3 %v6788_v62  ;;  %v6831_v2 = vpack.c.bf16 %v5157_v7, %v5137_v20  ;;  %v1258_v31 = vsel %vm713_vm8, %v5161_v50, %v5162_v39 }
 0x226   : > { %v1257_v5 = vsel %vm713_vm8, %v5141_v35, %v5142_v46 }
 0x227   : > { %v5185_v42 = vpop.permute.xlu0 %5184  ;;  %v5205_v61 = vpop.permute.xlu1 %5204  ;;  %8740 = vst [vmem:[#allocation28_spill] sm:$0xff] %v6831_v2 }
 0x228   : > { %v5207_v0 = vunpack.i.h.bf16 %v5205_v61  ;;  %v5206_v53 = vunpack.i.l.bf16 %v5205_v61  ;;  %v5230_v34 = vpop.permute.xlu2 %5229 }
 0x229   : > { %v5232_v32 = vunpack.i.h.bf16 %v5230_v34  ;;  %v5231_v41 = vunpack.i.l.bf16 %v5230_v34  ;;  %4202 = vmatpush.bf16.msk.msrb.mxu1 %vm6292_vm2, %v6804_v1  ;;  %1465 = vmatpush.bf16.msra.mxu3 %v6806_v54 }
 0x22a   : > { %v1260_v40 = vsel %vm713_vm8, %v5206_v53, %v5207_v0  ;;  %v1272_v59 = vsel %vm713_vm8, %v5207_v0, 0.0  ;;  %v1270_v53 = vsel %vm713_vm8, %v5162_v39, 0.0 }
 0x22b   : > { %v1177_v34 = vsel %vm631_vm1, %v5106_v17, %v5231_v41  ;;  %v1178_v61 = vsel %vm631_vm1, %v5107_v15, %v5232_v32  ;;  %v6829_v11 = vpack.c.bf16 %v1260_v40, %v1259_v4  ;;  %v1271_v15 = vsel %vm713_vm8, %v5182_v55, 0.0 }
 0x22c   : > { %1453 = vmatmul.bf16.vlgmr.msrb.gmra.mxu1 %v6810_v57  ;;  %v6836_v48 = vpack.c.bf16 %v1178_v61, %v1177_v34  ;;  %v5187_v17 = vunpack.i.h.bf16 %v5185_v42  ;;  %v5186_v41 = vunpack.i.l.bf16 %v5185_v42  ;;  %v6846_v7 = vpack.c.bf16 %v1272_v59, %v1271_v15  ;;  %v4165_v59 = vld [vmem:[#allocation2 + $0x48] sm:$0xf] }
 0x22d   : > { %4243 = vmatpush.bf16.msk.msra.mxu1 %vm6431_vm15, %v6808_v25  ;;  %4205 = vmatpush.bf16.msk.msra.mxu3 %vm6292_vm2, %v6829_v11  ;;  %v6848_v32 = vpack.c.bf16 %v1258_v31, %v1257_v5  ;;  %v5217_v55 = vunpack.i.h.bf16 %v6770_v18  ;;  %v5216_v42 = vunpack.i.l.bf16 %v6770_v18  ;;  %v1269_v40 = vsel %vm713_vm8, %v5142_v46, 0.0  ;;  %v4842_v18 = vld [vmem:[#allocation2 + $0x50] sm:$0xf0] }
 0x22e   : > { %8741 = vst [vmem:[#allocation29_spill] sm:$0xff] %v6846_v7  ;;  %v1219_v35 = vsel %vm672_vm10, %v5186_v41, %v5187_v17  ;;  %v6864_v39 = vpack.c.bf16 %v1270_v53, %v1269_v40  ;;  %v1231_v15 = vsel %vm672_vm10, %v5187_v17, 0.0 }
 0x22f   : > { %v5220_v0 = vpop.permute.xlu0 %5219  ;;  %v5210_v20 = vpop.permute.xlu1 %5209  ;;  %v1217_v5 = vsel %vm672_vm10, %v5216_v42, %v5217_v55 }
 0x230   : > { %v5222_v3 = vunpack.i.h.bf16 %v5220_v0  ;;  %v5221_v28 = vunpack.i.l.bf16 %v5220_v0  ;;  %v5212_v27 = vunpack.i.h.bf16 %v5210_v20  ;;  %v5211_v50 = vunpack.i.l.bf16 %v5210_v20  ;;  %8742 = vst [vmem:[#allocation30_spill] sm:$0xff] %v6864_v39 }
 0x231   : > { %4246 = vmatpush.bf16.msk.msra.mxu1 %vm6431_vm15, %v6831_v2  ;;  %4208 = vmatpush.bf16.msk.msra.mxu3 %vm6292_vm2, %v6848_v32 }
 0x232   : > { %v1220_v4 = vsel %vm672_vm10, %v5211_v50, %v5212_v27  ;;  %v1218_v61 = vsel %vm672_vm10, %v5221_v28, %v5222_v3  ;;  %v1232_v31 = vsel %vm672_vm10, %v5212_v27, 0.0  ;;  %v6880_v28 = vor.u32 %v4842_v18, %v4165_v59 }
 0x233   : > { %v6862_v34 = vpack.c.bf16 %v1220_v4, %v1219_v35  ;;  %v6876_v46 = vpack.c.bf16 %v1232_v31, %v1231_v15  ;;  %v6878_v20 = vpack.c.bf16 %v1218_v61, %v1217_v5  ;;  %v1230_v42 = vsel %vm672_vm10, %v5222_v3, 0.0  ;;  %v5240_v4 = vpop.permute.xlu2 %5239 }
 0x234   : > { %v8744_v31 = vunpack.i.h.bf16 %v6670_v51  ;;  %v1229_v59 = vsel %vm672_vm10, %v5217_v55, 0.0  ;;  %v5242_v5 = vunpack.i.h.bf16 %v5240_v4  ;;  %v5241_v51 = vunpack.i.l.bf16 %v5240_v4 }
 0x235   : > { %4249 = vmatpush.bf16.msk.msra.mxu1 %vm6401_vm11, %v6846_v7  ;;  %4211 = vmatpush.bf16.msk.msra.mxu3 %vm6320_vm5, %v6862_v34  ;;  %8743 = vst [vmem:[#allocation31_spill] sm:$0xff] %v6876_v46  ;;  %v6906_v16 = vpack.c.bf16 %v1230_v42, %v1229_v59 }
 0x236   : > { %v1331_v42 = vsel %vm787_vm7, %v5241_v51, %v5242_v5  ;;  %v5197_v51 = vunpack.i.h.bf16 %v6744_v12 }
 0x237   : > { %v5245_v41 = vpop.permute.xlu0 %5244  ;;  %v5225_v0 = vpop.permute.xlu1 %5224  ;;  %8746 = vst [vmem:[#allocation33_spill] sm:$0xff] %v6906_v16 }
 0x238   : > { %v5247_v27 = vunpack.i.h.bf16 %v5245_v41  ;;  %v5246_v50 = vunpack.i.l.bf16 %v5245_v41  ;;  %v5227_v53 = vunpack.i.h.bf16 %v5225_v0  ;;  %v5226_v35 = vunpack.i.l.bf16 %v5225_v0 }
 0x239   : > { %4252 = vmatpush.bf16.msk.msra.mxu1 %vm6401_vm11, %v6864_v39  ;;  %4214 = vmatpush.bf16.msk.msra.mxu3 %vm6320_vm5, %v6878_v20 }
 0x23a   : > { %v1139_v17 = vsel %vm586_vm4, %v5121_v22, %v5246_v50  ;;  %v1140_v40 = vsel %vm586_vm4, %v5122_v38, %v5247_v27  ;;  %v1179_v61 = vsel %vm631_vm1, %v5116_v23, %v5226_v35  ;;  %v1180_v3 = vsel %vm631_vm1, %v8744_v31, %v5227_v53  ;;  %v4838_v38 = vld [vmem:[#allocation2 + $0x34] sm:$0xf]  ;;  %v4155_v23 = vld [vmem:[#allocation2 + $0x3c] sm:$0xf0] }
 0x23b   : > { %v6902_v18 = vpack.c.bf16 %v1180_v3, %v1179_v61  ;;  %v6904_v22 = vpack.c.bf16 %v1140_v40, %v1139_v17  ;;  %v4158_v41 = vor.u32 %v4838_v38, %v4155_v23  ;;  %v1343_v35 = vsel %vm787_vm7, %v5242_v5, 0.0  ;;  %v5260_v59 = vpop.permute.xlu2 %5259 }
 0x23c   : > { %1458 = vmatmul.bf16.gmra.mxu1 %v6880_v28  ;;  %v8747_v17 = vunpack.i.l.bf16 %v6664_v29  ;;  %v8748_v61 = vunpack.i.h.bf16 %v6664_v29  ;;  %v5262_v29 = vunpack.i.h.bf16 %v5260_v59 }
 0x23d   : > { %4255 = vmatpush.bf16.msk.msra.mxu1 %vm6459_vm3, %v6876_v46  ;;  %8745 = vst [vmem:[#allocation32_spill] sm:$0xff] %v6904_v22  ;;  %1470 = vmatpush.bf16.msra.mxu3 %v6620_v52 }
 0x23e   : > { %4225 = vmatpush.bf16.msk.msra.mxu0 %vm6401_vm11, %v6902_v18 }
 0x23f   : > { %v5250_v55 = vpop.permute.xlu0 %5249  ;;  %v5235_v15 = vpop.permute.xlu1 %5234 }
 0x240   : > { %v5252_v0 = vunpack.i.h.bf16 %v5250_v55  ;;  %v5251_v27 = vunpack.i.l.bf16 %v5250_v55  ;;  %v5237_v50 = vunpack.i.h.bf16 %v5235_v15  ;;  %v5236_v53 = vunpack.i.l.bf16 %v5235_v15 }
 0x241   : > { %4258 = vmatpush.bf16.msk.msra.mxu1 %vm6459_vm3, %v6906_v16  ;;  %1471 = vmatpush.bf16.msra.mxu3 %v6607_v6  ;;  %v5172_v55 = vunpack.i.h.bf16 %v6738_v24  ;;  %v5261_v15 = vunpack.i.l.bf16 %v5260_v59  ;;  %v8758_v16 = vunpack.i.l.bf16 %v6725_v9 }
 0x242   : > { %4228 = vmatpush.bf16.msk.msra.mxu0 %vm6401_vm11, %v6836_v48  ;;  %v1344_v4 = vsel %vm787_vm7, %v5252_v0, 0.0  ;;  %v1137_v40 = vsel %vm586_vm4, %v8747_v17, %v5236_v53  ;;  %v1138_v31 = vsel %vm586_vm4, %v8748_v61, %v5237_v50  ;;  %v1332_v3 = vsel %vm787_vm7, %v5251_v27, %v5252_v0  ;;  %v4161_v61 = vld [vmem:[#allocation2 + $0x38] sm:$0xf] }
 0x243   : > { %v6931_v38 = vpack.c.bf16 %v1344_v4, %v1343_v35  ;;  %v6933_v23 = vpack.c.bf16 %v1332_v3, %v1331_v42  ;;  %v6935_v5 = vpack.c.bf16 %v1138_v31, %v1137_v40  ;;  %v5152_v0 = vunpack.i.h.bf16 %v6725_v9  ;;  %v4840_v31 = vld [vmem:[#allocation2 + $0x40] sm:$0xf0] }
 0x244   : > { %1472 = vmatmul.bf16.vlgmr.msra.gmra.mxu3 %v4158_v41  ;;  %v5132_v50 = vunpack.i.h.bf16 %v6729_v26  ;;  %v8752_v42 = vunpack.i.l.bf16 %v6744_v12  ;;  %v8753_v17 = vunpack.i.l.bf16 %v6738_v24  ;;  %v1342_v3 = vsel %vm787_vm7, %v5262_v29, 0.0 }
 0x245   : > { %1527 = vmatpush.bf16.msra.mxu1 %v6616_v45  ;;  %8749 = vst [vmem:[#allocation34_spill] sm:$0xff] %v6931_v38  ;;  %4217 = vmatpush.bf16.msk.msrb.mxu2 %vm6320_vm5, %v6933_v23  ;;  %v1330_v12 = vsel %vm787_vm7, %v5261_v15, %v5262_v29  ;;  %v5192_v24 = vunpack.i.h.bf16 %v6742_v30  ;;  %v4162_v45 = vor.u32 %v4840_v31, %v4161_v61  ;;  %v4841_v29 = vld [vmem:[#allocation2 + $0x4c] sm:$0xf]  ;;  %v4167_v15 = vld [vmem:[#allocation2 + $0x54] sm:$0xf0]  ;;  %v5147_v9 = vunpack.i.h.bf16 %v6740_v37 }
 0x246   : > { %8750 = vst [vmem:[#allocation35_spill] sm:$0xff] %v6933_v23  ;;  %4231 = vmatpush.bf16.msk.msra.mxu0 %vm6459_vm3, %v6904_v22  ;;  %4261 = vmatpush.bf16.msk.msrb.mxu3 %vm6459_vm3, %v6931_v38  ;;  %v1108_v4 = vsel %vm553_vm6, %v8752_v42, %v5197_v51  ;;  %v1107_v40 = vsel %vm553_vm6, %v8753_v17, %v5172_v55  ;;  %v8757_v55 = vunpack.i.l.bf16 %v6729_v26 }
 0x247   : > { %8751 = vst [vmem:[#allocation36_spill] sm:$0xff] %v6935_v5  ;;  %v5255_v27 = vpop.permute.xlu1 %5254  ;;  %v6968_v42 = vpack.c.bf16 %v1108_v4, %v1107_v40  ;;  %v1106_v46 = vsel %vm553_vm6, %v8758_v16, %v5152_v0  ;;  %v8760_v16 = vunpack.i.l.bf16 %v6742_v30  ;;  %v4170_v0 = vor.u32 %v4841_v29, %v4167_v15  ;;  %v1392_v29 = vpop.permute.xlu0 %1391 }
 0x248   : > { %v5257_v53 = vunpack.i.h.bf16 %v5255_v27  ;;  %v5256_v35 = vunpack.i.l.bf16 %v5255_v27  ;;  %v1105_v17 = vsel %vm553_vm6, %v8757_v55, %v5132_v50  ;;  %v5127_v50 = vunpack.i.h.bf16 %v6668_v19 }
 0x249   : > { %1528 = vmatpush.bf16.msra.mxu1 %v6599_v14  ;;  %8756 = vst [vmem:[#allocation39_spill] sm:$0xff] %v6968_v42  ;;  %v6985_v26 = vpack.c.bf16 %v1106_v46, %v1105_v17  ;;  %v8763_v46 = vunpack.i.l.bf16 %v6740_v37  ;;  %v8764_v30 = vunpack.i.l.bf16 %v6668_v19 }
 0x24a   : > { %4234 = vmatpush.bf16.msk.msra.mxu0 %vm6459_vm3, %v6935_v5  ;;  %v1341_v59 = vsel %vm787_vm7, %v5257_v53, 0.0  ;;  %v1329_v27 = vsel %vm787_vm7, %v5256_v35, %v5257_v53  ;;  %v5167_v53 = vunpack.i.h.bf16 %v6736_v13  ;;  %v8761_v35 = vunpack.i.l.bf16 %v6736_v13  ;;  %v4173_v13 = vld [vmem:[#allocation2 + $0x50] sm:$0xf] }
 0x24b   : > { %v6964_v14 = vpack.c.bf16 %v1342_v3, %v1341_v59  ;;  %v6966_v51 = vpack.c.bf16 %v1330_v12, %v1329_v27  ;;  %8759 = vst [vmem:[#allocation40_spill] sm:$0xff] %v6985_v26  ;;  %v1066_v61 = vsel %vm508_vm14, %v8763_v46, %v5147_v9  ;;  %v1065_v31 = vsel %vm508_vm14, %v8764_v30, %v5127_v50  ;;  %v4843_v59 = vld [vmem:[#allocation2 + $0x58] sm:$0xf0]  ;;  %v1402_v30 = vpop.permute.xlu2 %1401 }
 0x24c   : > { %1529 = vmatmul.bf16.vlgmr.msra.gmra.mxu1 %v4158_v41  ;;  %v1068_v41 = vsel %vm508_vm14, %v8760_v16, %v5192_v24  ;;  %v1067_v4 = vsel %vm508_vm14, %v8761_v35, %v5167_v53  ;;  %v7008_v3 = vpack.c.bf16 %v1066_v61, %v1065_v31  ;;  %v4174_v37 = vor.u32 %v4843_v59, %v4173_v13 }
 0x24d   : > { %8754 = vst [vmem:[#allocation37_spill] sm:$0xff] %v6964_v14  ;;  %4220 = vmatpush.bf16.msk.msrb.mxu2 %vm6320_vm5, %v6966_v51  ;;  %4264 = vmatpush.bf16.msk.msrb.mxu3 %vm6459_vm3, %v6964_v14  ;;  %v6997_v40 = vpack.c.bf16 %v1068_v41, %v1067_v4 }
 0x24e   : > { %8755 = vst [vmem:[#allocation38_spill] sm:$0xff] %v6966_v51  ;;  %1506 = vmatpush.bf16.msra.mxu0 %v6968_v42 }
 0x24f   : > { %8762 = vst [vmem:[#allocation41_spill] sm:$0xff] %v6997_v40 }
 0x250   : > { %4221 = vmatmul.msk.bf16.vlgmr.msrb.gmra.mxu2 %vm898_vm12, %v4162_v45  ;;  %8765 = vst [vmem:[#allocation42_spill] sm:$0xff] %v7008_v3 }
 0x252   : > { %1507 = vmatpush.bf16.msra.mxu0 %v6985_v26 }
 0x254   : > { %1477 = vmatmul.bf16.gmra.mxu3 %v4170_v0 }
 0x256   : > { %4237 = vmatpush.bf16.msk.msra.mxu0 %vm6401_vm11, %v6997_v40 }
 0x25a   : > { %4240 = vmatpush.bf16.msk.msra.mxu0 %vm6401_vm11, %v7008_v3 }
 0x25c   : > { %1534 = vmatmul.bf16.gmra.mxu1 %v4170_v0 }
 0x25d   : > { %1510 = vmatmul.bf16.vlgmr.msra.gmra.mxu0 %v6810_v57  ;;  %v1397_v57 = vpop.permute.xlu1 %1396 }
 0x260   : > { %4222 = vmatmul.msk.bf16.gmra.mxu2 %vm898_vm12, %v4174_v37 }
 0x264   : > { %4265 = vmatmul.msk.bf16.vlgmr.msrb.gmra.mxu3 %vm898_vm12, %v4162_v45 }
 0x26d   : > { %1515 = vmatmul.bf16.gmra.mxu0 %v6880_v28 }
 0x274   : > { %4266 = vmatmul.msk.bf16.gmra.mxu3 %vm898_vm12, %v4174_v37 }
 0x2a9   : > { %v1454_v19 = vpop.f32.mrf.mxu1 }
 0x2aa   : > { %v1455_v53 = vadd.f32 %v1454_v19, %v1392_v29 }
 0x2b1   : > { %v1456_v27 = vpop.f32.mrf.mxu1 }
 0x2b2   : > { %v1457_v16 = vadd.f32 %v1456_v27, %v1397_v57  ;;  %v1407_v27 = vpop.permute.xlu0 %1406 }
 0x2b9   : > { %v1459_v24 = vpop.f32.mrf.mxu1 }
 0x2ba   : > { %v1460_v13 = vadd.f32 %v1459_v24, %v1402_v30 }
 0x2c1   : > { %v1461_v15 = vpop.f32.mrf.mxu1 }
 0x2c7   : > { %v1473_v12 = vpop.f32.mrf.mxu3 }
 0x2c8   : > { %v1474_v41 = vadd.f32 %v1473_v12, %v1455_v53 }
 0x2c9   : > { %v1530_v4 = vpop.f32.mrf.mxu1 }
 0x2cf   : > { %v1475_v55 = vpop.f32.mrf.mxu3 }
 0x2d0   : > { %v1476_v50 = vadd.f32 %v1475_v55, %v1457_v16  ;;  %v1462_v16 = vadd.f32 %v1461_v15, %v1407_v27 }
 0x2d1   : > { %v1532_v55 = vpop.f32.mrf.mxu1 }
 0x2d3   : > { %v1492_v17 = vpop.f32.mrf.mxu2 }
 0x2d4   : > { %v1493_v45 = vadd.f32 %v1492_v17, %v1474_v41 }
 0x2d6   : > { %v1559_v46 = vmax.f32 %v1493_v45, 0.0 }
 0x2d7   : > { %v1478_v9 = vpop.f32.mrf.mxu3 }
 0x2d8   : > { %v1479_v37 = vadd.f32 %v1478_v9, %v1460_v13 }
 0x2da   : > { %v1511_v0 = vpop.f32.mrf.mxu0 }
 0x2db   : > { %v1494_v35 = vpop.f32.mrf.mxu2  ;;  %v1512_v39 = vadd.f32 %v1511_v0, %v1392_v29 }
 0x2dc   : > { %v1495_v28 = vadd.f32 %v1494_v35, %v1476_v50 }
 0x2dd   : > { %v1531_v12 = vadd.f32 %v1530_v4, %v1512_v39  ;;  %v1535_v4 = vpop.f32.mrf.mxu1 }
 0x2de   : > { %v1561_v61 = vmax.f32 %v1495_v28, 0.0 }
 0x2df   : > { %v1480_v31 = vpop.f32.mrf.mxu3 }
 0x2e0   : > { %v7018_v59 = vpack.c.bf16 %v1561_v61, %v1559_v46  ;;  %v1481_v45 = vadd.f32 %v1480_v31, %v1462_v16 }
 0x2e2   : > { %v1513_v19 = vpop.f32.mrf.mxu0 }
 0x2e3   : > { %v1497_v7 = vpop.f32.mrf.mxu2  ;;  %v1514_v35 = vadd.f32 %v1513_v19, %v1397_v57 }
 0x2e4   : > { %v1498_v2 = vadd.f32 %v1497_v7, %v1479_v37 }
 0x2e5   : > { %v1533_v7 = vadd.f32 %v1532_v55, %v1514_v35  ;;  %v1537_v16 = vpop.f32.mrf.mxu1 }
 0x2e6   : > { %v7020_v53 = vmax.f32 %v1498_v2, 0.0 }
 0x2e7   : > { %v1549_v17 = vpop.f32.mrf.mxu3 }
 0x2e8   : > { %v1550_v41 = vadd.f32 %v1549_v17, %v1531_v12  ;;  %v5263_v50 = vpack.i.bf16 %v7020_v53, %v1559_v46 }
 0x2ea   : > { %v1560_v24 = vmax.f32 %v1550_v41, 0.0  ;;  %5264 = vrot.lane.b32.xlu2 %v5263_v50, %s8766_s15  ;;  %v1516_v28 = vpop.f32.mrf.mxu0 }
 0x2eb   : > { %v1499_v9 = vpop.f32.mrf.mxu2 }
 0x2ec   : > { %v1500_v29 = vadd.f32 %v1499_v9, %v1481_v45  ;;  %v5273_v0 = vpack.i.bf16 %v1560_v24, %v1559_v46  ;;  %v1517_v46 = vadd.f32 %v1516_v28, %v1402_v30 }
 0x2ee   : > { %v7024_v13 = vmax.f32 %v1500_v29, 0.0  ;;  %5274 = vrot.lane.b32.xlu1 %v5273_v0, %s8767_s25  ;;  %v1536_v55 = vadd.f32 %v1535_v4, %v1517_v46  ;;  %v4268_v4 = vld [vmem:[%s8729_s2 + $0x48] sm:$0xff] }
 0x2ef   : > { %v1551_v2 = vpop.f32.mrf.mxu3  ;;  %v4388_v46 = vld [vmem:[%s8729_s2 + $0x68] sm:$0xff] }
 0x2f0   : > { %v1552_v39 = vadd.f32 %v1551_v2, %v1533_v7  ;;  %v5268_v15 = vpack.i.bf16 %v7024_v13, %v7020_v53 }
 0x2f2   : > { %v1562_v31 = vmax.f32 %v1552_v39, 0.0  ;;  %5269 = vrot.lane.b32.xlu0 %v5268_v15, %s8670_s12  ;;  %5279 = vrot.lane.b32.xlu2 %v5273_v0, %s8768_s29  ;;  %v1518_v19 = vpop.f32.mrf.mxu0  ;;  %v4267_v15 = vld [vmem:[%s8729_s2 + $0x40] sm:$0xff] }
 0x2f3   : > { %v1519_v17 = vadd.f32 %v1518_v19, %v1407_v27  ;;  %v4387_v19 = vld [vmem:[%s8729_s2 + $0x60] sm:$0xff] }
 0x2f4   : > { %v7034_v37 = vpack.c.bf16 %v1562_v31, %v1560_v24  ;;  %v5308_v50 = vpack.i.bf16 %v1562_v31, %v1561_v61 }
 0x2f5   : > { %v1538_v45 = vadd.f32 %v1537_v16, %v1519_v17  ;;  %v4390_v17 = vld [vmem:[%s8729_s2 + $0x78] sm:$0xff] }
 0x2f6   : > { %5289 = vrot.lane.b32.xlu1 %v5273_v0, %s8670_s12 }
 0x2f7   : > { %v1554_v12 = vpop.f32.mrf.mxu3 }
 0x2f8   : > { %v1555_v41 = vadd.f32 %v1554_v12, %v1536_v55  ;;  %v4389_v55 = vld [vmem:[%s8729_s2 + $0x70] sm:$0xff] }
 0x2fa   : > { %5284 = vrot.lane.b32.xlu0 %v5273_v0, %s8672_s14  ;;  %5294 = vrot.lane.b32.xlu2 %v5273_v0, %s8769_s13  ;;  %v7039_v30 = vmax.f32 %v1555_v41, 0.0 }
 0x2fc   : > { %v5323_v27 = vpack.i.bf16 %v7039_v30, %v7020_v53  ;;  %v5388_v2 = vpack.i.bf16 %v7024_v13, %v7039_v30 }
 0x2fe   : > { %5309 = vrot.lane.b32.xlu1 %v5308_v50, %s8672_s14 }
 0x2ff   : > { %v1556_v35 = vpop.f32.mrf.mxu3 }
 0x300   : > { %v1557_v9 = vadd.f32 %v1556_v35, %v1538_v45 }
 0x302   : > { %v7041_v29 = vmax.f32 %v1557_v9, 0.0  ;;  %5304 = vrot.lane.b32.xlu0 %v5308_v50, %s8768_s29  ;;  %5299 = vrot.lane.b32.xlu2 %v5308_v50, %s8767_s25 }
 0x304   : > { %v5338_v28 = vpack.i.bf16 %v7041_v29, %v7024_v13  ;;  %v5358_v7 = vpack.i.bf16 %v7041_v29, %v7039_v30  ;;  %v5393_v39 = vpack.i.bf16 %v1560_v24, %v7041_v29  ;;  %v4269_v24 = vld [vmem:[%s8729_s2 + $0x50] sm:$0xff] }
 0x306   : > { %5324 = vrot.lane.b32.xlu1 %v5323_v27, %s8768_s29 }
 0x30a   : > { %5319 = vrot.lane.b32.xlu0 %v5323_v27, %s8767_s25  ;;  %5314 = vrot.lane.b32.xlu2 %v5308_v50, %s8670_s12 }
 0x30e   : > { %5339 = vrot.lane.b32.xlu1 %v5338_v28, %s8767_s25 }
 0x312   : > { %5334 = vrot.lane.b32.xlu0 %v5323_v27, %s8769_s13  ;;  %5329 = vrot.lane.b32.xlu2 %v5323_v27, %s8672_s14 }
 0x316   : > { %5359 = vrot.lane.b32.xlu1 %v5358_v7, %s8670_s12  ;;  %s7456_s12 = scalar_lea.vmem [#allocation6], %s8695_s16  ;;  %s3853_s16 = sshll.u32 %s8097_s18, 4  ;;  %s8543_s16 = int_to_ptr.vmem [resolvable:$true] %s3853_s16 }
 0x31a   : > { %5349 = vrot.lane.b32.xlu0 %v5338_v28, %s8672_s14  ;;  %5344 = vrot.lane.b32.xlu2 %v5338_v28, %s8768_s29  ;;  %s8804_s14 = smov 1  }
 0x31e   : > { %5364 = vrot.lane.b32.xlu1 %v5338_v28, %s8769_s13 }
 0x322   : > { %5354 = vrot.lane.b32.xlu0 %v5308_v50, %s8769_s13  ;;  %5384 = vrot.lane.b32.xlu2 %v5338_v28, %s8770_s30 }
 0x326   : > { %5369 = vrot.lane.b32.xlu1 %v5323_v27, %s8770_s30 }
 0x32a   : > { %5374 = vrot.lane.b32.xlu0 %v5273_v0, %s8770_s30  ;;  %5389 = vrot.lane.b32.xlu2 %v5388_v2, %s8766_s15 }
 0x32e   : > { %5379 = vrot.lane.b32.xlu1 %v5308_v50, %s8770_s30 }
 0x332   : > { %5394 = vrot.lane.b32.xlu0 %v5393_v39, %s8766_s15  ;;  %5404 = vrot.lane.b32.xlu2 %v5323_v27, %s8734_s22 }
 0x336   : > { %5399 = vrot.lane.b32.xlu1 %v5308_v50, %s8766_s15 }
 0x33a   : > { %5409 = vrot.lane.b32.xlu0 %v5338_v28, %s8734_s22  ;;  %5419 = vrot.lane.b32.xlu2 %v5308_v50, %s8734_s22 }
 0x33e   : > { %5414 = vrot.lane.b32.xlu1 %v5273_v0, %s8734_s22  ;;  %v4270_v0 = vld [vmem:[%s8729_s2 + $0x58] sm:$0xff] }
 0x342   : > { %1931 = vperm.xlu0 %5101, %v4267_v15   ;;  %1941 = vperm.xlu2 %5100, %v4269_v24  }
 0x344   : > { %v7087_v31 = vpop.permute.xlu2 %5264 }
 0x346   : > { %1936 = vperm.xlu1 %5102, %v4268_v4  }
 0x34a   : > { %1946 = vperm.xlu0 %5101, %v4270_v0   ;;  %2128 = vperm.xlu2 %5100, %v4388_v46  }
 0x34c   : > { %v7098_v12 = vpop.permute.xlu2 %5279 }
 0x34e   : > { %2123 = vperm.xlu1 %5102, %v4387_v19  }
 0x352   : > { %2133 = vperm.xlu0 %5101, %v4389_v55  }
 0x354   : > { %v7106_v16 = vpop.permute.xlu2 %5294 }
 0x356   : > { %2138 = vperm.xlu1 %5102, %v4390_v17  }
 0x35c   : > { %v5300_v41 = vpop.permute.xlu2 %5299 }
 0x35d   : > { %v5302_v50 = vunpack.i.h.bf16 %v5300_v41  ;;  %v5301_v45 = vunpack.i.l.bf16 %v5300_v41 }
 0x35f   : > { %v7109_v28 = vsel %vm508_vm14, %v5301_v45, %v5302_v50  ;;  %v7112_v7 = vsel %vm508_vm14, 0.0, %v5301_v45 }
 0x360   : > { %v5275_v35 = vpop.permute.xlu1 %5274 }
 0x361   : > { %v5277_v9 = vunpack.i.h.bf16 %v5275_v35  ;;  %v5276_v27 = vunpack.i.l.bf16 %v5275_v35 }
 0x363   : > { %v7115_v2 = vsel %vm508_vm14, %v5276_v27, %v5277_v9  ;;  %v7118_v39 = vsel %vm508_vm14, 0.0, %v5276_v27 }
 0x364   : > { %v5270_v4 = vpop.permute.xlu0 %5269  ;;  %v5315_v0 = vpop.permute.xlu2 %5314 }
 0x365   : > { %v5272_v46 = vunpack.i.h.bf16 %v5270_v4  ;;  %v5271_v19 = vunpack.i.l.bf16 %v5270_v4  ;;  %v5316_v41 = vunpack.i.l.bf16 %v5315_v0  ;;  %v5317_v26 = vunpack.i.h.bf16 %v5315_v0 }
 0x367   : > { %v1732_v55 = vsel %vm631_vm1, 0.0, %v5272_v46  ;;  %v1731_v17 = vsel %vm631_vm1, 0.0, %v5271_v19  ;;  %v1730_v9 = vsel %vm631_vm1, 0.0, %v5316_v41  ;;  %v1718_v6 = vsel %vm631_vm1, %v5316_v41, %v5317_v26 }
 0x368   : > { %v4296_v50 = vpack.c.bf16 %v1732_v55, %v1731_v17  ;;  %v5290_v45 = vpop.permute.xlu1 %5289 }
 0x369   : > { %v5291_v35 = vunpack.i.l.bf16 %v5290_v45 }
 0x36a   : > { %4297 = vmatpush.bf16.msk.msra.mxu2 %vm6292_vm2, %v4296_v50 }
 0x36b   : > { %v1729_v27 = vsel %vm631_vm1, 0.0, %v5291_v35 }
 0x36c   : > { %v4299_v61 = vpack.c.bf16 %v1730_v9, %v1729_v27  ;;  %v7130_v57 = vpop.permute.xlu0 %5284  ;;  %v5330_v55 = vpop.permute.xlu2 %5329  ;;  %v5292_v27 = vunpack.i.h.bf16 %v5290_v45 }
 0x36d   : > { %v5286_v60 = vunpack.i.l.bf16 %v7130_v57 }
 0x36e   : > { %4300 = vmatpush.bf16.msk.msra.mxu2 %vm6292_vm2, %v4299_v61  ;;  %v5331_v61 = vunpack.i.l.bf16 %v5330_v55  ;;  %v1717_v38 = vsel %vm631_vm1, %v5291_v35, %v5292_v27 }
 0x36f   : > { %v4347_v0 = vpack.c.bf16 %v1718_v6, %v1717_v38  ;;  %v5287_v6 = vunpack.i.h.bf16 %v7130_v57  ;;  %v1689_v38 = vsel %vm586_vm4, 0.0, %v5286_v60 }
 0x370   : > { %v5310_v4 = vpop.permute.xlu1 %5309 }
 0x371   : > { %v5311_v5 = vunpack.i.l.bf16 %v5310_v4  ;;  %v5312_v27 = vunpack.i.h.bf16 %v5310_v4 }
 0x373   : > { %v1690_v41 = vsel %vm586_vm4, 0.0, %v5311_v5  ;;  %v1678_v52 = vsel %vm586_vm4, %v5311_v5, %v5312_v27 }
 0x374   : > { %v7134_v24 = vpop.permute.xlu0 %5304  ;;  %v7142_v50 = vpop.permute.xlu2 %5344 }
 0x375   : > { %v5347_v27 = vunpack.i.h.bf16 %v7142_v50 }
 0x378   : > { %v7136_v15 = vpop.permute.xlu1 %5324 }
 0x37c   : > { %v7138_v17 = vpop.permute.xlu0 %5319  ;;  %v7151_v22 = vpop.permute.xlu2 %5384 }
 0x380   : > { %v7140_v3 = vpop.permute.xlu1 %5339 }
 0x384   : > { %v7144_v25 = vpop.permute.xlu0 %5334 }
 0x388   : > { %v5360_v9 = vpop.permute.xlu1 %5359 }
 0x389   : > { %v5362_v40 = vunpack.i.h.bf16 %v5360_v9  ;;  %v5361_v1 = vunpack.i.l.bf16 %v5360_v9  ;;  %v5296_v9 = vunpack.i.l.bf16 %v7106_v16 }
 0x38b   : > { %v1720_v43 = vsel %vm631_vm1, %v5272_v46, %v5362_v40  ;;  %v1719_v14 = vsel %vm631_vm1, %v5271_v19, %v5361_v1  ;;  %v1691_v40 = vsel %vm586_vm4, 0.0, %v5331_v61  ;;  %v5332_v46 = vunpack.i.h.bf16 %v5330_v55 }
 0x38c   : > { %v4344_v42 = vpack.c.bf16 %v1720_v43, %v1719_v14  ;;  %v5350_v56 = vpop.permute.xlu0 %5349  ;;  %v5336_v14 = vunpack.i.l.bf16 %v7144_v25  ;;  %v8771_v55 = vunpack.i.h.bf16 %v7144_v25 }
 0x38d   : > { %v5351_v51 = vunpack.i.l.bf16 %v5350_v56  ;;  %v5352_v45 = vunpack.i.h.bf16 %v5350_v56 }
 0x38e   : > { %4345 = vmatpush.bf16.msk.msra.mxu3 %vm6401_vm11, %v4344_v42 }
 0x38f   : > { %v1692_v43 = vsel %vm586_vm4, 0.0, %v5351_v51  ;;  %v1680_v1 = vsel %vm586_vm4, %v5351_v51, %v5352_v45  ;;  %v1679_v51 = vsel %vm586_vm4, %v5331_v61, %v5332_v46  ;;  %v4305_v45 = vpack.c.bf16 %v1690_v41, %v1689_v38 }
 0x390   : > { %v4302_v19 = vpack.c.bf16 %v1692_v43, %v1691_v40  ;;  %v7159_v26 = vpop.permute.xlu1 %5364  ;;  %v1839_v40 = vsel %vm754_vm13, %v5336_v14, %v8771_v55  ;;  %v5326_v43 = vunpack.i.l.bf16 %v7136_v15  ;;  %v5346_v14 = vunpack.i.l.bf16 %v7142_v50 }
 0x391   : > { %v5367_v56 = vunpack.i.h.bf16 %v7159_v26  ;;  %v5366_v35 = vunpack.i.l.bf16 %v7159_v26  ;;  %v5327_v55 = vunpack.i.h.bf16 %v7136_v15  ;;  %v8772_v61 = vunpack.i.h.bf16 %v7106_v16 }
 0x392   : > { %4303 = vmatpush.bf16.msk.msra.mxu2 %vm6320_vm5, %v4302_v19  ;;  %4348 = vmatpush.bf16.msk.msra.mxu3 %vm6401_vm11, %v4347_v0  ;;  %v4350_v0 = vpack.c.bf16 %v1680_v1, %v1679_v51  ;;  %v1677_v1 = vsel %vm586_vm4, %v5286_v60, %v5287_v6  ;;  %v5387_v41 = vunpack.i.h.bf16 %v7151_v22  ;;  %v5306_v15 = vunpack.i.l.bf16 %v7134_v24 }
 0x393   : > { %v1840_v4 = vsel %vm754_vm13, %v5366_v35, %v5367_v56  ;;  %v1837_v46 = vsel %vm754_vm13, %v5296_v9, %v8772_v61  ;;  %v5386_v35 = vunpack.i.l.bf16 %v7151_v22  ;;  %v4310_v38 = vpack.c.bf16 %v5346_v14, %v5326_v43 }
 0x394   : > { %v1923_v19 = vpack.c.bf16 %v1840_v4, %v1839_v40  ;;  %v7181_v42 = vpop.permute.xlu0 %5354  ;;  %v7203_v40 = vpop.permute.xlu2 %5389  ;;  %v4353_v6 = vpack.c.bf16 %v1678_v52, %v1677_v1  ;;  %v5341_v4 = vunpack.i.l.bf16 %v7140_v3  ;;  %v1647_v50 = vsel %vm553_vm6, %v5326_v43, %v5327_v55 }
 0x395   : > { %v5357_v57 = vunpack.i.h.bf16 %v7181_v42  ;;  %v5356_v23 = vunpack.i.l.bf16 %v7181_v42  ;;  %v1800_v52 = vsel %vm713_vm8, %v5386_v35, %v5387_v41  ;;  %v1648_v43 = vsel %vm553_vm6, %v5346_v14, %v5347_v27 }
 0x396   : > { %4306 = vmatpush.bf16.msk.msra.mxu2 %vm6320_vm5, %v4305_v45  ;;  %2004 = vmatpush.bf16.msrb.mxu0 %v1923_v19  ;;  %v5281_v19 = vunpack.i.l.bf16 %v7098_v12  ;;  %v5342_v55 = vunpack.i.h.bf16 %v7140_v3  ;;  %v1900_v35 = vpack.c.bf16 %v1648_v43, %v1647_v50  ;;  %v8776_v42 = vpack.c.bf16 %v7109_v28, %v7115_v2 }
 0x397   : > { %4351 = vmatpush.bf16.msk.msra.mxu3 %vm6459_vm3, %v4350_v0  ;;  %v1838_v5 = vsel %vm754_vm13, %v5356_v23, %v5357_v57  ;;  %v5307_v23 = vunpack.i.h.bf16 %v7134_v24  ;;  %v5321_v0 = vunpack.i.l.bf16 %v7138_v17  ;;  %v5282_v24 = vunpack.i.h.bf16 %v7098_v12 }
 0x398   : > { %v7205_v9 = vpop.permute.xlu1 %5369  ;;  %v1921_v60 = vpack.c.bf16 %v1838_v5, %v1837_v46  ;;  %v4315_v46 = vpack.c.bf16 %v5306_v15, %v5281_v19  ;;  %v5322_v12 = vunpack.i.h.bf16 %v7138_v17  ;;  %v4273_v17 = vld [vmem:[#allocation2 + $0x60] sm:$0xf] }
 0x399   : > { %v5372_v51 = vunpack.i.h.bf16 %v7205_v9  ;;  %v5371_v45 = vunpack.i.l.bf16 %v7205_v9  ;;  %v1645_v50 = vsel %vm553_vm6, %v5281_v19, %v5282_v24  ;;  %v5267_v24 = vunpack.i.h.bf16 %v7087_v31 }
 0x39a   : > { %4311 = vmatpush.bf16.msk.msra.mxu2 %vm6353_vm9, %v4310_v38  ;;  %2005 = vmatpush.bf16.msrb.mxu0 %v1921_v60  ;;  %v1620_v38 = vsel %vm508_vm14, 0.0, %v5341_v4  ;;  %v1646_v60 = vsel %vm553_vm6, %v5306_v15, %v5307_v23  ;;  %v4845_v15 = vld [vmem:[#allocation2 + $0x68] sm:$0xf0]  ;;  %v1607_v23 = vsel %vm508_vm14, %v5321_v0, %v5322_v12 }
 0x39b   : > { %v1799_v61 = vsel %vm713_vm8, %v5371_v45, %v5372_v51  ;;  %4354 = vmatpush.bf16.msk.msra.mxu3 %vm6459_vm3, %v4353_v6  ;;  %v1619_v6 = vsel %vm508_vm14, 0.0, %v5321_v0 }
 0x39c   : > { %v4324_v1 = vpack.c.bf16 %v1800_v52, %v1799_v61  ;;  %v7225_v5 = vpop.permute.xlu0 %5374  ;;  %v4318_v3 = vpack.c.bf16 %v1620_v38, %v1619_v6  ;;  %v1608_v52 = vsel %vm508_vm14, %v5341_v4, %v5342_v55  ;;  %v7241_v43 = vpop.permute.xlu2 %5404  ;;  %v5392_v6 = vunpack.i.h.bf16 %v7203_v40 }
 0x39d   : > { %v5377_v45 = vunpack.i.h.bf16 %v7225_v5  ;;  %v5376_v14 = vunpack.i.l.bf16 %v7225_v5  ;;  %v4356_v55 = vpack.c.bf16 %v1608_v52, %v1607_v23  ;;  %v8775_v52 = vunpack.i.h.bf16 %v7106_v16  ;;  %v4844_v5 = vld [vmem:[#allocation2 + $0x64] sm:$0xf] }
 0x39e   : > { %4316 = vmatpush.bf16.msk.msra.mxu2 %vm6353_vm9, %v4315_v46  ;;  %4325 = vmatpush.bf16.msk.msrb.mxu0 %vm6292_vm2, %v4324_v1  ;;  %v1898_v1 = vpack.c.bf16 %v1646_v60, %v1645_v50  ;;  %v5407_v23 = vunpack.i.h.bf16 %v7241_v43 }
 0x39f   : > { %2046 = vmatpush.bf16.msra.mxu3 %v1900_v35  ;;  %v5391_v35 = vunpack.i.l.bf16 %v7203_v40  ;;  %v1797_v19 = vsel %vm713_vm8, %v5376_v14, %v5377_v45  ;;  %v8774_v14 = vpack.c.bf16 %v7112_v7, %v7118_v39 }
 0x3a0   : > { %v5380_v27 = vpop.permute.xlu1 %5379 }
 0x3a1   : > { %v5382_v61 = vunpack.i.h.bf16 %v5380_v27  ;;  %v5381_v46 = vunpack.i.l.bf16 %v5380_v27  ;;  %v4274_v27 = vor.u32 %v4845_v15, %v4273_v17  ;;  %v1759_v50 = vsel %vm672_vm10, %v5267_v24, %v5391_v35 }
 0x3a2   : > { %4319 = vmatpush.bf16.msk.msra.mxu2 %vm6292_vm2, %v4318_v3  ;;  %v8773_v3 = vunpack.i.h.bf16 %v7144_v25  ;;  %v1811_v15 = vsel %vm713_vm8, %v5372_v51, 0.0 }
 0x3a3   : > { %v1798_v4 = vsel %vm713_vm8, %v5381_v46, %v5382_v61  ;;  %2047 = vmatpush.bf16.msra.mxu3 %v1898_v1  ;;  %v4365_v46 = vpack.c.bf16 %v5357_v57, %v8775_v52  ;;  %v1812_v57 = vsel %vm713_vm8, %v5387_v41, 0.0  ;;  %v1810_v28 = vsel %vm713_vm8, %v5382_v61, 0.0  ;;  %v4281_v52 = vld [vmem:[#allocation2 + $0x68] sm:$0xf] }
 0x3a4   : > { %v4327_v38 = vpack.c.bf16 %v1798_v4, %v1797_v19  ;;  %v7252_v60 = vpop.permute.xlu0 %5394  ;;  %v4362_v0 = vpack.c.bf16 %v5367_v56, %v8773_v3  ;;  %v5266_v56 = vunpack.i.l.bf16 %v7087_v31  ;;  %v5406_v19 = vunpack.i.l.bf16 %v7241_v43  ;;  %v5420_v9 = vpop.permute.xlu2 %5419 }
 0x3a5   : > { %v5396_v12 = vunpack.i.l.bf16 %v7252_v60  ;;  %v5397_v25 = vunpack.i.h.bf16 %v7252_v60  ;;  %v4368_v4 = vpack.c.bf16 %v1812_v57, %v1811_v15  ;;  %v5421_v22 = vunpack.i.l.bf16 %v5420_v9  ;;  %v8783_v60 = vld [vmem:[#allocation20_spill] sm:$0xff] }
 0x3a6   : > { %4322 = vmatpush.bf16.msk.msra.mxu2 %vm6292_vm2, %v8774_v14  ;;  %4328 = vmatpush.bf16.msk.msrb.mxu0 %vm6292_vm2, %v4327_v38  ;;  %v1871_v2 = vsel %vm787_vm7, %v5406_v19, %v5407_v23  ;;  %v5422_v38 = vunpack.i.h.bf16 %v5420_v9  ;;  %v4285_v14 = vld [vmem:[#allocation2 + $0x78] sm:$0xf]  ;;  %v8786_v9 = vld [vmem:[#allocation34_spill] sm:$0xff] }
 0x3a7   : > { %v1760_v26 = vsel %vm672_vm10, %v5392_v6, %v5396_v12  ;;  %4357 = vmatpush.bf16.msk.msra.mxu3 %vm6401_vm11, %v4356_v55  ;;  %v1757_v31 = vsel %vm672_vm10, %v5266_v56, %v5397_v25  ;;  %v8785_v57 = vld [vmem:[#allocation36_spill] sm:$0xff] }
 0x3a8   : > { %v4330_v7 = vpack.c.bf16 %v1760_v26, %v1759_v50  ;;  %v5400_v39 = vpop.permute.xlu1 %5399  ;;  %v4848_v50 = vld [vmem:[#allocation2 + $0x80] sm:$0xf0]  ;;  %v1772_v26 = vsel %vm672_vm10, %v5396_v12, 0.0  ;;  %v4846_v12 = vld [vmem:[#allocation2 + $0x70] sm:$0xf0] }
 0x3a9   : > { %v5402_v1 = vunpack.i.h.bf16 %v5400_v39  ;;  %v5401_v17 = vunpack.i.l.bf16 %v5400_v39  ;;  %1993 = vmatmul.bf16.vlgmr.msra.gmra.mxu2 %v4274_v27  ;;  %v8777_v39 = vpack.c.bf16 %v7024_v13, %v7020_v53  ;;  %v1883_v53 = vsel %vm787_vm7, %v5407_v23, 0.0  ;;  %v8784_v23 = vld [vmem:[#allocation38_spill] sm:$0xff] }
 0x3aa   : > { %4363 = vmatpush.bf16.msk.msrb.mxu2 %vm6431_vm15, %v4362_v0  ;;  %4331 = vmatpush.bf16.msk.msrb.mxu0 %vm6320_vm5, %v4330_v7  ;;  %v4286_v19 = vor.u32 %v4848_v50, %v4285_v14  ;;  %v4282_v40 = vor.u32 %v4846_v12, %v4281_v52  ;;  %v8797_v50 = vld [vmem:[#allocation29_spill] sm:$0xff] }
 0x3ab   : > { %v1758_v16 = vsel %vm672_vm10, %v5401_v17, %v5402_v1  ;;  %4360 = vmatpush.bf16.msk.msra.mxu3 %vm6401_vm11, %v8776_v42  ;;  %v8800_v12 = vld [vmem:[#allocation33_spill] sm:$0xff] }
 0x3ac   : > { %v4333_v51 = vpack.c.bf16 %v1758_v16, %v1757_v31  ;;  %v5410_v43 = vpop.permute.xlu0 %5409  ;;  %v1770_v16 = vsel %vm672_vm10, %v5402_v1, 0.0 }
 0x3ad   : > { %v5412_v24 = vunpack.i.h.bf16 %v5410_v43  ;;  %v5411_v55 = vunpack.i.l.bf16 %v5410_v43  ;;  %v8787_v43 = vld [vmem:[#allocation24_spill] sm:$0xff] }
 0x3ae   : > { %4366 = vmatpush.bf16.msk.msrb.mxu2 %vm6431_vm15, %v4365_v46  ;;  %2050 = vmatmul.bf16.vlgmr.msra.gmra.mxu3 %v4274_v27  ;;  %v1771_v46 = vsel %vm672_vm10, %v5391_v35, 0.0  ;;  %v1769_v35 = vsel %vm672_vm10, %v5397_v25, 0.0  ;;  %v4395_v25 = vld [vmem:[#allocation2 + $0x9c] sm:$0xf0] }
 0x3af   : > { %2196 = vmatpush.bf16.msrb.mxu3 %v6788_v62  ;;  %4334 = vmatpush.bf16.msk.msrb.mxu0 %vm6320_vm5, %v4333_v51  ;;  %v1872_v41 = vsel %vm787_vm7, %v5411_v55, %v5412_v24  ;;  %v1809_v62 = vsel %vm713_vm8, %v5377_v45, 0.0  ;;  %v1884_v7 = vsel %vm787_vm7, %v5412_v24, 0.0  ;;  %v4275_v45 = vld [vmem:[#allocation2 + $0x6c] sm:$0xf0]  ;;  %v4374_v17 = vpack.c.bf16 %v1772_v26, %v1771_v46  ;;  %v8789_v24 = vld [vmem:[#allocation37_spill] sm:$0xff]  ;;  %v8798_v26 = vld [vmem:[#allocation30_spill] sm:$0xff] }
 0x3b0   : > { %v4336_v6 = vpack.c.bf16 %v1872_v41, %v1871_v2  ;;  %v5415_v61 = vpop.permute.xlu1 %5414  ;;  %v4371_v3 = vpack.c.bf16 %v1810_v28, %v1809_v62  ;;  %v4380_v15 = vpack.c.bf16 %v1884_v7, %v1883_v53  ;;  %v4278_v31 = vor.u32 %v4844_v5, %v4275_v45  ;;  %v8790_v55 = vld [vmem:[#allocation25_spill] sm:$0xff]  ;;  %v8791_v28 = vld [vmem:[#allocation40_spill] sm:$0xff]  ;;  %v8792_v2 = vld [vmem:[#allocation26_spill] sm:$0xff] }
 0x3b1   : > { %v5417_v0 = vunpack.i.h.bf16 %v5415_v61  ;;  %v5416_v27 = vunpack.i.l.bf16 %v5415_v61  ;;  %v8793_v41 = vld [vmem:[#allocation41_spill] sm:$0xff]  ;;  %v8794_v62 = vld [vmem:[#allocation27_spill] sm:$0xff]  ;;  %v4853_v61 = vld [vmem:[#allocation2 + $0xac] sm:$0xf] }
 0x3b2   : > { %4369 = vmatpush.bf16.msk.msrb.mxu2 %vm6401_vm11, %v4368_v4  ;;  %4337 = vmatpush.bf16.msk.msrb.mxu1 %vm6320_vm5, %v4336_v6  ;;  %v8788_v4 = vld [vmem:[#allocation39_spill] sm:$0xff]  ;;  %v4405_v7 = vld [vmem:[#allocation2 + $0xa8] sm:$0xf]  ;;  %v4401_v5 = vld [vmem:[#allocation2 + $0x98] sm:$0xf] }
 0x3b3   : > { %2197 = vmatpush.bf16.msrb.mxu3 %v6806_v54  ;;  %2010 = vmatpush.bf16.msrb.mxu0 %v8777_v39  ;;  %v1870_v54 = vsel %vm787_vm7, %v5421_v22, %v5422_v38  ;;  %v1869_v56 = vsel %vm787_vm7, %v5416_v27, %v5417_v0  ;;  %v1881_v42 = vsel %vm787_vm7, %v5417_v0, 0.0  ;;  %v4851_v22 = vld [vmem:[#allocation2 + $0x98] sm:$0xf0]  ;;  %v8795_v0 = vld [vmem:[#allocation42_spill] sm:$0xff]  ;;  %v4854_v39 = vld [vmem:[#allocation2 + $0xb0] sm:$0xf0] }
 0x3b4   : > { %v4339_v13 = vpack.c.bf16 %v1870_v54, %v1869_v56  ;;  %v8796_v27 = vld [vmem:[#allocation28_spill] sm:$0xff]  ;;  %v4852_v45 = vld [vmem:[#allocation2 + $0xa0] sm:$0xf0]  ;;  %v8799_v54 = vld [vmem:[#allocation31_spill] sm:$0xff]  ;;  %v4406_v56 = vor.u32 %v4854_v39, %v4405_v7 }
 0x3b5   : > { %v4402_v52 = vor.u32 %v4852_v45, %v4401_v5  ;;  %v8801_v46 = vld [vmem:[#allocation21_spill] sm:$0xff]  ;;  %v8802_v53 = vld [vmem:[#allocation19_spill] sm:$0xff] }
 0x3b6   : > { %4372 = vmatpush.bf16.msk.msrb.mxu2 %vm6401_vm11, %v4371_v3  ;;  %4340 = vmatpush.bf16.msk.msrb.mxu1 %vm6320_vm5, %v4339_v13  ;;  %v4407_v3 = vld [vmem:[#allocation2 + $0xb4] sm:$0xf0]  ;;  %v4413_v13 = vld [vmem:[#allocation2 + $0xb0] sm:$0xf] }
 0x3b7   : > { %4445 = vmatpush.bf16.msk.msrb.mxu3 %vm6292_vm2, %v6829_v11  ;;  %2011 = vmatpush.bf16.msrb.mxu0 %v7018_v59  ;;  %v1882_v11 = vsel %vm787_vm7, %v5422_v38, 0.0  ;;  %v4377_v59 = vpack.c.bf16 %v1770_v16, %v1769_v35  ;;  %v4393_v38 = vld [vmem:[#allocation2 + $0x90] sm:$0xf]  ;;  %v4410_v14 = vor.u32 %v4853_v61, %v4407_v3  ;;  %v1932_v16 = vpop.permute.xlu0 %1931 }
 0x3b8   : > { %v4383_v1 = vpack.c.bf16 %v1882_v11, %v1881_v42  ;;  %v4394_v6 = vor.u32 %v4851_v22, %v4393_v38 }
 0x3b9   : > { %1998 = vmatmul.bf16.gmra.mxu2 %v4286_v19  ;;  %4341 = vmatmul.msk.bf16.vlgmr.msrb.gmra.mxu1 %vm898_vm12, %v4282_v40 }
 0x3ba   : > { %4375 = vmatpush.bf16.msk.msrb.mxu2 %vm6459_vm3, %v4374_v17  ;;  %4417 = vmatpush.bf16.msk.msra.mxu1 %vm6292_vm2, %v6682_v36  ;;  %v8778_v36 = vpack.c.bf16 %v7041_v29, %v7039_v30  ;;  %v8780_v30 = vld [vmem:[#allocation35_spill] sm:$0xff]  ;;  %v4855_v17 = vld [vmem:[#allocation2 + $0xb8] sm:$0xf0] }
 0x3bb   : > { %4381 = vmatpush.bf16.msk.msra.mxu0 %vm6459_vm3, %v4380_v15  ;;  %4448 = vmatpush.bf16.msk.msrb.mxu3 %vm6292_vm2, %v6848_v32  ;;  %v4287_v32 = vld [vmem:[#allocation2 + $0x84] sm:$0xf0]  ;;  %v8782_v29 = vld [vmem:[#allocation23_spill] sm:$0xff]  ;;  %v4414_v15 = vor.u32 %v4855_v17, %v4413_v13 }
 0x3bc   : > { %2012 = vmatmul.bf16.vlgmr.msrb.gmra.mxu0 %v4278_v31 }
 0x3be   : > { %4378 = vmatpush.bf16.msk.msrb.mxu2 %vm6459_vm3, %v4377_v59  ;;  %4420 = vmatpush.bf16.msk.msra.mxu1 %vm6292_vm2, %v6699_v21  ;;  %v4847_v21 = vld [vmem:[#allocation2 + $0x7c] sm:$0xf] }
 0x3bf   : > { %4384 = vmatpush.bf16.msk.msra.mxu0 %vm6459_vm3, %v4383_v1  ;;  %4451 = vmatpush.bf16.msk.msrb.mxu3 %vm6320_vm5, %v6862_v34  ;;  %v8779_v34 = vld [vmem:[#allocation22_spill] sm:$0xff] }
 0x3c0   : > { %2055 = vmatmul.bf16.gmra.mxu3 %v4286_v19 }
 0x3c2   : > { %2067 = vmatpush.bf16.msrb.mxu2 %v8778_v36  ;;  %4423 = vmatpush.bf16.msk.msra.mxu1 %vm6320_vm5, %v6714_v49  ;;  %v4849_v49 = vld [vmem:[#allocation2 + $0x88] sm:$0xf0] }
 0x3c3   : > { %4465 = vmatpush.bf16.msk.msrb.mxu0 %vm6401_vm11, %v6902_v18  ;;  %4454 = vmatpush.bf16.msk.msrb.mxu3 %vm6320_vm5, %v6878_v20  ;;  %v4293_v18 = vld [vmem:[#allocation2 + $0x80] sm:$0xf]  ;;  %v8781_v20 = vld [vmem:[#allocation32_spill] sm:$0xff] }
 0x3c6   : > { %2068 = vmatpush.bf16.msrb.mxu2 %v7034_v37  ;;  %4426 = vmatpush.bf16.msk.msra.mxu1 %vm6320_vm5, %v6731_v10  ;;  %v4294_v37 = vor.u32 %v4849_v49, %v4293_v18  ;;  %v4850_v10 = vld [vmem:[#allocation2 + $0x94] sm:$0xf] }
 0x3c7   : > { %4468 = vmatpush.bf16.msk.msrb.mxu0 %vm6401_vm11, %v6836_v48  ;;  %2202 = vmatpush.bf16.msrb.mxu3 %v8779_v34  ;;  %v4290_v48 = vor.u32 %v4847_v21, %v4287_v32  ;;  %v4398_v51 = vor.u32 %v4850_v10, %v4395_v25  ;;  %v1937_v32 = vpop.permute.xlu1 %1936  ;;  %v1942_v10 = vpop.permute.xlu2 %1941 }
 0x3c9   : > { %4342 = vmatmul.msk.bf16.gmra.mxu1 %vm898_vm12, %v4294_v37  ;;  %2069 = vmatmul.bf16.vlgmr.msrb.gmra.mxu2 %v4278_v31 }
 0x3ca   : > { %4457 = vmatpush.bf16.msk.msra.mxu2 %vm6320_vm5, %v8780_v30  ;;  %4431 = vmatpush.bf16.msk.msra.mxu1 %vm6353_vm9, %v8782_v29 }
 0x3cb   : > { %4471 = vmatpush.bf16.msk.msrb.mxu0 %vm6459_vm3, %v8781_v20  ;;  %2203 = vmatpush.bf16.msrb.mxu3 %v8783_v60 }
 0x3cc   : > { %2017 = vmatmul.bf16.gmra.mxu0 %v4290_v48 }
 0x3ce   : > { %4460 = vmatpush.bf16.msk.msra.mxu2 %vm6320_vm5, %v8784_v23  ;;  %4436 = vmatpush.bf16.msk.msra.mxu1 %vm6353_vm9, %v8787_v43 }
 0x3cf   : > { %4474 = vmatpush.bf16.msk.msrb.mxu0 %vm6459_vm3, %v8785_v57  ;;  %4501 = vmatpush.bf16.msk.msra.mxu3 %vm6459_vm3, %v8786_v9 }
 0x3d0   : > { %2204 = vmatmul.bf16.vlgmr.msrb.gmra.mxu3 %v4398_v51 }
 0x3d2   : > { %4439 = vmatpush.bf16.msk.msra.mxu1 %vm6292_vm2, %v8790_v55  ;;  %v1947_v55 = vpop.permute.xlu0 %1946 }
 0x3d3   : > { %2238 = vmatpush.bf16.msrb.mxu0 %v8788_v4  ;;  %4504 = vmatpush.bf16.msk.msra.mxu3 %vm6459_vm3, %v8789_v24 }
 0x3d6   : > { %4442 = vmatpush.bf16.msk.msra.mxu1 %vm6292_vm2, %v8792_v2 }
 0x3d7   : > { %2239 = vmatpush.bf16.msrb.mxu0 %v8791_v28 }
 0x3d9   : > { %2074 = vmatmul.bf16.gmra.mxu2 %v4290_v48  ;;  %2185 = vmatmul.bf16.vlgmr.msra.gmra.mxu1 %v4394_v6 }
 0x3da   : > { %4483 = vmatpush.bf16.msk.msrb.mxu1 %vm6431_vm15, %v8794_v62 }
 0x3db   : > { %4477 = vmatpush.bf16.msk.msrb.mxu0 %vm6401_vm11, %v8793_v41 }
 0x3dc   : > { %4385 = vmatmul.msk.bf16.vlgmr.msra.gmra.mxu0 %vm898_vm12, %v4282_v40 }
 0x3de   : > { %4486 = vmatpush.bf16.msk.msrb.mxu1 %vm6431_vm15, %v8796_v27 }
 0x3df   : > { %4480 = vmatpush.bf16.msk.msrb.mxu0 %vm6401_vm11, %v8795_v0 }
 0x3e0   : > { %2209 = vmatmul.bf16.gmra.mxu3 %v4410_v14 }
 0x3e2   : > { %4489 = vmatpush.bf16.msk.msrb.mxu1 %vm6401_vm11, %v8797_v50 }
 0x3e6   : > { %4492 = vmatpush.bf16.msk.msrb.mxu1 %vm6401_vm11, %v8798_v26 }
 0x3e9   : > { %2190 = vmatmul.bf16.gmra.mxu1 %v4406_v56  ;;  %4461 = vmatmul.msk.bf16.vlgmr.msra.gmra.mxu2 %vm898_vm12, %v4402_v52 }
 0x3ea   : > { %4495 = vmatpush.bf16.msk.msrb.mxu1 %vm6459_vm3, %v8799_v54 }
 0x3ec   : > { %4386 = vmatmul.msk.bf16.gmra.mxu0 %vm898_vm12, %v4294_v37 }
 0x3ee   : > { %4498 = vmatpush.bf16.msk.msrb.mxu1 %vm6459_vm3, %v8800_v12 }
 0x3f0   : > { %4505 = vmatmul.msk.bf16.vlgmr.msra.gmra.mxu3 %vm898_vm12, %v4402_v52 }
 0x3f2   : > { %2259 = vmatpush.bf16.msrb.mxu1 %v8801_v46 }
 0x3f6   : > { %2260 = vmatpush.bf16.msrb.mxu1 %v8802_v53 }
 0x3f9   : > { %4462 = vmatmul.msk.bf16.gmra.mxu2 %vm898_vm12, %v4414_v15  ;;  %2261 = vmatmul.bf16.vlgmr.msrb.gmra.mxu1 %v4398_v51 }
 0x3fc   : > { %2242 = vmatmul.bf16.vlgmr.msrb.gmra.mxu0 %v4394_v6 }
 0x400   : > { %4506 = vmatmul.msk.bf16.gmra.mxu3 %vm898_vm12, %v4414_v15 }
 0x409   : > { %2266 = vmatmul.bf16.gmra.mxu1 %v4410_v14 }
 0x40c   : > { %2247 = vmatmul.bf16.gmra.mxu0 %v4406_v56 }
 0x42c   : > { %v1994_v19 = vpop.f32.mrf.mxu2 }
 0x42d   : > { %v1995_v40 = vadd.f32 %v1994_v19, %v1932_v16 }
 0x431   : > { %v2051_v31 = vpop.f32.mrf.mxu3 }
 0x432   : > { %v2052_v61 = vadd.f32 %v2051_v31, %v1932_v16 }
 0x434   : > { %v1996_v42 = vpop.f32.mrf.mxu2 }
 0x435   : > { %v1997_v18 = vadd.f32 %v1996_v42, %v1937_v32 }
 0x436   : > { %v2032_v59 = vpop.f32.mrf.mxu1 }
 0x439   : > { %v2013_v11 = vpop.f32.mrf.mxu0  ;;  %v2053_v36 = vpop.f32.mrf.mxu3 }
 0x43a   : > { %v2014_v35 = vadd.f32 %v2013_v11, %v1995_v40  ;;  %v2054_v45 = vadd.f32 %v2053_v36, %v1937_v32 }
 0x43c   : > { %v2033_v1 = vadd.f32 %v2032_v59, %v2014_v35  ;;  %v1999_v34 = vpop.f32.mrf.mxu2  ;;  %v2124_v59 = vpop.permute.xlu1 %2123 }
 0x43d   : > { %v2000_v23 = vadd.f32 %v1999_v34, %v1942_v10 }
 0x43e   : > { %v7452_v21 = vmax.f32 %v2033_v1, 0.0  ;;  %v2034_v20 = vpop.f32.mrf.mxu1 }
 0x440   : > { %2839 = vst [vmem:[%s7456_s12] sm:$0xff] %v7452_v21 }
 0x441   : > { %v2015_v49 = vpop.f32.mrf.mxu0 }
 0x442   : > { %v2016_v30 = vadd.f32 %v2015_v49, %v1997_v18  ;;  %v2129_v49 = vpop.permute.xlu2 %2128 }
 0x443   : > { %v2056_v37 = vpop.f32.mrf.mxu3 }
 0x444   : > { %v2035_v48 = vadd.f32 %v2034_v20, %v2016_v30  ;;  %v2001_v60 = vpop.f32.mrf.mxu2  ;;  %v2057_v15 = vadd.f32 %v2056_v37, %v1942_v10 }
 0x445   : > { %v2002_v28 = vadd.f32 %v2001_v60, %v1947_v55 }
 0x446   : > { %v7460_v29 = vmax.f32 %v2035_v48, 0.0  ;;  %v2037_v51 = vpop.f32.mrf.mxu1 }
 0x448   : > { %2841 = vst [vmem:[%s7456_s12 + $0x10] sm:$0xff] %v7460_v29 }
 0x449   : > { %v2018_v57 = vpop.f32.mrf.mxu0 }
 0x44a   : > { %v2019_v9 = vadd.f32 %v2018_v57, %v2000_v23 }
 0x44b   : > { %v2058_v4 = vpop.f32.mrf.mxu3 }
 0x44c   : > { %v2038_v43 = vadd.f32 %v2037_v51, %v2019_v9  ;;  %v2070_v2 = vpop.f32.mrf.mxu2  ;;  %v2059_v36 = vadd.f32 %v2058_v4, %v1947_v55 }
 0x44d   : > { %v2071_v0 = vadd.f32 %v2070_v2, %v2052_v61 }
 0x44e   : > { %v7466_v24 = vmax.f32 %v2038_v43, 0.0  ;;  %v2039_v41 = vpop.f32.mrf.mxu1 }
 0x450   : > { %2843 = vst [vmem:[%s7456_s12 + $0x20] sm:$0xff] %v7466_v24 }
 0x451   : > { %v2020_v38 = vpop.f32.mrf.mxu0 }
 0x452   : > { %v2021_v22 = vadd.f32 %v2020_v38, %v2002_v28 }
 0x453   : > { %v2205_v6 = vpop.f32.mrf.mxu3 }
 0x454   : > { %v2040_v62 = vadd.f32 %v2039_v41, %v2021_v22  ;;  %v2072_v27 = vpop.f32.mrf.mxu2 }
 0x455   : > { %v2073_v56 = vadd.f32 %v2072_v27, %v2054_v45 }
 0x456   : > { %v7470_v3 = vmax.f32 %v2040_v62, 0.0  ;;  %v2186_v7 = vpop.f32.mrf.mxu1 }
 0x457   : > { %v2187_v32 = vadd.f32 %v2186_v7, %v2124_v59 }
 0x458   : > { %2845 = vst [vmem:[%s7456_s12 + $0x30] sm:$0xff] %v7470_v3 }
 0x459   : > { %v2089_v50 = vpop.f32.mrf.mxu0  ;;  %v2206_v23 = vadd.f32 %v2205_v6, %v2187_v32 }
 0x45a   : > { %v2090_v26 = vadd.f32 %v2089_v50, %v2071_v0  ;;  %v2134_v50 = vpop.permute.xlu0 %2133 }
 0x45b   : > { %v2207_v5 = vpop.f32.mrf.mxu3 }
 0x45c   : > { %v7476_v39 = vmax.f32 %v2090_v26, 0.0  ;;  %v2075_v52 = vpop.f32.mrf.mxu2 }
 0x45d   : > { %v2076_v31 = vadd.f32 %v2075_v52, %v2057_v15  ;;  %v2139_v52 = vpop.permute.xlu1 %2138 }
 0x45e   : > { %v7480_v54 = vpack.i.bf16 %v7476_v39, %v7452_v21  ;;  %2840 = vst [vmem:[%s7456_s12 + $0x8] sm:$0xff] %v7476_v39  ;;  %v2188_v53 = vpop.f32.mrf.mxu1 }
 0x45f   : > { %v2189_v48 = vadd.f32 %v2188_v53, %v2129_v49 }
 0x461   : > { %v2091_v12 = vpop.f32.mrf.mxu0  ;;  %v2208_v9 = vadd.f32 %v2207_v5, %v2189_v48 }
 0x462   : > { %v2092_v46 = vadd.f32 %v2091_v12, %v2073_v56 }
 0x463   : > { %v2210_v17 = vpop.f32.mrf.mxu3 }
 0x464   : > { %v7484_v13 = vmax.f32 %v2092_v46, 0.0  ;;  %v2077_v16 = vpop.f32.mrf.mxu2 }
 0x465   : > { %v2078_v30 = vadd.f32 %v2077_v16, %v2059_v36 }
 0x466   : > { %v7488_v19 = vpack.i.bf16 %v7484_v13, %v7460_v29  ;;  %2842 = vst [vmem:[%s7456_s12 + $0x18] sm:$0xff] %v7484_v13  ;;  %v2191_v35 = vpop.f32.mrf.mxu1 }
 0x467   : > { %v2192_v5 = vadd.f32 %v2191_v35, %v2134_v50 }
 0x469   : > { %v2094_v40 = vpop.f32.mrf.mxu0  ;;  %v2211_v16 = vadd.f32 %v2210_v17, %v2192_v5 }
 0x46a   : > { %v2095_v11 = vadd.f32 %v2094_v40, %v2076_v31 }
 0x46b   : > { %v2212_v34 = vpop.f32.mrf.mxu3 }
 0x46c   : > { %v7494_v1 = vmax.f32 %v2095_v11, 0.0  ;;  %v2224_v20 = vpop.f32.mrf.mxu2 }
 0x46d   : > { %v2225_v51 = vadd.f32 %v2224_v20, %v2206_v23 }
 0x46e   : > { %v7498_v18 = vpack.i.bf16 %v7494_v1, %v7466_v24  ;;  %2844 = vst [vmem:[%s7456_s12 + $0x28] sm:$0xff] %v7494_v1  ;;  %v2193_v10 = vpop.f32.mrf.mxu1 }
 0x46f   : > { %v2291_v62 = vmax.f32 %v2225_v51, 0.0  ;;  %v2194_v15 = vadd.f32 %v2193_v10, %v2139_v52 }
 0x471   : > { %v2096_v37 = vpop.f32.mrf.mxu0  ;;  %v2213_v11 = vadd.f32 %v2212_v34, %v2194_v15 }
 0x472   : > { %v2097_v60 = vadd.f32 %v2096_v37, %v2078_v30 }
 0x473   : > { %v2281_v4 = vpop.f32.mrf.mxu3 }
 0x474   : > { %v7502_v57 = vmax.f32 %v2097_v60, 0.0  ;;  %v2226_v55 = vpop.f32.mrf.mxu2 }
 0x475   : > { %v2227_v2 = vadd.f32 %v2226_v55, %v2208_v9 }
 0x476   : > { %v7506_v43 = vpack.i.bf16 %v7502_v57, %v7470_v3  ;;  %2846 = vst [vmem:[%s7456_s12 + $0x38] sm:$0xff] %v7502_v57  ;;  %v2262_v41 = vpop.f32.mrf.mxu1 }
 0x477   : > { %v7512_v6 = vmax.f32 %v2227_v2, 0.0 }
 0x479   : > { %v2243_v38 = vpop.f32.mrf.mxu0  ;;  %v7515_v0 = vpack.c.bf16 %v7512_v6, %v2291_v62 }
 0x47a   : > { %v2244_v22 = vadd.f32 %v2243_v38, %v2124_v59 }
 0x47b   : > { %v2283_v56 = vpop.f32.mrf.mxu3 }
 0x47c   : > { %v2263_v61 = vadd.f32 %v2262_v41, %v2244_v22  ;;  %v2229_v7 = vpop.f32.mrf.mxu2 }
 0x47d   : > { %v2230_v59 = vadd.f32 %v2229_v7, %v2211_v16 }
 0x47e   : > { %v2282_v27 = vadd.f32 %v2281_v4, %v2263_v61  ;;  %v2264_v46 = vpop.f32.mrf.mxu1 }
 0x47f   : > { %v7520_v48 = vmax.f32 %v2230_v59, 0.0 }
 0x480   : > { %v2292_v26 = vmax.f32 %v2282_v27, 0.0 }
 0x481   : > { %v2245_v45 = vpop.f32.mrf.mxu0  ;;  %v5543_v7 = vpack.i.bf16 %v7520_v48, %v7512_v6 }
 0x482   : > { %v2246_v12 = vadd.f32 %v2245_v45, %v2129_v49  ;;  %v5433_v53 = vpack.i.bf16 %v2292_v26, %v2291_v62  ;;  %v4507_v45 = vld [vmem:[%s8729_s2 + $0x80] sm:$0xff] }
 0x483   : > { %v2286_v20 = vpop.f32.mrf.mxu3 }
 0x484   : > { %v2265_v31 = vadd.f32 %v2264_v46, %v2246_v12  ;;  %5434 = vrot.lane.b32.xlu1 %v5433_v53, %s8803_s0  ;;  %5429 = vrot.lane.b32.xlu0 %v5433_v53, %s8768_s29  ;;  %v2231_v35 = vpop.f32.mrf.mxu2 }
 0x485   : > { %5424 = vrot.lane.b32.xlu2 %v5433_v53, %s8767_s25  ;;  %v2232_v32 = vadd.f32 %v2231_v35, %v2213_v11 }
 0x486   : > { %v2284_v40 = vadd.f32 %v2283_v56, %v2265_v31  ;;  %v2267_v49 = vpop.f32.mrf.mxu1  ;;  %v4509_v56 = vld [vmem:[%s8729_s2 + $0x90] sm:$0xff] }
 0x487   : > { %v7522_v37 = vmax.f32 %v2232_v32, 0.0 }
 0x488   : > { %v2294_v36 = vmax.f32 %v2284_v40, 0.0 }
 0x489   : > { %v2248_v30 = vpop.f32.mrf.mxu0 }
 0x48a   : > { %v7526_v17 = vpack.c.bf16 %v2294_v36, %v2292_v26  ;;  %v2249_v60 = vadd.f32 %v2248_v30, %v2134_v50  ;;  %v5463_v4 = vpack.i.bf16 %v2294_v36, %v7512_v6  ;;  %v4510_v6 = vld [vmem:[%s8729_s2 + $0x98] sm:$0xff] }
 0x48b   : > { %v2288_v55 = vpop.f32.mrf.mxu3 }
 0x48c   : > { %5449 = vrot.lane.b32.xlu1 %v5433_v53, %s8770_s30  ;;  %5444 = vrot.lane.b32.xlu0 %v5433_v53, %s8766_s15  ;;  %v2268_v23 = vadd.f32 %v2267_v49, %v2249_v60 }
 0x48d   : > { %5439 = vrot.lane.b32.xlu2 %v5433_v53, %s8804_s14 }
 0x48e   : > { %v2269_v51 = vpop.f32.mrf.mxu1  ;;  %v2287_v38 = vadd.f32 %v2286_v20, %v2268_v23 }
 0x490   : > { %v7537_v62 = vmax.f32 %v2287_v38, 0.0 }
 0x491   : > { %v2250_v10 = vpop.f32.mrf.mxu0 }
 0x492   : > { %v2251_v9 = vadd.f32 %v2250_v10, %v2139_v52  ;;  %v5488_v27 = vpack.i.bf16 %v7537_v62, %v7520_v48  ;;  %v5553_v26 = vpack.i.bf16 %v7522_v37, %v7537_v62  ;;  %v4508_v52 = vld [vmem:[%s8729_s2 + $0x88] sm:$0xff] }
 0x494   : > { %v2270_v2 = vadd.f32 %v2269_v51, %v2251_v9  ;;  %5464 = vrot.lane.b32.xlu1 %v5463_v4, %s8768_s29  ;;  %5459 = vrot.lane.b32.xlu0 %v5463_v4, %s8767_s25 }
 0x495   : > { %5454 = vrot.lane.b32.xlu2 %v5433_v53, %s8769_s13 }
 0x496   : > { %v2289_v22 = vadd.f32 %v2288_v55, %v2270_v2 }
 0x498   : > { %v7535_v41 = vmax.f32 %v2289_v22, 0.0 }
 0x49a   : > { %v5528_v50 = vpack.i.bf16 %v7535_v41, %v7522_v37  ;;  %v5558_v5 = vpack.i.bf16 %v2294_v36, %v7535_v41 }
 0x49c   : > { %5479 = vrot.lane.b32.xlu1 %v5463_v4, %s8766_s15  ;;  %5474 = vrot.lane.b32.xlu0 %v5463_v4, %s8804_s14 }
 0x49d   : > { %5469 = vrot.lane.b32.xlu2 %v5463_v4, %s8803_s0 }
 0x4a4   : > { %5489 = vrot.lane.b32.xlu1 %v5488_v27, %s8767_s25  ;;  %5499 = vrot.lane.b32.xlu0 %v5488_v27, %s8803_s0 }
 0x4a5   : > { %5484 = vrot.lane.b32.xlu2 %v5463_v4, %s8770_s30 }
 0x4ac   : > { %5504 = vrot.lane.b32.xlu1 %v5488_v27, %s8804_s14  ;;  %5514 = vrot.lane.b32.xlu0 %v5488_v27, %s8770_s30 }
 0x4ad   : > { %5494 = vrot.lane.b32.xlu2 %v5488_v27, %s8768_s29 }
 0x4b4   : > { %5529 = vrot.lane.b32.xlu1 %v5528_v50, %s8803_s0  ;;  %5524 = vrot.lane.b32.xlu0 %v5528_v50, %s8768_s29 }
 0x4b5   : > { %5509 = vrot.lane.b32.xlu2 %v5488_v27, %s8766_s15 }
 0x4bc   : > { %5549 = vrot.lane.b32.xlu1 %v5528_v50, %s8770_s30  ;;  %5539 = vrot.lane.b32.xlu0 %v5528_v50, %s8766_s15 }
 0x4bd   : > { %5519 = vrot.lane.b32.xlu2 %v5528_v50, %s8767_s25 }
 0x4c4   : > { %5554 = vrot.lane.b32.xlu1 %v5553_v26, %s8769_s13  ;;  %5544 = vrot.lane.b32.xlu0 %v5543_v7, %s8769_s13 }
 0x4c5   : > { %5534 = vrot.lane.b32.xlu2 %v5528_v50, %s8804_s14 }
 0x4cc   : > { %5569 = vrot.lane.b32.xlu1 %v5463_v4, %s8734_s22  ;;  %5564 = vrot.lane.b32.xlu0 %v5433_v53, %s8734_s22 }
 0x4cd   : > { %5559 = vrot.lane.b32.xlu2 %v5558_v5, %s8769_s13 }
 0x4d4   : > { %2663 = vperm.xlu1 %5102, %v4507_v45   ;;  %5579 = vrot.lane.b32.xlu0 %v5528_v50, %s8734_s22 }
 0x4d5   : > { %5574 = vrot.lane.b32.xlu2 %v5488_v27, %s8734_s22 }
 0x4dc   : > { %2678 = vperm.xlu1 %5102, %v4510_v6   ;;  %2673 = vperm.xlu0 %5101, %v4509_v56  }
 0x4dd   : > { %2668 = vperm.xlu2 %5100, %v4508_v52  }
 0x4df   : > { %v7585_v12 = vpop.permute.xlu2 %5424 }
 0x4e4   : > { %5594 = vrot.lane.b32.xlu1 %v7498_v18, %s8767_s25  ;;  %5589 = vrot.lane.b32.xlu0 %v7488_v19, %s8767_s25 }
 0x4e5   : > { %5584 = vrot.lane.b32.xlu2 %v7480_v54, %s8767_s25 }
 0x4e7   : > { %v7593_v46 = vpop.permute.xlu2 %5439 }
 0x4e8   : > { %v5441_v25 = vunpack.i.l.bf16 %v7593_v46 }
 0x4ec   : > { %5609 = vrot.lane.b32.xlu1 %v7488_v19, %s8768_s29  ;;  %5604 = vrot.lane.b32.xlu0 %v7480_v54, %s8768_s29 }
 0x4ed   : > { %5599 = vrot.lane.b32.xlu2 %v7506_v43, %s8767_s25 }
 0x4ef   : > { %v7601_v53 = vpop.permute.xlu2 %5454 }
 0x4f4   : > { %5624 = vrot.lane.b32.xlu1 %v7480_v54, %s8803_s0  ;;  %5619 = vrot.lane.b32.xlu0 %v7506_v43, %s8768_s29 }
 0x4f5   : > { %5614 = vrot.lane.b32.xlu2 %v7498_v18, %s8768_s29 }
 0x4f6   : > { %v7609_v15 = vpop.permute.xlu1 %5434  ;;  %v7611_v31 = vpop.permute.xlu0 %5429 }
 0x4f7   : > { %v7613_v16 = vpop.permute.xlu2 %5469 }
 0x4fc   : > { %5639 = vrot.lane.b32.xlu1 %v7506_v43, %s8803_s0  ;;  %5634 = vrot.lane.b32.xlu0 %v7498_v18, %s8803_s0 }
 0x4fd   : > { %5629 = vrot.lane.b32.xlu2 %v7488_v19, %s8803_s0 }
 0x4fe   : > { %v5450_v40 = vpop.permute.xlu1 %5449  ;;  %v7621_v11 = vpop.permute.xlu0 %5444 }
 0x4ff   : > { %v5452_v59 = vunpack.i.h.bf16 %v5450_v40  ;;  %v5451_v36 = vunpack.i.l.bf16 %v5450_v40  ;;  %v5485_v35 = vpop.permute.xlu2 %5484 }
 0x500   : > { %v5487_v32 = vunpack.i.h.bf16 %v5485_v35  ;;  %v5486_v30 = vunpack.i.l.bf16 %v5485_v35 }
 0x501   : > { %v7624_v20 = vsel %vm713_vm8, %v5452_v59, 0.0  ;;  %v7627_v49 = vsel %vm713_vm8, %v5451_v36, %v5452_v59 }
 0x502   : > { %v7630_v60 = vsel %vm713_vm8, %v5487_v32, 0.0  ;;  %v7633_v10 = vsel %vm713_vm8, %v5486_v30, %v5487_v32  ;;  %v5442_v30 = vunpack.i.h.bf16 %v7593_v46  ;;  %v5437_v46 = vunpack.i.h.bf16 %v7609_v15 }
 0x503   : > { %v4611_v23 = vpack.c.bf16 %v7630_v60, %v7624_v20  ;;  %v4567_v9 = vpack.c.bf16 %v7633_v10, %v7627_v49 }
 0x504   : > { %5654 = vrot.lane.b32.xlu1 %v7498_v18, %s8804_s14  ;;  %5649 = vrot.lane.b32.xlu0 %v7488_v19, %s8804_s14 }
 0x505   : > { %5644 = vrot.lane.b32.xlu2 %v7480_v54, %s8804_s14 }
 0x506   : > { %v7645_v51 = vpop.permute.xlu1 %5464  ;;  %v7647_v4 = vpop.permute.xlu0 %5459 }
 0x507   : > { %v7649_v55 = vpop.permute.xlu2 %5494 }
 0x50c   : > { %5669 = vrot.lane.b32.xlu1 %v7488_v19, %s8766_s15  ;;  %5664 = vrot.lane.b32.xlu0 %v7480_v54, %s8766_s15 }
 0x50d   : > { %5659 = vrot.lane.b32.xlu2 %v7506_v43, %s8804_s14 }
 0x50e   : > { %v7657_v2 = vpop.permute.xlu1 %5479  ;;  %v5475_v38 = vpop.permute.xlu0 %5474 }
 0x50f   : > { %v7659_v22 = vpop.permute.xlu2 %5509  ;;  %v5477_v52 = vunpack.i.h.bf16 %v5475_v38  ;;  %v5476_v40 = vunpack.i.l.bf16 %v5475_v38 }
 0x511   : > { %v2462_v38 = vsel %vm631_vm1, 0.0, %v5476_v40 }
 0x514   : > { %5684 = vrot.lane.b32.xlu1 %v7480_v54, %s8770_s30  ;;  %5679 = vrot.lane.b32.xlu0 %v7506_v43, %s8766_s15 }
 0x515   : > { %5674 = vrot.lane.b32.xlu2 %v7498_v18, %s8766_s15 }
 0x516   : > { %v7667_v27 = vpop.permute.xlu1 %5489  ;;  %v5500_v50 = vpop.permute.xlu0 %5499 }
 0x517   : > { %v7669_v26 = vpop.permute.xlu2 %5519 }
 0x51c   : > { %5699 = vrot.lane.b32.xlu1 %v7506_v43, %s8770_s30  ;;  %5694 = vrot.lane.b32.xlu0 %v7498_v18, %s8770_s30 }
 0x51d   : > { %5689 = vrot.lane.b32.xlu2 %v7488_v19, %s8770_s30 }
 0x51e   : > { %v5505_v7 = vpop.permute.xlu1 %5504  ;;  %v7677_v5 = vpop.permute.xlu0 %5514 }
 0x51f   : > { %v5507_v45 = vunpack.i.h.bf16 %v5505_v7  ;;  %v5506_v6 = vunpack.i.l.bf16 %v5505_v7  ;;  %v5535_v56 = vpop.permute.xlu2 %5534  ;;  %v2450_v7 = vsel %vm631_vm1, %v5476_v40, %v5477_v52 }
 0x520   : > { %v5537_v59 = vunpack.i.h.bf16 %v5535_v56  ;;  %v5536_v36 = vunpack.i.l.bf16 %v5535_v56  ;;  %v5436_v56 = vunpack.i.l.bf16 %v7609_v15 }
 0x521   : > { %v2451_v35 = vsel %vm631_vm1, %v5506_v6, %v5507_v45  ;;  %v2463_v32 = vsel %vm631_vm1, 0.0, %v5506_v6  ;;  %v5502_v45 = vunpack.i.h.bf16 %v5500_v50  ;;  %v5501_v6 = vunpack.i.l.bf16 %v5500_v50 }
 0x522   : > { %v2452_v42 = vsel %vm631_vm1, %v5536_v36, %v5537_v59  ;;  %v2464_v14 = vsel %vm631_vm1, 0.0, %v5536_v36 }
 0x523   : > { %v4536_v28 = vpack.c.bf16 %v2464_v14, %v2463_v32  ;;  %v4584_v61 = vpack.c.bf16 %v2452_v42, %v2451_v35  ;;  %v2449_v14 = vsel %vm631_vm1, %v5441_v25, %v5442_v30  ;;  %v2461_v42 = vsel %vm631_vm1, 0.0, %v5441_v25 }
 0x524   : > { %5714 = vrot.lane.b32.xlu1 %v7498_v18, %s8769_s13  ;;  %5709 = vrot.lane.b32.xlu0 %v7488_v19, %s8769_s13  ;;  %v4539_v50 = vpack.c.bf16 %v2462_v38, %v2461_v42  ;;  %v4587_v59 = vpack.c.bf16 %v2450_v7, %v2449_v14  ;;  %v5471_v32 = vunpack.i.l.bf16 %v7613_v16  ;;  %v2411_v25 = vsel %vm586_vm4, %v5501_v6, %v5502_v45 }
 0x525   : > { %4537 = vmatpush.bf16.msk.msrb.mxu2 %vm6292_vm2, %v4536_v28  ;;  %4585 = vmatpush.bf16.msk.msrb.mxu3 %vm6401_vm11, %v4584_v61  ;;  %v5472_v61 = vunpack.i.h.bf16 %v7613_v16  ;;  %v2423_v30 = vsel %vm586_vm4, 0.0, %v5501_v6  ;;  %v2409_v14 = vsel %vm586_vm4, %v5436_v56, %v5437_v46  ;;  %v2421_v16 = vsel %vm586_vm4, 0.0, %v5436_v56 }
 0x526   : > { %5704 = vrot.lane.b32.xlu2 %v7480_v54, %s8769_s13  ;;  %v5530_v52 = vpop.permute.xlu1 %5529  ;;  %v5525_v40 = vpop.permute.xlu0 %5524  ;;  %v2422_v6 = vsel %vm586_vm4, 0.0, %v5471_v32  ;;  %v5496_v46 = vunpack.i.l.bf16 %v7649_v55 }
 0x527   : > { %v5532_v36 = vunpack.i.h.bf16 %v5530_v52  ;;  %v5531_v28 = vunpack.i.l.bf16 %v5530_v52  ;;  %v7701_v35 = vpop.permute.xlu2 %5559  ;;  %v2410_v45 = vsel %vm586_vm4, %v5471_v32, %v5472_v61  ;;  %v5527_v42 = vunpack.i.h.bf16 %v5525_v40 }
 0x528   : > { %v5526_v52 = vunpack.i.l.bf16 %v5525_v40  ;;  %v5432_v61 = vunpack.i.h.bf16 %v7611_v31 }
 0x529   : > { %v2412_v15 = vsel %vm586_vm4, %v5531_v28, %v5532_v36  ;;  %v2424_v34 = vsel %vm586_vm4, 0.0, %v5531_v28  ;;  %4540 = vmatpush.bf16.msk.msrb.mxu2 %vm6292_vm2, %v4539_v50  ;;  %4588 = vmatpush.bf16.msk.msrb.mxu3 %vm6401_vm11, %v4587_v59  ;;  %v4593_v50 = vpack.c.bf16 %v2410_v45, %v2409_v14  ;;  %v5466_v59 = vunpack.i.l.bf16 %v7645_v51 }
 0x52a   : > { %v4542_v7 = vpack.c.bf16 %v2424_v34, %v2423_v30  ;;  %v4590_v38 = vpack.c.bf16 %v2412_v15, %v2411_v25  ;;  %v5497_v34 = vunpack.i.h.bf16 %v7649_v55  ;;  %v2380_v28 = vsel %vm553_vm6, %v5526_v52, %v5527_v42 }
 0x52b   : > { %v5431_v55 = vunpack.i.l.bf16 %v7611_v31  ;;  %v5427_v25 = vunpack.i.h.bf16 %v7585_v12  ;;  %v4550_v30 = vpack.c.bf16 %v5526_v52, %v5496_v46  ;;  %v5522_v31 = vunpack.i.h.bf16 %v7669_v26 }
 0x52c   : > { %5729 = vrot.lane.b32.xlu1 %v7488_v19, %s8734_s22  ;;  %5724 = vrot.lane.b32.xlu0 %v7480_v54, %s8734_s22  ;;  %v4545_v19 = vpack.c.bf16 %v2422_v6, %v2421_v16  ;;  %v5467_v54 = vunpack.i.h.bf16 %v7645_v51  ;;  %v2379_v32 = vsel %vm553_vm6, %v5496_v46, %v5497_v34  ;;  %v5521_v14 = vunpack.i.l.bf16 %v7669_v26 }
 0x52d   : > { %4543 = vmatpush.bf16.msk.msrb.mxu2 %vm6320_vm5, %v4542_v7  ;;  %4591 = vmatpush.bf16.msk.msrb.mxu3 %vm6459_vm3, %v4590_v38  ;;  %v2632_v51 = vpack.c.bf16 %v2380_v28, %v2379_v32  ;;  %v5492_v7 = vunpack.i.h.bf16 %v7667_v27  ;;  %v5491_v38 = vunpack.i.l.bf16 %v7667_v27  ;;  %v5426_v16 = vunpack.i.l.bf16 %v7585_v12 }
 0x52e   : > { %5719 = vrot.lane.b32.xlu2 %v7506_v43, %s8769_s13  ;;  %v7729_v56 = vpop.permute.xlu1 %5549  ;;  %v7731_v40 = vpop.permute.xlu0 %5539  ;;  %v2378_v15 = vsel %vm553_vm6, %v5466_v59, %v5467_v54  ;;  %v5457_v45 = vunpack.i.h.bf16 %v7601_v53  ;;  %v5462_v6 = vunpack.i.h.bf16 %v7647_v4  ;;  %v2377_v42 = vsel %vm553_vm6, %v5431_v55, %v5432_v61 }
 0x52f   : > { %v7735_v36 = vpop.permute.xlu2 %5574  ;;  %v4555_v27 = vpack.c.bf16 %v5466_v59, %v5431_v55  ;;  %v5461_v52 = vunpack.i.l.bf16 %v7647_v4  ;;  %v5561_v26 = vunpack.i.l.bf16 %v7701_v35  ;;  %v2630_v34 = vpack.c.bf16 %v2378_v15, %v2377_v42 }
 0x530   : > { %v2339_v32 = vsel %vm508_vm14, %v5491_v38, %v5492_v7  ;;  %v2351_v59 = vsel %vm508_vm14, 0.0, %v5491_v38  ;;  %v2340_v4 = vsel %vm508_vm14, %v5521_v14, %v5522_v31  ;;  %v2352_v61 = vsel %vm508_vm14, 0.0, %v5521_v14 }
 0x531   : > { %4546 = vmatpush.bf16.msk.msrb.mxu2 %vm6320_vm5, %v4545_v19  ;;  %4594 = vmatpush.bf16.msk.msrb.mxu3 %vm6459_vm3, %v4593_v50  ;;  %v5456_v55 = vunpack.i.l.bf16 %v7601_v53  ;;  %v4558_v7 = vpack.c.bf16 %v2352_v61, %v2351_v59  ;;  %v4596_v42 = vpack.c.bf16 %v2340_v4, %v2339_v32  ;;  %v2338_v31 = vsel %vm508_vm14, %v5461_v52, %v5462_v6 }
 0x532   : > { %v2350_v14 = vsel %vm508_vm14, 0.0, %v5461_v52  ;;  %v5552_v53 = vunpack.i.h.bf16 %v7729_v56  ;;  %v2349_v6 = vsel %vm508_vm14, 0.0, %v5426_v16  ;;  %v5517_v52 = vunpack.i.h.bf16 %v7677_v5 }
 0x534   : > { %5734 = vrot.lane.b32.xlu1 %v7498_v18, %s8734_s22 }
 0x535   : > { %4551 = vmatpush.bf16.msk.msrb.mxu2 %vm6353_vm9, %v4550_v30  ;;  %2778 = vmatpush.bf16.msrb.mxu3 %v2632_v51 }
 0x536   : > { %5739 = vrot.lane.b32.xlu2 %v7506_v43, %s8734_s22  ;;  %v5555_v18 = vpop.permute.xlu1 %5554  ;;  %v5545_v12 = vpop.permute.xlu0 %5544  ;;  %v5562_v43 = vunpack.i.h.bf16 %v7701_v35  ;;  %v5551_v35 = vunpack.i.l.bf16 %v7729_v56 }
 0x537   : > { %v5557_v46 = vunpack.i.h.bf16 %v5555_v18  ;;  %v5556_v19 = vunpack.i.l.bf16 %v5555_v18  ;;  %v5547_v50 = vunpack.i.h.bf16 %v5545_v12  ;;  %v5546_v54 = vunpack.i.l.bf16 %v5545_v12  ;;  %v7763_v28 = vpop.permute.xlu2 %2668  ;;  %v4513_v12 = vld [vmem:[#allocation2 + $0xc0] sm:$0xf] }
 0x538   : > { %v2337_v18 = vsel %vm508_vm14, %v5426_v16, %v5427_v25  ;;  %v2532_v4 = vsel %vm713_vm8, %v5551_v35, %v5552_v53 }
 0x539   : > { %v2572_v30 = vsel %vm754_vm13, %v5557_v46, %v5561_v26  ;;  %v2571_v51 = vsel %vm754_vm13, %v5547_v50, %v5556_v19  ;;  %4556 = vmatpush.bf16.msk.msrb.mxu2 %vm6353_vm9, %v4555_v27  ;;  %2779 = vmatpush.bf16.msrb.mxu3 %v2630_v34  ;;  %v2570_v38 = vsel %vm754_vm13, %v5546_v54, %v5562_v43  ;;  %v4857_v34 = vld [vmem:[#allocation2 + $0xc8] sm:$0xf0]  ;;  %v5516_v46 = vunpack.i.l.bf16 %v7677_v5 }
 0x53a   : > { %v2655_v15 = vpack.c.bf16 %v2572_v30, %v2571_v51  ;;  %v2569_v27 = vsel %vm754_vm13, %v5456_v55, %v5457_v45  ;;  %v4561_v54 = vpack.c.bf16 %v2350_v14, %v2349_v6  ;;  %v4599_v32 = vpack.c.bf16 %v2338_v31, %v2337_v18 }
 0x53b   : > { %v2653_v25 = vpack.c.bf16 %v2570_v38, %v2569_v27  ;;  %v4602_v61 = vpack.c.bf16 %v5561_v26, %v5556_v19  ;;  %v4514_v55 = vor.u32 %v4857_v34, %v4513_v12  ;;  %v2531_v5 = vsel %vm713_vm8, %v5516_v46, %v5517_v52 }
 0x53c   : > { %2736 = vmatpush.bf16.msra.mxu0 %v2655_v15  ;;  %v4564_v16 = vpack.c.bf16 %v2532_v4, %v2531_v5  ;;  %v4605_v30 = vpack.c.bf16 %v5562_v43, %v5457_v45  ;;  %v5542_v51 = vunpack.i.h.bf16 %v7731_v40  ;;  %v5541_v15 = vunpack.i.l.bf16 %v7731_v40  ;;  %v4525_v5 = vld [vmem:[#allocation2 + $0xd8] sm:$0xf] }
 0x53d   : > { %4559 = vmatpush.bf16.msk.msrb.mxu2 %vm6292_vm2, %v4558_v7  ;;  %4597 = vmatpush.bf16.msk.msrb.mxu3 %vm6401_vm11, %v4596_v42  ;;  %v5512_v26 = vunpack.i.h.bf16 %v7659_v22  ;;  %v2544_v19 = vsel %vm713_vm8, %v5552_v53, 0.0  ;;  %v5577_v7 = vunpack.i.h.bf16 %v7735_v36  ;;  %v5576_v42 = vunpack.i.l.bf16 %v7735_v36  ;;  %v4533_v36 = vld [vmem:[#allocation2 + $0xe0] sm:$0xf] }
 0x53e   : > { %v7789_v56 = vpop.permute.xlu1 %5569  ;;  %v7791_v50 = vpop.permute.xlu0 %5564  ;;  %v5511_v38 = vunpack.i.l.bf16 %v7659_v22  ;;  %v2543_v45 = vsel %vm713_vm8, %v5517_v52, 0.0  ;;  %v5482_v22 = vunpack.i.h.bf16 %v7657_v2  ;;  %v5481_v34 = vunpack.i.l.bf16 %v7657_v2 }
 0x53f   : > { %v7793_v59 = vpop.permute.xlu2 %5584  ;;  %v5572_v43 = vunpack.i.h.bf16 %v7789_v56  ;;  %v5571_v40 = vunpack.i.l.bf16 %v7789_v56  ;;  %v5567_v53 = vunpack.i.h.bf16 %v7791_v50  ;;  %v5566_v35 = vunpack.i.l.bf16 %v7791_v50 }
 0x540   : > { %2737 = vmatpush.bf16.msra.mxu0 %v2653_v25  ;;  %v4608_v6 = vpack.c.bf16 %v2544_v19, %v2543_v45  ;;  %v2492_v52 = vsel %vm672_vm10, %v5541_v15, %v5542_v51  ;;  %v2603_v46 = vsel %vm787_vm7, %v5576_v42, %v5577_v7  ;;  %v5447_v50 = vunpack.i.h.bf16 %v7621_v11 }
 0x541   : > { %4562 = vmatpush.bf16.msk.msrb.mxu2 %vm6292_vm2, %v4561_v54  ;;  %4600 = vmatpush.bf16.msk.msrb.mxu3 %vm6401_vm11, %v4599_v32  ;;  %v5446_v54 = vunpack.i.l.bf16 %v7621_v11  ;;  %v2491_v2 = vsel %vm672_vm10, %v5511_v38, %v5512_v26  ;;  %v2601_v49 = vsel %vm787_vm7, %v5566_v35, %v5567_v53  ;;  %v2490_v10 = vsel %vm672_vm10, %v5481_v34, %v5482_v22  ;;  %v4858_v11 = vld [vmem:[#allocation2 + $0xd0] sm:$0xf0] }
 0x542   : > { %v4570_v4 = vpack.c.bf16 %v2492_v52, %v2491_v2  ;;  %v2502_v20 = vsel %vm672_vm10, %v5482_v22, 0.0  ;;  %v2501_v60 = vsel %vm672_vm10, %v5447_v50, 0.0  ;;  %v4515_v22 = vld [vmem:[#allocation2 + $0xcc] sm:$0xf0] }
 0x544   : > { %2725 = vmatmul.bf16.vlgmr.msrb.gmra.mxu2 %v4514_v55  ;;  %2782 = vmatmul.bf16.vlgmr.msrb.gmra.mxu3 %v4514_v55  ;;  %v2504_v55 = vsel %vm672_vm10, %v5542_v51, 0.0  ;;  %v2503_v51 = vsel %vm672_vm10, %v5512_v26, 0.0  ;;  %v8805_v26 = vpack.c.bf16 %v7522_v37, %v7520_v48  ;;  %v2614_v37 = vsel %vm787_vm7, %v5572_v43, 0.0 }
 0x545   : > { %4603 = vmatpush.bf16.msk.msra.mxu2 %vm6431_vm15, %v4602_v61  ;;  %4565 = vmatpush.bf16.msk.msra.mxu0 %vm6292_vm2, %v4564_v16  ;;  %v2602_v61 = vsel %vm787_vm7, %v5571_v40, %v5572_v43  ;;  %v4860_v16 = vld [vmem:[#allocation2 + $0xe0] sm:$0xf0] }
 0x546   : > { %v7817_v31 = vpop.permute.xlu1 %2663  ;;  %v5580_v14 = vpop.permute.xlu0 %5579  ;;  %v4579_v15 = vpack.c.bf16 %v2602_v61, %v2601_v49  ;;  %v4526_v35 = vor.u32 %v4860_v16, %v4525_v5 }
 0x547   : > { %v5582_v18 = vunpack.i.h.bf16 %v5580_v14  ;;  %v5581_v27 = vunpack.i.l.bf16 %v5580_v14  ;;  %v7821_v12 = vpop.permute.xlu2 %5599  ;;  %v4614_v14 = vpack.c.bf16 %v2504_v55, %v2503_v51 }
 0x549   : > { %4606 = vmatpush.bf16.msk.msra.mxu2 %vm6431_vm15, %v4605_v30  ;;  %v2604_v25 = vsel %vm787_vm7, %v5581_v27, %v5582_v18  ;;  %4568 = vmatpush.bf16.msk.msra.mxu0 %vm6292_vm2, %v4567_v9  ;;  %v4521_v9 = vld [vmem:[#allocation2 + $0xc8] sm:$0xf]  ;;  %v2489_v30 = vsel %vm672_vm10, %v5446_v54, %v5447_v50  ;;  %v4856_v27 = vld [vmem:[#allocation2 + $0xc4] sm:$0xf]  ;;  %v2616_v34 = vsel %vm787_vm7, %v5582_v18, 0.0  ;;  %v2613_v18 = vsel %vm787_vm7, %v5567_v53, 0.0 }
 0x54a   : > { %v4576_v32 = vpack.c.bf16 %v2604_v25, %v2603_v46  ;;  %v4573_v38 = vpack.c.bf16 %v2490_v10, %v2489_v30  ;;  %v7863_v40 = vor.u32 %v4858_v11, %v4521_v9  ;;  %v2615_v25 = vsel %vm787_vm7, %v5577_v7, 0.0  ;;  %v4861_v7 = vld [vmem:[#allocation2 + $0xe8] sm:$0xf0] }
 0x54b   : > { %v4518_v50 = vor.u32 %v4856_v27, %v4515_v22  ;;  %v4620_v48 = vpack.c.bf16 %v2616_v34, %v2615_v25  ;;  %v8806_v54 = vpack.c.bf16 %v7535_v41, %v7537_v62  ;;  %v4623_v2 = vpack.c.bf16 %v2614_v37, %v2613_v18  ;;  %v4859_v41 = vld [vmem:[#allocation2 + $0xdc] sm:$0xf]  ;;  %v4527_v62 = vld [vmem:[#allocation2 + $0xe4] sm:$0xf0] }
 0x54c   : > { %4577 = vmatpush.bf16.msk.msra.mxu1 %vm6320_vm5, %v4576_v32  ;;  %v7907_v53 = vor.u32 %v4861_v7, %v4533_v36 }
 0x54d   : > { %4609 = vmatpush.bf16.msk.msra.mxu2 %vm6401_vm11, %v4608_v6  ;;  %4571 = vmatpush.bf16.msk.msra.mxu0 %vm6320_vm5, %v4570_v4 }
 0x54e   : > { %v7856_v19 = vpop.permute.xlu1 %2678  ;;  %v7858_v42 = vpop.permute.xlu0 %2673 }
 0x54f   : > { %v7861_v45 = vpop.permute.xlu2 %5614 }
 0x550   : > { %4580 = vmatpush.bf16.msk.msra.mxu1 %vm6320_vm5, %v4579_v15 }
 0x551   : > { %4612 = vmatpush.bf16.msk.msra.mxu2 %vm6401_vm11, %v4611_v23  ;;  %4574 = vmatpush.bf16.msk.msra.mxu0 %vm6320_vm5, %v4573_v38  ;;  %v4617_v23 = vpack.c.bf16 %v2502_v20, %v2501_v60 }
 0x553   : > { %4581 = vmatmul.msk.bf16.vlgmr.msra.gmra.mxu1 %vm898_vm12, %v7863_v40 }
 0x554   : > { %2730 = vmatmul.bf16.gmra.mxu2 %v4526_v35  ;;  %2787 = vmatmul.bf16.gmra.mxu3 %v4526_v35 }
 0x555   : > { %4615 = vmatpush.bf16.msk.msra.mxu2 %vm6459_vm3, %v4614_v14  ;;  %2742 = vmatpush.bf16.msra.mxu0 %v8805_v26 }
 0x556   : > { %v7881_v6 = vpop.permute.xlu1 %5594  ;;  %v7883_v52 = vpop.permute.xlu0 %5589 }
 0x557   : > { %v7885_v46 = vpop.permute.xlu2 %5629 }
 0x559   : > { %4618 = vmatpush.bf16.msk.msra.mxu2 %vm6459_vm3, %v4617_v23  ;;  %2743 = vmatpush.bf16.msra.mxu0 %v7515_v0 }
 0x55c   : > { %2744 = vmatmul.bf16.vlgmr.msra.gmra.mxu0 %v4518_v50 }
 0x55d   : > { %2799 = vmatpush.bf16.msra.mxu2 %v8806_v54  ;;  %4621 = vmatpush.bf16.msk.msrb.mxu0 %vm6459_vm3, %v4620_v48 }
 0x55e   : > { %v7901_v0 = vpop.permute.xlu1 %5609  ;;  %v7903_v56 = vpop.permute.xlu0 %5604 }
 0x55f   : > { %v5645_v43 = vpop.permute.xlu2 %5644 }
 0x560   : > { %v5646_v51 = vunpack.i.l.bf16 %v5645_v43  ;;  %v5647_v26 = vunpack.i.h.bf16 %v5645_v43 }
 0x561   : > { %2800 = vmatpush.bf16.msra.mxu2 %v7526_v17  ;;  %4624 = vmatpush.bf16.msk.msrb.mxu0 %vm6459_vm3, %v4623_v2  ;;  %v4530_v17 = vor.u32 %v4859_v41, %v4527_v62 }
 0x562   : > { %v3006_v54 = vsel %vm631_vm1, 0.0, %v5646_v51  ;;  %v2994_v7 = vsel %vm631_vm1, %v5646_v51, %v5647_v26 }
 0x563   : > { %4582 = vmatmul.msk.bf16.gmra.mxu1 %vm898_vm12, %v7907_v53 }
 0x564   : > { %2801 = vmatmul.bf16.vlgmr.msra.gmra.mxu2 %v4518_v50 }
 0x566   : > { %v5625_v32 = vpop.permute.xlu1 %5624  ;;  %v7911_v4 = vpop.permute.xlu0 %5619 }
 0x567   : > { %v5660_v61 = vpop.permute.xlu2 %5659  ;;  %v5626_v62 = vunpack.i.l.bf16 %v5625_v32  ;;  %v5621_v51 = vunpack.i.l.bf16 %v7911_v4 }
 0x568   : > { %v5662_v11 = vunpack.i.h.bf16 %v5660_v61  ;;  %v5661_v55 = vunpack.i.l.bf16 %v5660_v61 }
 0x56a   : > { %v2997_v35 = vsel %vm631_vm1, %v5661_v55, %v5662_v11  ;;  %v3009_v20 = vsel %vm631_vm1, 0.0, %v5661_v55  ;;  %v5631_v55 = vunpack.i.l.bf16 %v7885_v46 }
 0x56c   : > { %2749 = vmatmul.bf16.gmra.mxu0 %v4530_v17 }
 0x56e   : > { %v5640_v49 = vpop.permute.xlu1 %5639  ;;  %v5635_v10 = vpop.permute.xlu0 %5634 }
 0x56f   : > { %v7913_v9 = vpop.permute.xlu2 %5674  ;;  %v5641_v34 = vunpack.i.l.bf16 %v5640_v49  ;;  %v5636_v25 = vunpack.i.l.bf16 %v5635_v10  ;;  %v5642_v48 = vunpack.i.h.bf16 %v5640_v49  ;;  %v5637_v37 = vunpack.i.h.bf16 %v5635_v10 }
 0x570   : > { %v5627_v49 = vunpack.i.h.bf16 %v5625_v32 }
 0x571   : > { %v2957_v10 = vsel %vm586_vm4, %v5641_v34, %v5642_v48  ;;  %v2956_v11 = vsel %vm586_vm4, %v5636_v25, %v5637_v37 }
 0x572   : > { %v2954_v32 = vsel %vm586_vm4, %v5626_v62, %v5627_v49  ;;  %v5592_v49 = vunpack.i.h.bf16 %v7883_v52 }
 0x574   : > { %2806 = vmatmul.bf16.gmra.mxu2 %v4530_v17  ;;  %v2968_v17 = vsel %vm586_vm4, 0.0, %v5636_v25  ;;  %v5606_v25 = vunpack.i.l.bf16 %v7903_v56 }
 0x576   : > { %v5655_v5 = vpop.permute.xlu1 %5654  ;;  %v5650_v16 = vpop.permute.xlu0 %5649 }
 0x577   : > { %v5657_v30 = vunpack.i.h.bf16 %v5655_v5  ;;  %v5656_v15 = vunpack.i.l.bf16 %v5655_v5  ;;  %v5651_v38 = vunpack.i.l.bf16 %v5650_v16  ;;  %v5652_v14 = vunpack.i.h.bf16 %v5650_v16  ;;  %v7926_v36 = vpop.permute.xlu2 %5689 }
 0x578   : > { %v5632_v5 = vunpack.i.h.bf16 %v7885_v46  ;;  %v5617_v46 = vunpack.i.h.bf16 %v7861_v45 }
 0x579   : > { %v2996_v60 = vsel %vm631_vm1, %v5656_v15, %v5657_v30  ;;  %v3008_v23 = vsel %vm631_vm1, 0.0, %v5656_v15  ;;  %v3007_v50 = vsel %vm631_vm1, 0.0, %v5651_v38  ;;  %v2995_v18 = vsel %vm631_vm1, %v5651_v38, %v5652_v14 }
 0x57a   : > { %v4628_v27 = vpack.c.bf16 %v3009_v20, %v3008_v23  ;;  %v4675_v22 = vpack.c.bf16 %v2997_v35, %v2996_v60  ;;  %v4631_v2 = vpack.c.bf16 %v3007_v50, %v3006_v54  ;;  %v4678_v61 = vpack.c.bf16 %v2995_v18, %v2994_v7 }
 0x57b   : > { %v2966_v30 = vsel %vm586_vm4, 0.0, %v5626_v62  ;;  %v4681_v15 = vpack.c.bf16 %v2957_v10, %v2956_v11  ;;  %v5622_v38 = vunpack.i.h.bf16 %v7911_v4  ;;  %v2967_v14 = vsel %vm586_vm4, 0.0, %v5631_v55 }
 0x57c   : > { %4625 = vmatmul.msk.bf16.vlgmr.msrb.gmra.mxu0 %vm898_vm12, %v7863_v40  ;;  %4629 = vmatpush.bf16.msk.msrb.mxu1 %vm6292_vm2, %v4628_v27  ;;  %v2969_v40 = vsel %vm586_vm4, 0.0, %v5641_v34  ;;  %v5616_v35 = vunpack.i.l.bf16 %v7861_v45  ;;  %v2955_v20 = vsel %vm586_vm4, %v5631_v55, %v5632_v5  ;;  %v4637_v60 = vpack.c.bf16 %v2967_v14, %v2966_v30 }
 0x57d   : > { %4676 = vmatpush.bf16.msk.msra.mxu0 %vm6401_vm11, %v4675_v22  ;;  %v4634_v16 = vpack.c.bf16 %v2969_v40, %v2968_v17  ;;  %v5612_v4 = vunpack.i.h.bf16 %v7901_v0  ;;  %v4684_v27 = vpack.c.bf16 %v2955_v20, %v2954_v32  ;;  %v5611_v22 = vunpack.i.l.bf16 %v7901_v0 }
 0x57e   : > { %v7931_v43 = vpop.permute.xlu1 %5669  ;;  %v7933_v41 = vpop.permute.xlu0 %5664  ;;  %v5607_v34 = vunpack.i.h.bf16 %v7903_v56  ;;  %v2925_v45 = vsel %vm553_vm6, %v5621_v51, %v5622_v38  ;;  %v4642_v48 = vpack.c.bf16 %v5621_v51, %v5616_v35  ;;  %v2924_v37 = vsel %vm553_vm6, %v5616_v35, %v5617_v46 }
 0x57f   : > { %v5596_v18 = vunpack.i.l.bf16 %v7881_v6  ;;  %v3177_v0 = vpack.c.bf16 %v2925_v45, %v2924_v37  ;;  %v5597_v54 = vunpack.i.h.bf16 %v7881_v6  ;;  %v2923_v7 = vsel %vm553_vm6, %v5611_v22, %v5612_v4 }
 0x580   : > { %4632 = vmatpush.bf16.msk.msrb.mxu1 %vm6292_vm2, %v4631_v2  ;;  %v7965_v50 = vpop.permute.xlu2 %5704  ;;  %v2922_v56 = vsel %vm553_vm6, %v5606_v25, %v5607_v34  ;;  %v5601_v2 = vunpack.i.l.bf16 %v7821_v12  ;;  %v5602_v62 = vunpack.i.h.bf16 %v7821_v12  ;;  %v4647_v40 = vpack.c.bf16 %v5611_v22, %v5606_v25 }
 0x581   : > { %4679 = vmatpush.bf16.msk.msra.mxu0 %vm6401_vm11, %v4678_v61  ;;  %v2896_v6 = vsel %vm508_vm14, 0.0, %v5596_v18  ;;  %v3175_v10 = vpack.c.bf16 %v2923_v7, %v2922_v56  ;;  %v2884_v11 = vsel %vm508_vm14, %v5596_v18, %v5597_v54  ;;  %v5587_v55 = vunpack.i.h.bf16 %v7793_v59 }
 0x582   : > { %v5586_v5 = vunpack.i.l.bf16 %v7793_v59  ;;  %v2897_v12 = vsel %vm508_vm14, 0.0, %v5601_v2  ;;  %v5707_v45 = vunpack.i.h.bf16 %v7965_v50 }
 0x583   : > { %v4650_v30 = vpack.c.bf16 %v2897_v12, %v2896_v6 }
 0x584   : > { %4635 = vmatpush.bf16.msk.msrb.mxu1 %vm6320_vm5, %v4634_v16  ;;  %v2885_v16 = vsel %vm508_vm14, %v5601_v2, %v5602_v62  ;;  %v2882_v51 = vsel %vm508_vm14, %v5586_v5, %v5587_v55  ;;  %v2894_v14 = vsel %vm508_vm14, 0.0, %v5586_v5 }
 0x585   : > { %4682 = vmatpush.bf16.msk.msra.mxu0 %vm6459_vm3, %v4681_v15  ;;  %v4687_v32 = vpack.c.bf16 %v2885_v16, %v2884_v11 }
 0x586   : > { %v7957_v23 = vpop.permute.xlu1 %5684  ;;  %v7959_v26 = vpop.permute.xlu0 %5679 }
 0x587   : > { %v5686_v5 = vunpack.i.l.bf16 %v7957_v23 }
 0x588   : > { %4638 = vmatpush.bf16.msk.msrb.mxu1 %vm6320_vm5, %v4637_v60  ;;  %v5720_v15 = vpop.permute.xlu2 %5719 }
 0x589   : > { %4685 = vmatpush.bf16.msk.msra.mxu0 %vm6459_vm3, %v4684_v27  ;;  %v5722_v59 = vunpack.i.h.bf16 %v5720_v15  ;;  %v5721_v46 = vunpack.i.l.bf16 %v5720_v15 }
 0x58b   : > { %v3117_v37 = vsel %vm754_vm13, %v5721_v46, %v5722_v59 }
 0x58c   : > { %4626 = vmatmul.msk.bf16.gmra.mxu0 %vm898_vm12, %v7907_v53  ;;  %4643 = vmatpush.bf16.msk.msrb.mxu1 %vm6353_vm9, %v4642_v48  ;;  %v5591_v53 = vunpack.i.l.bf16 %v7883_v52  ;;  %v5706_v48 = vunpack.i.l.bf16 %v7965_v50  ;;  %v5692_v50 = vunpack.i.h.bf16 %v7926_v36 }
 0x58d   : > { %3267 = vmatpush.bf16.msra.mxu0 %v3177_v0 }
 0x58e   : > { %v5700_v17 = vpop.permute.xlu1 %5699  ;;  %v5695_v61 = vpop.permute.xlu0 %5694  ;;  %v2883_v52 = vsel %vm508_vm14, %v5591_v53, %v5592_v49  ;;  %v2895_v38 = vsel %vm508_vm14, 0.0, %v5591_v53  ;;  %v3114_v49 = vsel %vm754_vm13, %v5706_v48, %v5707_v45  ;;  %v5687_v53 = vunpack.i.h.bf16 %v7957_v23 }
 0x58f   : > { %v4653_v35 = vpack.c.bf16 %v2895_v38, %v2894_v14  ;;  %v4690_v20 = vpack.c.bf16 %v2883_v52, %v2882_v51  ;;  %v5702_v54 = vunpack.i.h.bf16 %v5700_v17  ;;  %v5697_v56 = vunpack.i.h.bf16 %v5695_v61 }
 0x590   : > { %4648 = vmatpush.bf16.msk.msrb.mxu1 %vm6353_vm9, %v4647_v40  ;;  %v5701_v2 = vunpack.i.l.bf16 %v5700_v17  ;;  %v5696_v62 = vunpack.i.l.bf16 %v5695_v61  ;;  %v5691_v61 = vunpack.i.l.bf16 %v7926_v36  ;;  %v3086_v52 = vsel %vm713_vm8, %v5687_v53, 0.0  ;;  %v5740_v51 = vpop.permute.xlu2 %5739 }
 0x591   : > { %3268 = vmatpush.bf16.msra.mxu0 %v3175_v10  ;;  %v3089_v10 = vsel %vm713_vm8, %v5702_v54, 0.0  ;;  %v3088_v11 = vsel %vm713_vm8, %v5697_v56, 0.0  ;;  %v5681_v38 = vunpack.i.l.bf16 %v7959_v26  ;;  %v5676_v23 = vunpack.i.l.bf16 %v7913_v9 }
 0x592   : > { %v3077_v12 = vsel %vm713_vm8, %v5701_v2, %v5702_v54  ;;  %v3076_v16 = vsel %vm713_vm8, %v5696_v62, %v5697_v56  ;;  %v4699_v15 = vpack.c.bf16 %v3089_v10, %v3088_v11  ;;  %v3087_v14 = vsel %vm713_vm8, %v5692_v50, 0.0 }
 0x593   : > { %v4656_v36 = vpack.c.bf16 %v3077_v12, %v3076_v16  ;;  %v3074_v46 = vsel %vm713_vm8, %v5686_v5, %v5687_v53  ;;  %v8807_v16 = vpack.c.bf16 %v7502_v57, %v7494_v1  ;;  %v8810_v1 = vpack.c.bf16 %v7460_v29, %v7452_v21 }
 0x594   : > { %4651 = vmatpush.bf16.msk.msrb.mxu1 %vm6292_vm2, %v4650_v30  ;;  %v5682_v30 = vunpack.i.h.bf16 %v7959_v26  ;;  %v5666_v26 = vunpack.i.l.bf16 %v7933_v41 }
 0x595   : > { %4688 = vmatpush.bf16.msk.msra.mxu0 %vm6401_vm11, %v4687_v32  ;;  %v5677_v32 = vunpack.i.h.bf16 %v7913_v9  ;;  %v4702_v9 = vpack.c.bf16 %v3087_v14, %v3086_v52 }
 0x596   : > { %v5715_v60 = vpop.permute.xlu1 %5714  ;;  %v5710_v4 = vpop.permute.xlu0 %5709 }
 0x597   : > { %v5717_v27 = vunpack.i.h.bf16 %v5715_v60  ;;  %v5716_v22 = vunpack.i.l.bf16 %v5715_v60  ;;  %v5712_v34 = vunpack.i.h.bf16 %v5710_v4  ;;  %v5711_v25 = vunpack.i.l.bf16 %v5710_v4 }
 0x598   : > { %4654 = vmatpush.bf16.msk.msrb.mxu1 %vm6292_vm2, %v4653_v35  ;;  %v5672_v35 = vunpack.i.h.bf16 %v7931_v43  ;;  %v5667_v60 = vunpack.i.h.bf16 %v7933_v41  ;;  %v3048_v56 = vsel %vm672_vm10, %v5677_v32, 0.0 }
 0x599   : > { %v3116_v18 = vsel %vm754_vm13, %v5716_v22, %v5717_v27  ;;  %v4693_v0 = vpack.c.bf16 %v5722_v59, %v5717_v27  ;;  %4691 = vmatpush.bf16.msk.msra.mxu0 %vm6401_vm11, %v4690_v20  ;;  %v3115_v40 = vsel %vm754_vm13, %v5711_v25, %v5712_v34  ;;  %v4696_v6 = vpack.c.bf16 %v5712_v34, %v5707_v45 }
 0x59a   : > { %v3200_v7 = vpack.c.bf16 %v3117_v37, %v3116_v18  ;;  %v3198_v17 = vpack.c.bf16 %v3115_v40, %v3114_v49  ;;  %v3075_v59 = vsel %vm713_vm8, %v5691_v61, %v5692_v50  ;;  %v5671_v20 = vunpack.i.l.bf16 %v7931_v43 }
 0x59b   : > { %v3049_v27 = vsel %vm672_vm10, %v5682_v30, 0.0  ;;  %v5742_v22 = vunpack.i.h.bf16 %v5740_v51  ;;  %v5741_v34 = vunpack.i.l.bf16 %v5740_v51  ;;  %v4659_v25 = vpack.c.bf16 %v3075_v59, %v3074_v46 }
 0x59c   : > { %4694 = vmatpush.bf16.msk.msra.mxu1 %vm6431_vm15, %v4693_v0  ;;  %3237 = vmatpush.bf16.msra.mxu3 %v3200_v7  ;;  %v3037_v45 = vsel %vm672_vm10, %v5681_v38, %v5682_v30  ;;  %v3036_v7 = vsel %vm672_vm10, %v5676_v23, %v5677_v32  ;;  %v4705_v2 = vpack.c.bf16 %v3049_v27, %v3048_v56  ;;  %v3047_v50 = vsel %vm672_vm10, %v5672_v35, 0.0 }
 0x59d   : > { %v3149_v62 = vsel %vm787_vm7, %v5741_v34, %v5742_v22  ;;  %v4662_v49 = vpack.c.bf16 %v3037_v45, %v3036_v7  ;;  %v3035_v10 = vsel %vm672_vm10, %v5671_v20, %v5672_v35  ;;  %v3034_v11 = vsel %vm672_vm10, %v5666_v26, %v5667_v60 }
 0x59e   : > { %v8017_v55 = vpop.permute.xlu1 %5729  ;;  %v5725_v4 = vpop.permute.xlu0 %5724  ;;  %v4665_v5 = vpack.c.bf16 %v3035_v10, %v3034_v11  ;;  %v3161_v32 = vsel %vm787_vm7, %v5742_v22, 0.0  ;;  %v8809_v38 = vpack.c.bf16 %v7484_v13, %v7476_v39 }
 0x59f   : > { %v5732_v48 = vunpack.i.h.bf16 %v8017_v55  ;;  %v5731_v43 = vunpack.i.l.bf16 %v8017_v55  ;;  %v5727_v18 = vunpack.i.h.bf16 %v5725_v4  ;;  %v5726_v0 = vunpack.i.l.bf16 %v5725_v4 }
 0x5a0   : > { %4697 = vmatpush.bf16.msk.msra.mxu1 %vm6431_vm15, %v4696_v6  ;;  %3238 = vmatpush.bf16.msra.mxu3 %v3198_v17  ;;  %v3046_v6 = vsel %vm672_vm10, %v5667_v60, 0.0 }
 0x5a1   : > { %v3147_v55 = vsel %vm787_vm7, %v5731_v43, %v5732_v48  ;;  %v3146_v17 = vsel %vm787_vm7, %v5726_v0, %v5727_v18  ;;  %v4708_v61 = vpack.c.bf16 %v3047_v50, %v3046_v6  ;;  %v3158_v51 = vsel %vm787_vm7, %v5727_v18, 0.0 }
 0x5a2   : > { %v4671_v12 = vpack.c.bf16 %v3147_v55, %v3146_v17 }
 0x5a4   : > { %4700 = vmatpush.bf16.msk.msra.mxu1 %vm6401_vm11, %v4699_v15  ;;  %4657 = vmatpush.bf16.msk.msra.mxu3 %vm6292_vm2, %v4656_v36  ;;  %v8808_v15 = vpack.c.bf16 %v7470_v3, %v7466_v24  ;;  %v3159_v36 = vsel %vm787_vm7, %v5732_v48, 0.0 }
 0x5a5   : > { %v4714_v24 = vpack.c.bf16 %v3159_v36, %v3158_v51 }
 0x5a6   : > { %v5735_v37 = vpop.permute.xlu1 %5734 }
 0x5a7   : > { %v5737_v41 = vunpack.i.h.bf16 %v5735_v37  ;;  %v5736_v54 = vunpack.i.l.bf16 %v5735_v37 }
 0x5a8   : > { %4703 = vmatpush.bf16.msk.msra.mxu1 %vm6401_vm11, %v4702_v9  ;;  %4660 = vmatpush.bf16.msk.msra.mxu3 %vm6292_vm2, %v4659_v25 }
 0x5a9   : > { %v3148_v40 = vsel %vm787_vm7, %v5736_v54, %v5737_v41  ;;  %v3160_v30 = vsel %vm787_vm7, %v5737_v41, 0.0 }
 0x5aa   : > { %v4668_v53 = vpack.c.bf16 %v3149_v62, %v3148_v40  ;;  %v4711_v52 = vpack.c.bf16 %v3161_v32, %v3160_v30 }
 0x5ac   : > { %4706 = vmatpush.bf16.msk.msra.mxu1 %vm6459_vm3, %v4705_v2  ;;  %4663 = vmatpush.bf16.msk.msra.mxu3 %vm6320_vm5, %v4662_v49  ;;  %v2855_v2 = vld [vmem:[%s8630_s3] sm:$0xff] }
 0x5ad   : > { %4669 = vmatpush.bf16.msk.msrb.mxu2 %vm6320_vm5, %v4668_v53  ;;  %v3214_v40 = vunpack.c.h.b16 %v2855_v2  ;;  %v3213_v50 = vunpack.c.l.b16 %v2855_v2 }
 0x5af   : > { %v3217_v53 = vpack.c.b16 %v3214_v40, %v3214_v40  ;;  %v3216_v10 = vpack.c.b16 %v3213_v50, %v3213_v50 }
 0x5b0   : > { %4709 = vmatpush.bf16.msk.msra.mxu1 %vm6459_vm3, %v4708_v61  ;;  %4666 = vmatpush.bf16.msk.msra.mxu3 %vm6320_vm5, %v4665_v5 }
 0x5b1   : > { %4672 = vmatpush.bf16.msk.msrb.mxu2 %vm6320_vm5, %v4671_v12  ;;  %3232 = vmatmul.bf16.vlgmr.msrb.gmra.mxu1 %v3216_v10 }
 0x5b2   : > { %3271 = vmatmul.bf16.vlgmr.msra.gmra.mxu0 %v3216_v10 }
 0x5b4   : > { %3282 = vmatpush.bf16.msra.mxu1 %v8807_v16  ;;  %3243 = vmatpush.bf16.msra.mxu3 %v8808_v15 }
 0x5b8   : > { %3283 = vmatpush.bf16.msra.mxu1 %v8809_v38  ;;  %3244 = vmatpush.bf16.msra.mxu3 %v8810_v1 }
 0x5bb   : > { %3245 = vmatmul.bf16.vlgmr.msra.gmra.mxu3 %v3217_v53 }
 0x5bc   : > { %4712 = vmatpush.bf16.msk.msrb.mxu3 %vm6459_vm3, %v4711_v52 }
 0x5c0   : > { %4715 = vmatpush.bf16.msk.msrb.mxu3 %vm6459_vm3, %v4714_v24 }
 0x5c1   : > { %3284 = vmatmul.bf16.vlgmr.msra.gmra.mxu1 %v3217_v53 }
 0x5c7   : > { %v2726_v3 = vpop.f32.mrf.mxu2  ;;  %v2783_v37 = vpop.f32.mrf.mxu3 }
 0x5c8   : > { %v2727_v13 = vadd.f32 %v2726_v3, %v7817_v31  ;;  %v2784_v6 = vadd.f32 %v2783_v37, %v7817_v31  ;;  %v3308_v37 = vld [vmem:[%s8633_s6] sm:$0xff] }
 0x5cf   : > { %v2728_v57 = vpop.f32.mrf.mxu2  ;;  %v2785_v11 = vpop.f32.mrf.mxu3 }
 0x5d0   : > { %v2764_v39 = vpop.f32.mrf.mxu1  ;;  %v2729_v29 = vadd.f32 %v2728_v57, %v7763_v28  ;;  %v2786_v30 = vadd.f32 %v2785_v11, %v7763_v28  ;;  %v2856_v28 = vld [vmem:[%s8630_s3 + $0x8] sm:$0xf] }
 0x5d1   : > { %v3215_v24 = vunpack.c.l.b16 %v2856_v28 }
 0x5d3   : > { %v3218_v57 = vpack.c.b16 %v3215_v24, %v3215_v24 }
 0x5d5   : > { %4673 = vmatmul.msk.bf16.vlgmr.msrb.gmra.mxu2 %vm898_vm12, %v3218_v57  ;;  %4716 = vmatmul.msk.bf16.vlgmr.msrb.gmra.mxu3 %vm898_vm12, %v3218_v57 }
 0x5d7   : > { %v2731_v59 = vpop.f32.mrf.mxu2  ;;  %v2788_v52 = vpop.f32.mrf.mxu3 }
 0x5d8   : > { %v2766_v21 = vpop.f32.mrf.mxu1  ;;  %v2732_v27 = vadd.f32 %v2731_v59, %v7858_v42  ;;  %v2789_v3 = vadd.f32 %v2788_v52, %v7858_v42 }
 0x5d9   : > { %v2745_v23 = vpop.f32.mrf.mxu0 }
 0x5da   : > { %v2746_v14 = vadd.f32 %v2745_v23, %v2727_v13 }
 0x5dc   : > { %v2765_v46 = vadd.f32 %v2764_v39, %v2746_v14 }
 0x5de   : > { %v8092_v35 = vmax.f32 %v2765_v46, 0.0 }
 0x5df   : > { %v2733_v4 = vpop.f32.mrf.mxu2  ;;  %v2790_v46 = vpop.f32.mrf.mxu3 }
 0x5e0   : > { %2847 = vst [vmem:[%s8097_s18] sm:$0xff] %v8092_v35  ;;  %v2769_v25 = vpop.f32.mrf.mxu1  ;;  %v2734_v41 = vadd.f32 %v2733_v4, %v7856_v19 }
 0x5e1   : > { %v2747_v20 = vpop.f32.mrf.mxu0 }
 0x5e2   : > { %v2748_v60 = vadd.f32 %v2747_v20, %v2729_v29  ;;  %v2791_v20 = vadd.f32 %v2790_v46, %v7856_v19 }
 0x5e4   : > { %v2767_v26 = vadd.f32 %v2766_v21, %v2748_v60 }
 0x5e6   : > { %v8101_v9 = vmax.f32 %v2767_v26, 0.0 }
 0x5e7   : > { %v2802_v0 = vpop.f32.mrf.mxu2 }
 0x5e8   : > { %v5748_v22 = vpack.i.bf16 %v8101_v9, %v8092_v35  ;;  %2849 = vst [vmem:[%s8097_s18 + $0x10] sm:$0xff] %v8101_v9  ;;  %v2771_v7 = vpop.f32.mrf.mxu1  ;;  %v2803_v55 = vadd.f32 %v2802_v0, %v2784_v6  ;;  %v2857_v0 = vld [vmem:[%s8631_s4] sm:$0xff] }
 0x5e9   : > { %v2750_v34 = vpop.f32.mrf.mxu0 }
 0x5ea   : > { %v2751_v48 = vadd.f32 %v2750_v34, %v2732_v27  ;;  %5749 = vrot.lane.b32.xlu1 %v5748_v22, %s8803_s0  ;;  %5744 = vrot.lane.b32.xlu0 %v5748_v22, %s8804_s14 }
 0x5eb   : > { %5754 = vrot.lane.b32.xlu2 %v5748_v22, %s8768_s29 }
 0x5ec   : > { %v2770_v43 = vadd.f32 %v2769_v25, %v2751_v48  ;;  %v3309_v48 = vld [vmem:[%s8633_s6 + $0x8] sm:$0x1] }
 0x5ee   : > { %v8113_v18 = vmax.f32 %v2770_v43, 0.0  ;;  %v3771_v43 = vld [vmem:[%s8634_s7 + $0x8] sm:$0x1] }
 0x5ef   : > { %v2804_v61 = vpop.f32.mrf.mxu2 }
 0x5f0   : > { %2851 = vst [vmem:[%s8097_s18 + $0x20] sm:$0xff] %v8113_v18  ;;  %v2805_v15 = vadd.f32 %v2804_v61, %v2786_v30 }
 0x5f1   : > { %v2752_v54 = vpop.f32.mrf.mxu0 }
 0x5f2   : > { %v2753_v56 = vadd.f32 %v2752_v54, %v2734_v41  ;;  %5759 = vrot.lane.b32.xlu1 %v5748_v22, %s8767_s25  ;;  %v3770_v54 = vld [vmem:[%s8634_s7] sm:$0xff] }
 0x5f4   : > { %v2772_v62 = vadd.f32 %v2771_v7, %v2753_v56 }
 0x5f6   : > { %v8123_v49 = vmax.f32 %v2772_v62, 0.0 }
 0x5f7   : > { %v2807_v51 = vpop.f32.mrf.mxu2 }
 0x5f8   : > { %v5773_v17 = vpack.i.bf16 %v8123_v49, %v8113_v18  ;;  %2853 = vst [vmem:[%s8097_s18 + $0x30] sm:$0xff] %v8123_v49  ;;  %v3640_v31 = vpack.c.bf16 %v8123_v49, %v8113_v18  ;;  %v2808_v39 = vadd.f32 %v2807_v51, %v2789_v3 }
 0x5f9   : > { %v2821_v5 = vpop.f32.mrf.mxu0 }
 0x5fa   : > { %v2822_v12 = vadd.f32 %v2821_v5, %v2803_v55  ;;  %5774 = vrot.lane.b32.xlu1 %v5773_v17, %s8768_s29  ;;  %5769 = vrot.lane.b32.xlu0 %v5773_v17, %s8803_s0 }
 0x5fb   : > { %5764 = vrot.lane.b32.xlu2 %v5773_v17, %s8804_s14 }
 0x5fc   : > { %v8134_v16 = vmax.f32 %v2822_v12, 0.0 }
 0x5fe   : > { %2848 = vst [vmem:[%s8097_s18 + $0x8] sm:$0xff] %v8134_v16  ;;  %v5798_v32 = vpack.i.bf16 %v8134_v16, %v8092_v35 }
 0x5ff   : > { %v2809_v29 = vpop.f32.mrf.mxu2 }
 0x600   : > { %v2810_v60 = vadd.f32 %v2809_v29, %v2791_v20 }
 0x601   : > { %v2823_v38 = vpop.f32.mrf.mxu0 }
 0x602   : > { %v2824_v36 = vadd.f32 %v2823_v38, %v2805_v15  ;;  %5799 = vrot.lane.b32.xlu1 %v5798_v32, %s8734_s22  ;;  %5779 = vrot.lane.b32.xlu0 %v5773_v17, %s8767_s25 }
 0x603   : > { %5794 = vrot.lane.b32.xlu2 %v5798_v32, %s8766_s15 }
 0x604   : > { %v8147_v1 = vmax.f32 %v2824_v36, 0.0 }
 0x606   : > { %2850 = vst [vmem:[%s8097_s18 + $0x18] sm:$0xff] %v8147_v1  ;;  %v5803_v13 = vpack.i.bf16 %v8147_v1, %v8101_v9  ;;  %v5818_v59 = vpack.i.bf16 %v8147_v1, %v8134_v16  ;;  %v8813_v58 = vpack.c.bf16 %v8147_v1, %v8134_v16 }
 0x609   : > { %v2826_v14 = vpop.f32.mrf.mxu0 }
 0x60a   : > { %v2827_v42 = vadd.f32 %v2826_v14, %v2808_v39  ;;  %5804 = vrot.lane.b32.xlu1 %v5803_v13, %s8769_s13  ;;  %5784 = vrot.lane.b32.xlu0 %v5798_v32, %s8769_s13 }
 0x60b   : > { %5819 = vrot.lane.b32.xlu2 %v5818_v59, %s8803_s0 }
 0x60c   : > { %v8163_v21 = vmax.f32 %v2827_v42, 0.0 }
 0x60e   : > { %2852 = vst [vmem:[%s8097_s18 + $0x28] sm:$0xff] %v8163_v21  ;;  %v5828_v4 = vpack.i.bf16 %v8163_v21, %v8113_v18 }
 0x611   : > { %v2828_v26 = vpop.f32.mrf.mxu0 }
 0x612   : > { %v2829_v27 = vadd.f32 %v2828_v26, %v2810_v60  ;;  %5809 = vrot.lane.b32.xlu1 %v5818_v59, %s8804_s14  ;;  %5789 = vrot.lane.b32.xlu0 %v5798_v32, %s8770_s30 }
 0x613   : > { %5829 = vrot.lane.b32.xlu2 %v5828_v4, %s8769_s13 }
 0x614   : > { %v8173_v22 = vmax.f32 %v2829_v27, 0.0 }
 0x616   : > { %2854 = vst [vmem:[%s8097_s18 + $0x38] sm:$0xff] %v8173_v22  ;;  %v3641_v19 = vpack.c.bf16 %v8173_v22, %v8163_v21  ;;  %v5873_v34 = vpack.i.bf16 %v8173_v22, %v8123_v49  ;;  %v5888_v25 = vpack.i.bf16 %v8173_v22, %v8163_v21  ;;  %v8812_v21 = vpack.c.bf16 %v8101_v9, %v8092_v35 }
 0x61a   : > { %5814 = vrot.lane.b32.xlu1 %v5803_v13, %s8770_s30  ;;  %5824 = vrot.lane.b32.xlu0 %v5803_v13, %s8766_s15 }
 0x61b   : > { %5834 = vrot.lane.b32.xlu2 %v5828_v4, %s8770_s30 }
 0x622   : > { %5874 = vrot.lane.b32.xlu1 %v5873_v34, %s8766_s15  ;;  %5839 = vrot.lane.b32.xlu0 %v5828_v4, %s8766_s15  ;;  %s3835_s15 = scalar_lea.hbm %s8637_s10, %s4866_s1 }
 0x623   : > { %5844 = vrot.lane.b32.xlu2 %v5828_v4, %s8734_s22 }
 0x62a   : > { %5889 = vrot.lane.b32.xlu1 %v5888_v25, %s8768_s29  ;;  %5849 = vrot.lane.b32.xlu0 %v5873_v34, %s8769_s13  ;;  %s3800_s13 = sand.u32 1, %s6155_s21  }
 0x62b   : > { %5854 = vrot.lane.b32.xlu2 %v5888_v25, %s8804_s14  ;;  %s8554_s20 = scalar_lea.sflag [#allocation7], %s3800_s13 }
 0x62f   : > { %v8336_v45 = vpop.f32.mrf.mxu0 }
 0x632   : > { %5894 = vrot.lane.b32.xlu1 %v5888_v25, %s8767_s25  ;;  %5859 = vrot.lane.b32.xlu0 %v5873_v34, %s8770_s30  ;;  %s3838_s30 = sshll.u32 %s3835_s15, 4  ;;  %s3839_s30 = int_to_ptr.hbm [resolvable:$true] %s3838_s30 }
 0x633   : > { %5864 = vrot.lane.b32.xlu2 %v5888_v25, %s8803_s0  ;;  %v8290_v25 = vpop.f32.mrf.mxu1 }
 0x63a   : > { %3665 = vperm.xlu1 %5102, %v3309_v48   ;;  %5879 = vrot.lane.b32.xlu0 %v5873_v34, %s8734_s22 }
 0x63b   : > { %5869 = vrot.lane.b32.xlu2 %v5803_v13, %s8734_s22  ;;  %s3852_s22 = scalar_lea.hbm %s8638_s11, %s4866_s1 }
 0x63e   : > { %v8294_v48 = vpop.f32.mrf.mxu3 }
 0x642   : > { %3779 = vperm.xlu1 %5102, %v3771_v43   ;;  %5884 = vrot.lane.b32.xlu0 %v5818_v59, %s8768_s29 }
 0x643   : > { %5899 = vrot.lane.b32.xlu2 %v5818_v59, %s8767_s25  ;;  %s3836_s25 = sshll.u32 %s7456_s12, 4  ;;  %s5947_s12 = sshra.s32 %s3839_s30, 4  ;;  %s3837_s25 = int_to_ptr.vmem [resolvable:$true] %s3836_s25  ;;  %s5948_s12 = int_to_ptr.hbm [resolvable:$true] %s5947_s12 }
 0x644   : > { %s5949_s18 = scalar_lea.hbm %s5948_s12, 64  ;;  %p5954_p3 = scmp.lt.s32.totalorder %s5948_s12, %s8637_s10 }
 0x645   : > { %v8211_v41 = vpop.permute.xlu2 %5754  ;;  %p5950_p0 = scmp.ne.s32.totalorder %s5948_s12, %s5949_s18  ;;  %p5955_p4 = scmp.lt.s32.totalorder %s5953_s19, %s5949_s18 }
 0x646   : > { %v5757_v60 = vunpack.i.h.bf16 %v8211_v41  ;;  %v5756_v26 = vunpack.i.l.bf16 %v8211_v41  ;;  %v4862_v41 = vld [vmem:[%s8632_s5 + $0x4] sm:$0xf] }
 0x647   : > { %p5951_p1 = pnand %p5950_p0, %p6174_p5  ;;  %p5956_p7 = por %p5955_p4, %p5954_p3 }
 0x648   : > { %v4749_v43 = vpack.c.bf16 %v5757_v60, %v5756_v26 }
 0x649   : > { %p5952_p2 = pneg %p5951_p1 }
 0x64a   : > { %3660 = vperm.xlu0 %5101, %v3308_v37  }
 0x64b   : > { %3208 = vperm.xlu2 %5100, %v2857_v0   ;;  %p5957_p8 = pnand %p5956_p7, %p5952_p2 }
 0x652   : > { %3774 = vperm.xlu0 %5101, %v3770_v54  }
 0x655   : > { %v8216_v56 = vpop.permute.xlu2 %5764 }
 0x656   : > { %v5767_v7 = vunpack.i.h.bf16 %v8216_v56  ;;  %v5766_v2 = vunpack.i.l.bf16 %v8216_v56 }
 0x658   : > { %v3461_v62 = vsel %vm631_vm1, 0.0, %v5767_v7  ;;  %v3460_v40 = vsel %vm631_vm1, 0.0, %v5766_v2 }
 0x659   : > { %v4730_v50 = vpack.c.bf16 %v3461_v62, %v3460_v40 }
 0x65b   : > { %4731 = vmatpush.bf16.msk.msra.mxu2 %vm6292_vm2, %v4730_v50 }
 0x65c   : > { %v8228_v6 = vpop.permute.xlu1 %5749  ;;  %v8230_v53 = vpop.permute.xlu0 %5744 }
 0x65d   : > { %v5747_v10 = vunpack.i.h.bf16 %v8230_v53  ;;  %v5746_v11 = vunpack.i.l.bf16 %v8230_v53  ;;  %v8234_v55 = vpop.permute.xlu2 %5794  ;;  %v5752_v52 = vunpack.i.h.bf16 %v8228_v6  ;;  %v5751_v38 = vunpack.i.l.bf16 %v8228_v6 }
 0x65f   : > { %v3459_v17 = vsel %vm631_vm1, 0.0, %v5747_v10  ;;  %v3458_v61 = vsel %vm631_vm1, 0.0, %v5746_v11  ;;  %v3419_v39 = vsel %vm586_vm4, 0.0, %v5752_v52  ;;  %v3418_v13 = vsel %vm586_vm4, 0.0, %v5751_v38 }
 0x660   : > { %v4733_v5 = vpack.c.bf16 %v3459_v17, %v3458_v61  ;;  %v4739_v14 = vpack.c.bf16 %v3419_v39, %v3418_v13  ;;  %v3248_v39 = vpop.f32.mrf.mxu3 }
 0x662   : > { %4734 = vmatpush.bf16.msk.msra.mxu2 %vm6292_vm2, %v4733_v5 }
 0x664   : > { %v8244_v12 = vpop.permute.xlu1 %5759 }
 0x665   : > { %v8246_v30 = vpop.permute.xlu2 %5819  ;;  %v5762_v54 = vunpack.i.h.bf16 %v8244_v12  ;;  %v5761_v62 = vunpack.i.l.bf16 %v8244_v12 }
 0x666   : > { %v5821_v53 = vunpack.i.l.bf16 %v8246_v30 }
 0x667   : > { %v3347_v5 = vsel %vm508_vm14, 0.0, %v5762_v54 }
 0x66c   : > { %v8248_v15 = vpop.permute.xlu1 %5774  ;;  %v8250_v32 = vpop.permute.xlu0 %5769 }
 0x66d   : > { %v5772_v36 = vunpack.i.h.bf16 %v8250_v32  ;;  %v5771_v51 = vunpack.i.l.bf16 %v8250_v32  ;;  %v8256_v28 = vpop.permute.xlu2 %5829  ;;  %v5777_v59 = vunpack.i.h.bf16 %v8248_v15  ;;  %v5776_v42 = vunpack.i.l.bf16 %v8248_v15 }
 0x66e   : > { %v5831_v6 = vunpack.i.l.bf16 %v8256_v28 }
 0x66f   : > { %v3421_v24 = vsel %vm586_vm4, 0.0, %v5772_v36  ;;  %v3420_v3 = vsel %vm586_vm4, 0.0, %v5771_v51  ;;  %v4744_v4 = vpack.c.bf16 %v5777_v59, %v5776_v42 }
 0x670   : > { %v4736_v57 = vpack.c.bf16 %v3421_v24, %v3420_v3  ;;  %v3346_v24 = vsel %vm508_vm14, 0.0, %v5761_v62  ;;  %v3235_v3 = vpop.f32.mrf.mxu1 }
 0x671   : > { %v4755_v13 = vpack.c.bf16 %v3347_v5, %v3346_v24 }
 0x672   : > { %4737 = vmatpush.bf16.msk.msra.mxu2 %vm6320_vm5, %v4736_v57  ;;  %v4719_v57 = vld [vmem:[%s8632_s5] sm:$0xf] }
 0x674   : > { %v8274_v46 = vpop.permute.xlu1 %5799  ;;  %v8276_v29 = vpop.permute.xlu0 %5779 }
 0x675   : > { %v8278_v20 = vpop.permute.xlu2 %5834  ;;  %v5782_v27 = vunpack.i.h.bf16 %v8276_v29  ;;  %v5781_v34 = vunpack.i.l.bf16 %v8276_v29 }
 0x676   : > { %4740 = vmatpush.bf16.msk.msra.mxu2 %vm6320_vm5, %v4739_v14 }
 0x677   : > { %v3349_v40 = vsel %vm508_vm14, 0.0, %v5782_v27  ;;  %v3348_v50 = vsel %vm508_vm14, 0.0, %v5781_v34 }
 0x678   : > { %v4752_v61 = vpack.c.bf16 %v3349_v40, %v3348_v50  ;;  %v8332_v40 = vor.u32 %v4863_v63, %v4719_v57  ;;  %v8345_v57 = vpop.f32.mrf.mxu1 }
 0x67a   : > { %4745 = vmatpush.bf16.msk.msra.mxu2 %vm6353_vm9, %v4744_v4 }
 0x67c   : > { %v8300_v37 = vpop.permute.xlu1 %5804  ;;  %v8302_v0 = vpop.permute.xlu0 %5784 }
 0x67d   : > { %v8312_v17 = vpop.permute.xlu2 %5844 }
 0x67e   : > { %4750 = vmatpush.bf16.msk.msra.mxu2 %vm6353_vm9, %v4749_v43 }
 0x682   : > { %4753 = vmatpush.bf16.msk.msra.mxu2 %vm6292_vm2, %v4752_v61 }
 0x684   : > { %v5810_v14 = vpop.permute.xlu1 %5809  ;;  %v8330_v4 = vpop.permute.xlu0 %5789 }
 0x685   : > { %v5855_v43 = vpop.permute.xlu2 %5854  ;;  %v5812_v50 = vunpack.i.h.bf16 %v5810_v14  ;;  %v5811_v3 = vunpack.i.l.bf16 %v5810_v14  ;;  %v8359_v14 = vpop.f32.mrf.mxu2 }
 0x686   : > { %v5857_v23 = vunpack.i.h.bf16 %v5855_v43  ;;  %v5856_v61 = vunpack.i.l.bf16 %v5855_v43  ;;  %4756 = vmatpush.bf16.msk.msra.mxu2 %vm6292_vm2, %v4755_v13 }
 0x687   : > { %v3446_v63 = vsel %vm631_vm1, %v5746_v11, %v5811_v3  ;;  %v3447_v13 = vsel %vm631_vm1, %v5747_v10, %v5812_v50  ;;  %v5822_v11 = vunpack.i.h.bf16 %v8246_v30  ;;  %v3274_v10 = vpop.f32.mrf.mxu0  ;;  %v3406_v30 = vsel %vm586_vm4, %v5751_v38, %v5821_v53 }
 0x688   : > { %v3448_v39 = vsel %vm631_vm1, %v5766_v2, %v5856_v61  ;;  %v3449_v5 = vsel %vm631_vm1, %v5767_v7, %v5857_v23  ;;  %v4780_v23 = vpack.c.bf16 %v3447_v13, %v3446_v63  ;;  %v5807_v38 = vunpack.i.h.bf16 %v8300_v37 }
 0x689   : > { %v4777_v24 = vpack.c.bf16 %v3449_v5, %v3448_v39  ;;  %3694 = vmatmul.bf16.vlgmr.msra.gmra.mxu2 %v8332_v40  ;;  %v8361_v39 = vpop.f32.mrf.mxu3  ;;  %v3287_v5 = vpop.f32.mrf.mxu1  ;;  %v3407_v63 = vsel %vm586_vm4, %v5752_v52, %v5822_v11  ;;  %v5832_v52 = vunpack.i.h.bf16 %v8256_v28  ;;  %v5786_v11 = vunpack.i.l.bf16 %v8302_v0 }
 0x68b   : > { %4778 = vmatpush.bf16.msk.msrb.mxu1 %vm6401_vm11, %v4777_v24 }
 0x68c   : > { %v8355_v2 = vpop.permute.xlu1 %5814  ;;  %v8357_v56 = vpop.permute.xlu0 %5824 }
 0x68d   : > { %v5865_v7 = vpop.permute.xlu2 %5864  ;;  %v5817_v15 = vunpack.i.h.bf16 %v8355_v2 }
 0x68e   : > { %v5867_v43 = vunpack.i.h.bf16 %v5865_v7  ;;  %v5866_v61 = vunpack.i.l.bf16 %v5865_v7 }
 0x68f   : > { %4781 = vmatpush.bf16.msk.msrb.mxu1 %vm6401_vm11, %v4780_v23  ;;  %v4786_v23 = vpack.c.bf16 %v3407_v63, %v3406_v30  ;;  %v3568_v30 = vsel %vm754_vm13, %v5831_v6, %v5832_v52 }
 0x690   : > { %v3409_v50 = vsel %vm586_vm4, %v5772_v36, %v5867_v43  ;;  %v3408_v3 = vsel %vm586_vm4, %v5771_v51, %v5866_v61  ;;  %v3261_v51 = vpop.f32.mrf.mxu2  ;;  %v5806_v43 = vunpack.i.l.bf16 %v8300_v37  ;;  %v5787_v61 = vunpack.i.h.bf16 %v8302_v0 }
 0x691   : > { %v4783_v24 = vpack.c.bf16 %v3409_v50, %v3408_v3  ;;  %v3300_v7 = vpop.f32.mrf.mxu3 }
 0x692   : > { %v3566_v6 = vsel %vm754_vm13, %v5786_v11, %v5787_v61  ;;  %v3539_v11 = vsel %vm713_vm8, %v5817_v15, 0.0 }
 0x693   : > { %4784 = vmatpush.bf16.msk.msrb.mxu1 %vm6459_vm3, %v4783_v24 }
 0x694   : > { %v8381_v13 = vpop.permute.xlu1 %5874  ;;  %v8383_v36 = vpop.permute.xlu0 %5839 }
 0x695   : > { %v8385_v32 = vpop.permute.xlu2 %5869  ;;  %v5877_v8 = vunpack.i.h.bf16 %v8381_v13 }
 0x697   : > { %4787 = vmatpush.bf16.msk.msrb.mxu1 %vm6459_vm3, %v4786_v23 }
 0x69c   : > { %v5890_v53 = vpop.permute.xlu1 %5889  ;;  %v5850_v10 = vpop.permute.xlu0 %5849 }
 0x69d   : > { %v5892_v50 = vunpack.i.h.bf16 %v5890_v53  ;;  %v5891_v3 = vunpack.i.l.bf16 %v5890_v53  ;;  %v5852_v5 = vunpack.i.h.bf16 %v5850_v10  ;;  %v5851_v24 = vunpack.i.l.bf16 %v5850_v10  ;;  %v8395_v63 = vpop.permute.xlu2 %5899 }
 0x69e   : > { %v5837_v53 = vunpack.i.h.bf16 %v8278_v20  ;;  %v5836_v10 = vunpack.i.l.bf16 %v8278_v20  ;;  %v5902_v47 = vunpack.i.h.bf16 %v8395_v63 }
 0x69f   : > { %v3569_v28 = vsel %vm754_vm13, %v5851_v24, %v5852_v5  ;;  %v4795_v51 = vpack.c.bf16 %v5852_v5, %v5832_v52  ;;  %v3376_v37 = vsel %vm553_vm6, %v5776_v42, %v5891_v3  ;;  %v3377_v0 = vsel %vm553_vm6, %v5777_v59, %v5892_v50 }
 0x6a0   : > { %v3652_v23 = vpack.c.bf16 %v3569_v28, %v3568_v30  ;;  %v3629_v7 = vpack.c.bf16 %v3377_v0, %v3376_v37  ;;  %v3567_v52 = vsel %vm754_vm13, %v5806_v43, %v5807_v38  ;;  %v4798_v42 = vpack.c.bf16 %v5807_v38, %v5787_v61 }
 0x6a1   : > { %4796 = vmatpush.bf16.msk.msrb.mxu2 %vm6431_vm15, %v4795_v51  ;;  %v5816_v59 = vunpack.i.l.bf16 %v8355_v2  ;;  %v3650_v3 = vpack.c.bf16 %v3567_v52, %v3566_v6  ;;  %v3540_v5 = vsel %vm713_vm8, %v5837_v53, 0.0  ;;  %v3528_v20 = vsel %vm713_vm8, %v5836_v10, %v5837_v53 }
 0x6a2   : > { %3700 = vmatpush.bf16.msra.mxu3 %v3652_v23  ;;  %3732 = vmatpush.bf16.msrb.mxu1 %v3629_v7  ;;  %v5792_v43 = vunpack.i.h.bf16 %v8330_v4  ;;  %v5791_v38 = vunpack.i.l.bf16 %v8330_v4  ;;  %v5841_v53 = vunpack.i.l.bf16 %v8383_v36  ;;  %v5847_v6 = vunpack.i.h.bf16 %v8312_v17 }
 0x6a3   : > { %v3527_v51 = vsel %vm713_vm8, %v5816_v59, %v5817_v15  ;;  %v5846_v52 = vunpack.i.l.bf16 %v8312_v17  ;;  %v3335_v49 = vsel %vm508_vm14, %v5762_v54, %v5902_v47 }
 0x6a4   : > { %v5860_v50 = vpop.permute.xlu0 %5859 }
 0x6a5   : > { %v5862_v24 = vunpack.i.h.bf16 %v5860_v50  ;;  %v5861_v30 = vunpack.i.l.bf16 %v5860_v50  ;;  %v3209_v28 = vpop.permute.xlu2 %3208  ;;  %4799 = vmatpush.bf16.msk.msrb.mxu2 %vm6431_vm15, %v4798_v42  ;;  %v3538_v42 = vsel %vm713_vm8, %v5792_v43, 0.0  ;;  %v5872_v50 = vunpack.i.h.bf16 %v8385_v32 }
 0x6a6   : > { %v3234_v61 = vadd.f32 %v8290_v25, %v3209_v28  ;;  %v3273_v2 = vadd.f32 %v8336_v45, %v3209_v28  ;;  %3701 = vmatpush.bf16.msra.mxu3 %v3650_v3  ;;  %v5876_v25 = vunpack.i.l.bf16 %v8381_v13  ;;  %v5842_v45 = vunpack.i.h.bf16 %v8383_v36 }
 0x6a7   : > { %v3541_v37 = vsel %vm713_vm8, %v5862_v24, 0.0  ;;  %v3529_v0 = vsel %vm713_vm8, %v5861_v30, %v5862_v24  ;;  %v5827_v13 = vunpack.i.h.bf16 %v8357_v56  ;;  %v4804_v17 = vpack.c.bf16 %v3539_v11, %v3538_v42 }
 0x6a8   : > { %v4758_v23 = vpack.c.bf16 %v3529_v0, %v3528_v20  ;;  %v4801_v7 = vpack.c.bf16 %v3541_v37, %v3540_v5  ;;  %v3286_v4 = vadd.f32 %v8345_v57, %v3273_v2  ;;  %v3247_v10 = vadd.f32 %v8294_v48, %v3234_v61 }
 0x6a9   : > { %v3526_v57 = vsel %vm713_vm8, %v5791_v38, %v5792_v43  ;;  %v5826_v48 = vunpack.i.l.bf16 %v8357_v56  ;;  %v3489_v5 = vsel %vm672_vm10, %v5876_v25, %v5877_v8  ;;  %v3488_v20 = vsel %vm672_vm10, %v5841_v53, %v5842_v45 }
 0x6aa   : > { %v3299_v15 = vadd.f32 %v8361_v39, %v3286_v4  ;;  %4759 = vmatpush.bf16.msk.msra.mxu3 %vm6292_vm2, %v4758_v23  ;;  %4802 = vmatpush.bf16.msk.msrb.mxu2 %vm6401_vm11, %v4801_v7  ;;  %v3260_v36 = vadd.f32 %v8359_v14, %v3247_v10  ;;  %v4761_v59 = vpack.c.bf16 %v3527_v51, %v3526_v57  ;;  %v5871_v39 = vunpack.i.l.bf16 %v8385_v32  ;;  %v4727_v23 = vld [vmem:[%s8632_s5 + $0x8] sm:$0xf] }
 0x6ab   : > { %v5797_v14 = vunpack.i.h.bf16 %v8234_v55  ;;  %v5796_v30 = vunpack.i.l.bf16 %v8234_v55  ;;  %v3501_v28 = vsel %vm672_vm10, %v5877_v8, 0.0  ;;  %v3500_v32 = vsel %vm672_vm10, %v5842_v45, 0.0  ;;  %v5895_v8 = vpop.permute.xlu1 %5894 }
 0x6ac   : > { %3303 = vst [vmem:[%s8446_s23 + $0x8] sm:$0xff] %v3299_v15  ;;  %v5880_v3 = vpop.permute.xlu0 %5879  ;;  %v5802_v43 = vunpack.i.h.bf16 %v8274_v46  ;;  %v5801_v38 = vunpack.i.l.bf16 %v8274_v46  ;;  %v3600_v61 = vsel %vm787_vm7, %v5846_v52, %v5847_v6  ;;  %v3499_v55 = vsel %vm672_vm10, %v5827_v13, 0.0  ;;  %v4864_v46 = vld [vmem:[%s8632_s5 + $0x10] sm:$0x10] }
 0x6ad   : > { %3302 = vst [vmem:[%s8446_s23] sm:$0xff] %v3260_v36  ;;  %v5882_v56 = vunpack.i.h.bf16 %v5880_v3  ;;  %v5881_v24 = vunpack.i.l.bf16 %v5880_v3  ;;  %v3487_v11 = vsel %vm672_vm10, %v5826_v48, %v5827_v13  ;;  %v4764_v51 = vpack.c.bf16 %v3489_v5, %v3488_v20 }
 0x6ae   : > { %4762 = vmatpush.bf16.msk.msra.mxu3 %vm6292_vm2, %v4761_v59  ;;  %4805 = vmatpush.bf16.msk.msrb.mxu2 %vm6401_vm11, %v4804_v17  ;;  %v4807_v0 = vpack.c.bf16 %v3501_v28, %v3500_v32  ;;  %v3599_v33 = vsel %vm787_vm7, %v5871_v39, %v5872_v50  ;;  %v3498_v7 = vsel %vm672_vm10, %v5797_v14, 0.0  ;;  %v3486_v4 = vsel %vm672_vm10, %v5796_v30, %v5797_v14 }
 0x6af   : > { %v3601_v2 = vsel %vm787_vm7, %v5881_v24, %v5882_v56  ;;  %v3613_v25 = vsel %vm787_vm7, %v5882_v56, 0.0  ;;  %v3598_v45 = vsel %vm787_vm7, %v5801_v38, %v5802_v43  ;;  %v3612_v53 = vsel %vm787_vm7, %v5847_v6, 0.0 }
 0x6b0   : > { %v4770_v37 = vpack.c.bf16 %v3601_v2, %v3600_v61  ;;  %v4767_v10 = vpack.c.bf16 %v3487_v11, %v3486_v4  ;;  %v4810_v52 = vpack.c.bf16 %v3499_v55, %v3498_v7  ;;  %v3611_v42 = vsel %vm787_vm7, %v5872_v50, 0.0 }
 0x6b1   : > { %v4773_v15 = vpack.c.bf16 %v3599_v33, %v3598_v45  ;;  %v5897_v57 = vunpack.i.h.bf16 %v5895_v8  ;;  %v4728_v48 = vor.u32 %v4864_v46, %v4727_v23  ;;  %v5896_v36 = vunpack.i.l.bf16 %v5895_v8 }
 0x6b2   : > { %4765 = vmatpush.bf16.msk.msra.mxu3 %vm6320_vm5, %v4764_v51  ;;  %4771 = vmatpush.bf16.msk.msrb.mxu0 %vm6320_vm5, %v4770_v37  ;;  %v4813_v59 = vpack.c.bf16 %v3613_v25, %v3612_v53  ;;  %v3610_v6 = vsel %vm787_vm7, %v5802_v43, 0.0  ;;  %v5901_v56 = vunpack.i.l.bf16 %v8395_v63 }
 0x6b3   : > { %4808 = vmatpush.bf16.msk.msrb.mxu2 %vm6459_vm3, %v4807_v0  ;;  %v4816_v5 = vpack.c.bf16 %v3611_v42, %v3610_v6  ;;  %v3336_v24 = vsel %vm508_vm14, %v5781_v34, %v5896_v36  ;;  %v3337_v14 = vsel %vm508_vm14, %v5782_v27, %v5897_v57 }
 0x6b4   : > { %v5885_v13 = vpop.permute.xlu0 %5884  ;;  %v4789_v18 = vpack.c.bf16 %v3337_v14, %v3336_v24 }
 0x6b5   : > { %v5887_v17 = vunpack.i.h.bf16 %v5885_v13  ;;  %v5886_v39 = vunpack.i.l.bf16 %v5885_v13 }
 0x6b6   : > { %4768 = vmatpush.bf16.msk.msra.mxu3 %vm6320_vm5, %v4767_v10  ;;  %4774 = vmatpush.bf16.msk.msrb.mxu0 %vm6320_vm5, %v4773_v15 }
 0x6b7   : > { %4811 = vmatpush.bf16.msk.msrb.mxu2 %vm6459_vm3, %v4810_v52  ;;  %v3374_v50 = vsel %vm553_vm6, %v5756_v26, %v5886_v39  ;;  %v3375_v3 = vsel %vm553_vm6, %v5757_v60, %v5887_v17  ;;  %v4721_v60 = vld [vmem:[%s8632_s5 + $0xc] sm:$0x10] }
 0x6b8   : > { %v3627_v20 = vpack.c.bf16 %v3375_v3, %v3374_v50  ;;  %v4724_v29 = vor.u32 %v4862_v41, %v4721_v60 }
 0x6b9   : > { %4775 = vmatmul.msk.bf16.vlgmr.msrb.gmra.mxu0 %vm898_vm12, %v4728_v48 }
 0x6ba   : > { %4814 = vmatpush.bf16.msk.msra.mxu0 %vm6459_vm3, %v4813_v59  ;;  %3706 = vmatpush.bf16.msra.mxu3 %v3640_v31  ;;  %v3334_v31 = vsel %vm508_vm14, %v5761_v62, %v5901_v56 }
 0x6bb   : > { %3733 = vmatpush.bf16.msrb.mxu1 %v3627_v20  ;;  %3748 = vmatpush.bf16.msrb.mxu2 %v3641_v19  ;;  %v4792_v22 = vpack.c.bf16 %v3335_v49, %v3334_v31 }
 0x6be   : > { %4817 = vmatpush.bf16.msk.msra.mxu0 %vm6459_vm3, %v4816_v5  ;;  %3707 = vmatpush.bf16.msra.mxu3 %v8812_v21 }
 0x6bf   : > { %4790 = vmatpush.bf16.msk.msrb.mxu1 %vm6401_vm11, %v4789_v18  ;;  %3749 = vmatpush.bf16.msrb.mxu2 %v8813_v58 }
 0x6c1   : > { %3708 = vmatmul.bf16.vlgmr.msra.gmra.mxu3 %v4724_v29 }
 0x6c2   : > { %3750 = vmatmul.bf16.vlgmr.msrb.gmra.mxu2 %v4724_v29 }
 0x6c3   : > { %4793 = vmatpush.bf16.msk.msrb.mxu1 %vm6401_vm11, %v4792_v22 }
 0x6c6   : > { %3736 = vmatmul.bf16.vlgmr.msrb.gmra.mxu1 %v8332_v40 }
 0x6c9   : > { %4818 = vmatmul.msk.bf16.vlgmr.msra.gmra.mxu0 %vm898_vm12, %v4728_v48 }
 0x6ca   : > { %5960 = shalt.err (!%p5957_p8)
}
 0x6cb   : > { %s8700_s1 = smov 256   ;;  %s3855_s2 = sshll.u32 %s3852_s22, 4  ;;  %s8570_s2 = int_to_ptr.hbm [resolvable:$true] %s3855_s2 }
 0x6cc   : > { %4873 = dma.vmem_to_hbm [thread:$0]  (%p6174_p5), %s3837_s25, 1024, %s3839_s30, %s8554_s20, %s8700_s1, %s8700_s1, %s8768_s29  }
 0x6cd   : > { %s3817_s14 = scalar_lea.hbm %s8635_s8, %s4865_s17  ;;  %s3819_s12 = sshll.u32 %s8446_s23, 4  ;;  %s3820_s12 = int_to_ptr.vmem [resolvable:$true] %s3819_s12 }
 0x6ce   : > { %s3821_s18 = sshll.u32 %s3817_s14, 4  ;;  %s3791_s26 = scalar_lea.sflag [#allocation4], %s7449_s28  ;;  %s3822_s18 = int_to_ptr.hbm [resolvable:$true] %s3821_s18 }
 0x6cf   : > { %s5975_s19 = sshra.s32 %s3822_s18, 4  ;;  %s5981_s22 = scalar_lea.hbm %s8635_s8, 32  ;;  %s5976_s19 = int_to_ptr.hbm [resolvable:$true] %s5975_s19 }
 0x6d0   : > { %s5977_s21 = scalar_lea.hbm %s5976_s19, 16  ;;  %p5982_p12 = scmp.lt.s32.totalorder %s5976_s19, %s8635_s8 }
 0x6d1   : > { %p5978_p9 = scmp.ne.s32.totalorder %s5976_s19, %s5977_s21  ;;  %p5983_p13 = scmp.lt.s32.totalorder %s5981_s22, %s5977_s21 }
 0x6d3   : > { %p5979_p10 = pnand %p5978_p9, %p6174_p5  ;;  %p5984_p0 = por %p5983_p13, %p5982_p12 }
 0x6d5   : > { %p5980_p11 = pneg %p5979_p10 }
 0x6d7   : > { %p5985_p1 = pnand %p5984_p0, %p5980_p11 }
 0x6d9   : > { %5988 = shalt.err (!%p5985_p1)
}
 0x6da   : > { %4872 = dma.vmem_to_hbm [thread:$0]  (%p6174_p5), %s3820_s12, 256, %s3822_s18, %s3791_s26  }
 0x6db   : > { %s6003_s28 = sshra.s32 %s8570_s2, 4  ;;  %s6009_s1 = scalar_lea.hbm %s8638_s11, 128  ;;  %s6004_s28 = int_to_ptr.hbm [resolvable:$true] %s6003_s28 }
 0x6dc   : > { %s6005_s23 = scalar_lea.hbm %s6004_s28, 64  ;;  %p6010_p7 = scmp.lt.s32.totalorder %s6004_s28, %s8638_s11 }
 0x6dd   : > { %p6006_p2 = scmp.ne.s32.totalorder %s6004_s28, %s6005_s23  ;;  %p6011_p8 = scmp.lt.s32.totalorder %s6009_s1, %s6005_s23 }
 0x6df   : > { %p6007_p3 = pnand %p6006_p2, %p6174_p5  ;;  %p6012_p9 = por %p6011_p8, %p6010_p7 }
 0x6e1   : > { %p6008_p4 = pneg %p6007_p3 }
 0x6e3   : > { %p6013_p10 = pnand %p6012_p9, %p6008_p4 }
 0x6e5   : > { %6016 = shalt.err (!%p6013_p10)
}
 0x6e6   : > { %s8814_s12 = smov 256   ;;  %v3661_v16 = vpop.permute.xlu0 %3660  ;;  %s4831_s18 = sshll.u32 %s6196_s24, 5  ;;  %v3666_v62 = vpop.permute.xlu1 %3665 }
 0x6e7   : > { %4874 = dma.vmem_to_hbm [thread:$0]  (%p6174_p5), %s8543_s16, 1024, %s8570_s2, %s8554_s20, %s8814_s12, %s8814_s12, %s8768_s29  }
 0x6e8   : > { %s431_s29 = scalar_lea.vmem %s8636_s9, %s4831_s18 }
 0x6ee   : > { %v3775_v28 = vpop.permute.xlu0 %3774  ;;  %v3780_v23 = vpop.permute.xlu1 %3779 }
 0x70c   : > { %v3695_v44 = vpop.f32.mrf.mxu2 }
 0x70d   : > { %v3696_v12 = vadd.f32 %v3695_v44, %v3661_v16 }
 0x714   : > { %v3697_v9 = vpop.f32.mrf.mxu2 }
 0x715   : > { %v3698_v2 = vadd.f32 %v3697_v9, %v3666_v62 }
 0x736   : > { %v3723_v35 = vpop.f32.mrf.mxu0 }
 0x73e   : > { %v3725_v1 = vpop.f32.mrf.mxu0 }
 0x743   : > { %v3737_v19 = vpop.f32.mrf.mxu1 }
 0x744   : > { %v3738_v26 = vadd.f32 %v3737_v19, %v3661_v16  ;;  %v3709_v27 = vpop.f32.mrf.mxu3 }
 0x745   : > { %v3710_v34 = vadd.f32 %v3709_v27, %v3696_v12  ;;  %v3751_v54 = vpop.f32.mrf.mxu2 }
 0x746   : > { %v3752_v40 = vadd.f32 %v3751_v54, %v3738_v26  ;;  %v3765_v63 = vpop.f32.mrf.mxu0 }
 0x747   : > { %v3724_v30 = vadd.f32 %v3723_v35, %v3710_v34 }
 0x748   : > { %v3766_v32 = vadd.f32 %v3765_v63, %v3752_v40 }
 0x749   : > { %v3782_v43 = vmul.f32 %v3775_v28, %v3724_v30 }
 0x74a   : > { %v3783_v38 = vmul.f32 %v3775_v28, %v3766_v32 }
 0x74b   : > { %v3739_v61 = vpop.f32.mrf.mxu1  ;;  %3786 = vst [vmem:[%s431_s29] sm:$0xff] %v3782_v43 }
 0x74c   : > { %v3740_v55 = vadd.f32 %v3739_v61, %v3666_v62  ;;  %3787 = vst [vmem:[%s431_s29 + $0x8] sm:$0xff] %v3783_v38  ;;  %v3711_v11 = vpop.f32.mrf.mxu3 }
 0x74d   : > { %v3712_v51 = vadd.f32 %v3711_v11, %v3698_v2  ;;  %v3753_v37 = vpop.f32.mrf.mxu2 }
 0x74e   : > { %v3754_v0 = vadd.f32 %v3753_v37, %v3740_v55  ;;  %v3767_v33 = vpop.f32.mrf.mxu0 }
 0x74f   : > { %v3726_v8 = vadd.f32 %v3725_v1, %v3712_v51 }
 0x750   : > { %v3768_v46 = vadd.f32 %v3767_v33, %v3754_v0 }
 0x751   : > { %v3784_v7 = vmul.f32 %v3780_v23, %v3726_v8 }
 0x752   : > { %v3785_v4 = vmul.f32 %v3780_v23, %v3768_v46 }
 0x753   : > { %3788 = vst [vmem:[%s431_s29 + $0x10] sm:$0x1] %v3784_v7 }
 0x754   : > { %3789 = vst [vmem:[%s431_s29 + $0x18] sm:$0x1] %v3785_v4 }
 0x755 PF: > { %s8815_s24 = sld [smem:[#allocation15_spill]] }
 0x756   : > { %s8816_s16 = sld [smem:[#allocation12_spill]] }
 0x75b   : > { %p4894_p5 = scmp.ge.s32.totalorder %s8815_s24, 2 }
 0x75c   : > { %s3870_s2 = sand.u32 1, %s8816_s16  }
 0x75d   : > { %p4883_p11 = pnand %p4894_p5, %p6178_p6  ;;  %s3871_s19 = scalar_lea.sflag [#allocation4], %s3870_s2 }
 0x75f   : > { %p4884_p12 = pneg %p4883_p11 }
 0x761   : > { %6038 = dma.done.wait (%p4884_p12), %s3871_s19, 256  }
 0x762   : > { %6040 = vsyncadd (%p4884_p12), %s3871_s19, 4294967040  ;;  %s8818_s21 = sadd.s32 4294967294, %s8815_s24  }
 0x763   : > { %s3888_s25 = sand.u32 1, %s8818_s21  }
 0x764   : > { %s3889_s30 = scalar_lea.sflag [#allocation7], %s3888_s25 }
 0x765   : > { %6042 = dma.done.wait (%p4884_p12), %s3889_s30, 2048  }
 0x766   : > { %6044 = vsyncadd (%p4884_p12), %s3889_s30, 4294965248  ;;  %s8819_s20 = sld [smem:[#allocation16_spill]] }
 0x767   : > { %s8820_s17 = sld [smem:[#allocation13_spill]] }
 0x768   : > { %s8821_s18 = sld [smem:[#allocation14_spill]] }
 0x769   : > { %s8822_s19 = sld [smem:[#allocation17_spill]] }
 0x76c   : > { %p26_p13 = scmp.ge.s32.totalorder %s8819_s20, 4  }
 0x76e   :  { %28 = sbr.rel (!%p26_p13) target bundleno = 10 (0xa), region = 144 }
 0x773   :  { %3905 = vsyncpa [#allocation3], 1 }
 0x774   :  { %3907 = vsyncpa [#allocation3 + $0x1], 1 }
 0x775   :  { %3908 = vsyncpa [#allocation4], 1 }
 0x776   :  { %3910 = vsyncpa [#allocation4 + $0x1], 1 }
 0x777   :  { %3911 = vsyncpa [#allocation7], 1 }
 0x778   :  { %3913 = vsyncpa [#allocation7 + $0x1], 1 }

</bundles_post_ra>
